<compile_context>
chip_gen: v7x
topology: tpu7x:2x2x1
jax: 0.10.0
libtpu: 0.0.40
codegen_flags: <defaults>
</compile_context>

<pallas_src>
import jax
import jax.numpy as jnp
from jax.experimental import pallas as pl
from jax.experimental.pallas import tpu as pltpu


def _sigmoid_mul_conv1x1_kernel(s_ref, x_ref, w_ref, o_ref):
    # per-channel sigmoid gate (EUP) -> lane-broadcast multiply (VPU)
    # -> 1x1 conv as MXU matmul (bf16 operands, f32 accumulate)
    gate = jax.nn.sigmoid(s_ref[...].astype(jnp.float32))               # (C_in, 1)
    xs = (x_ref[...].astype(jnp.float32) * gate).astype(jnp.bfloat16)   # (C_in, HW)
    acc = jnp.dot(w_ref[...], xs, preferred_element_type=jnp.float32)   # (blk, HW)
    o_ref[...] = acc.astype(o_ref.dtype)


def sigmoid_mul_conv2d(x329_nchw, x333_nchw, weight_oihw, *, block_cout=128):
    """Replicates: y = Conv2d(C_in, C_out, 1x1, bias=False)(x329 * sigmoid(x333)).

    x329_nchw:   (1, C_in, H, W)
    x333_nchw:   (1, C_in, 1, 1)
    weight_oihw: (C_out, C_in, 1, 1)
    returns:     (1, C_out, H, W)
    """
    N, C_in, H, W = x329_nchw.shape
    C_out = weight_oihw.shape[0]
    assert N == 1, "kernel assumes batch=1 (matches module's fixed shapes)"
    HW = H * W

    # Pure reshapes only (NCHW stays NCHW) -- no XLA-side transposes.
    x_mat = x329_nchw.reshape(C_in, HW)                       # (C_in, HW)
    s_mat = x333_nchw.reshape(C_in, 1)                        # (C_in, 1)
    # Weight as (C_out, C_in); bf16 halves the dominant DMA and is MXU-native.
    w_mat = weight_oihw.reshape(C_out, C_in).astype(jnp.bfloat16)

    n_blocks = pl.cdiv(C_out, block_cout)                     # 232 -> 2 blocks of 128

    out_mat = pl.pallas_call(
        _sigmoid_mul_conv1x1_kernel,
        out_shape=jax.ShapeDtypeStruct((C_out, HW), x329_nchw.dtype),
        grid=(n_blocks,),
        in_specs=[
            # gate and x are tiny and shared by every C_out block (index_map
            # constant -> stays resident, no re-DMA across grid steps)
            pl.BlockSpec((C_in, 1), lambda i: (0, 0)),
            pl.BlockSpec((C_in, HW), lambda i: (0, 0)),
            # weight split along C_out so each TensorCore (v7x) loads half
            pl.BlockSpec((block_cout, C_in), lambda i: (i, 0)),
        ],
        out_specs=pl.BlockSpec((block_cout, HW), lambda i: (i, 0)),
        compiler_params=pltpu.CompilerParams(
            dimension_semantics=("parallel",)),
    )(s_mat, x_mat, w_mat)

    # (C_out, HW) -> (1, C_out, H, W): pure reshape, already NCHW
    return out_mat.reshape(N, C_out, H, W)


if __name__ == "__main__":
    key = jax.random.PRNGKey(0)
    k1, k2, k3 = jax.random.split(key, 3)

    # Shapes fixed by the module: Conv2d(1392, 232, 1x1) on a 1x1392x7x7 input.
    N, C_in, H, W, C_out = 1, 1392, 7, 7, 232
    x329 = jax.random.normal(k1, (N, C_in, H, W), dtype=jnp.float32)
    x333 = jax.random.normal(k2, (N, C_in, 1, 1), dtype=jnp.float32)
    weight = jax.random.normal(k3, (C_out, C_in, 1, 1), dtype=jnp.float32) * 0.02

    out = sigmoid_mul_conv2d(x329, x333, weight)
    out = jax.block_until_ready(out)

    # pure-JAX f32 reference of the same forward pass
    gated = x329 * jax.nn.sigmoid(x333)
    ref = jax.lax.conv_general_dilated(
        gated, weight, window_strides=(1, 1), padding="VALID",
        dimension_numbers=("NCHW", "OIHW", "NCHW"))

    assert out.shape == (N, C_out, H, W)
    # bf16 operands with f32 accumulation over K=1392 -> slightly looser tolerance
    assert jnp.allclose(out, ref, atol=1e-2, rtol=1e-2), (
        float(jnp.max(jnp.abs(out - ref))))

    print("KERNEL_OK")
</pallas_src>

<mosaic_0001>
module attributes {stable_mosaic.version = 11 : i64} {
  func.func @_sigmoid_mul_conv1x1_kernel(%arg0: i32, %arg1: memref<1392x1xf32, #tpu.memory_space<vmem>>, %arg2: memref<1392x49xf32, #tpu.memory_space<vmem>>, %arg3: memref<128x1392xbf16, #tpu.memory_space<vmem>>, %arg4: memref<128x49xf32, #tpu.memory_space<vmem>>) attributes {dimension_semantics = [#tpu.dimension_semantics<parallel>], iteration_bounds = array<i64: 2>, scalar_prefetch = 0 : i64, scratch_operands = 0 : i64, tpu.core_type = #tpu.core_type<tc>, window_params = [{pipeline_mode = #tpu.pipeline_mode<synchronous>, transform_indices = @transform_0, window_bounds = array<i64: 1392, 1>}, {pipeline_mode = #tpu.pipeline_mode<synchronous>, transform_indices = @transform_1, window_bounds = array<i64: 1392, 49>}, {transform_indices = @transform_2, window_bounds = array<i64: 128, 1392>}, {transform_indices = @transform_3, window_bounds = array<i64: 128, 49>}]} {
    %c0 = arith.constant 0 : index
    %c0_0 = arith.constant 0 : index
    %0 = vector.load %arg1[%c0, %c0_0] : memref<1392x1xf32, #tpu.memory_space<vmem>>, vector<1392x1xf32>
    %1 = arith.negf %0 : vector<1392x1xf32>
    %2 = math.exp %1 : vector<1392x1xf32>
    %cst = arith.constant 1.000000e+00 : f32
    %3 = vector.broadcast %cst : f32 to vector<1392x1xf32>
    %4 = arith.addf %3, %2 : vector<1392x1xf32>
    %5 = arith.divf %3, %4 : vector<1392x1xf32>
    %c0_1 = arith.constant 0 : index
    %c0_2 = arith.constant 0 : index
    %6 = vector.load %arg2[%c0_1, %c0_2] : memref<1392x49xf32, #tpu.memory_space<vmem>>, vector<1392x49xf32>
    %7 = vector.broadcast %5 : vector<1392x1xf32> to vector<1392x49xf32>
    %8 = arith.mulf %6, %7 : vector<1392x49xf32>
    %9 = arith.truncf %8 : vector<1392x49xf32> to vector<1392x49xbf16>
    %c0_3 = arith.constant 0 : index
    %c0_4 = arith.constant 0 : index
    %10 = vector.load %arg3[%c0_3, %c0_4] : memref<128x1392xbf16, #tpu.memory_space<vmem>>, vector<128x1392xbf16>
    %cst_5 = arith.constant dense<0.000000e+00> : vector<128x49xf32>
    %11 = tpu.matmul %10, %9, %cst_5 {dimension_numbers = #tpu.dot_dimension_numbers<[1], [0], [0], [1], [0, 0, 1, 1], [], []>} : vector<128x1392xbf16>, vector<1392x49xbf16>, vector<128x49xf32> -> vector<128x49xf32>
    %c0_6 = arith.constant 0 : index
    %c0_7 = arith.constant 0 : index
    %12 = vector.load %arg4[%c0_6, %c0_7] : memref<128x49xf32, #tpu.memory_space<vmem>>, vector<128x49xf32>
    tpu.vector_store %arg4[%c0_6, %c0_7], %11 {strides = array<i32>} : memref<128x49xf32, #tpu.memory_space<vmem>>, vector<128x49xf32>,
    return
  }
  func.func @transform_0(%arg0: i32) -> (i32, i32) {
    %c0_i32 = arith.constant 0 : i32
    %c0_i32_0 = arith.constant 0 : i32
    %c0_i32_1 = arith.constant 0 : i32
    return %c0_i32, %c0_i32_0 : i32, i32
  }
  func.func @transform_1(%arg0: i32) -> (i32, i32) {
    %c0_i32 = arith.constant 0 : i32
    %c0_i32_0 = arith.constant 0 : i32
    %c0_i32_1 = arith.constant 0 : i32
    return %c0_i32, %c0_i32_0 : i32, i32
  }
  func.func @transform_2(%arg0: i32) -> (i32, i32) {
    %c0_i32 = arith.constant 0 : i32
    %c0_i32_0 = arith.constant 0 : i32
    return %arg0, %c0_i32 : i32, i32
  }
  func.func @transform_3(%arg0: i32) -> (i32, i32) {
    %c0_i32 = arith.constant 0 : i32
    %c0_i32_0 = arith.constant 0 : i32
    return %arg0, %c0_i32 : i32, i32
  }
}

</mosaic_0001>

<bundles_post_ra>
// kernel: tpu_custom_call.1
= control target key start
LH: loop header
LB: loop body
LE: loop exit
PB: predicated region body
PF: predicated region fallthrough
CT: control target
= control target key end

     0   :  { %s5846_s12 = smov 0   ;;  %s5848_s13 = smov 0   ;;  %s7523_s0 = inlined_call_operand.vmem [shape: f32[1392,1], index: 0, kind: input, shape index: {}]   ;;  %s7524_s1 = inlined_call_operand.vmem [shape: f32[1392,49], index: 1, kind: input, shape index: {}]   ;;  %s7525_s2 = inlined_call_operand.vmem [shape: bf16[232,1392], index: 2, kind: input, shape index: {}]   ;;  %s7526_s3 = inlined_call_operand.vmem [shape: f32[232,49], index: 3, kind: output, shape index: {}]  }
   0x1   :  { %s5850_s14 = smov 0  }
   0x2 LB: > { %s5859_s15 = sadd.s32 4294967295, %s5791_s14   ;;  %s5861_s16 = sadd.s32 1, %s5791_s14   ;;  %s5791_s14 = sphi %s5850_s14, %s7533_s14   ;;  %s5787_s13 = sphi %s5848_s13, %s7532_s13   ;;  %s5783_s12 = sphi %s5846_s12, %s7531_s12  }
   0x3   : > { %s85_s17 = ssub.s32 %s5791_s14, %s5861_s16  ;;  %s88_s18 = sadd.s32 1, %s5787_s13 }
   0x4   : > { %p86_p0 = scmp.eq.s32.totalorder %s85_s17, 0  ;;  %p98_p1 = scmp.ne.s32.totalorder %s5787_s13, %s5783_s12 }
   0x5   : > { %p99_p2 = scmp.eq.s32.totalorder %s5859_s15, 1  ;;  %p4162_p3 = scmp.ge.s32.totalorder %s5791_s14, 1 }
   0x6   : > { %s5869_s19 = scalar_select %p86_p0, %s5787_s13, %s88_s18  }
   0x7   : > { %p5871_p4 = por %p99_p2, %p98_p1  ;;  %p149_p5 = scmp.lt.s32.totalorder %s5791_s14, 3 }
   0x9   : > { %p150_p6 = pnand %p4162_p3, %p149_p5 }
   0xa   : > { %v203_v0 = vld [vmem:[%s7523_s0 + $0x10] sm:$0xff] (!%p150_p6)  ;;  %v201_v1 = vld [vmem:[%s7523_s0] sm:$0xff] (!%p150_p6)  ;;  %v204_v2 = vld [vmem:[%s7523_s0 + $0x18] sm:$0xff] (!%p150_p6)  ;;  %v5825_v3 = vmov (!%p150_p6), 0   ;;  %s6110_s30 = sshll.u32 (!%p150_p6), %s5859_s15, 4  ;;  %vm3260_vm0 = vcmask (!%p150_p6), 916480  }
   0xb   : > { %153 = sbr.rel (%p150_p6) target bundleno = 817 (0x331), region = 32  ;;  %4912 = vset.pattern.permute.xlu1 (!%p150_p6), %v5825_v3  ;;  %4911 = vset.pattern.permute.xlu0 (!%p150_p6), %v5825_v3  ;;  %v4168_v4 = vmul.f32 (!%p150_p6), -1.442695, %v203_v0  ;;  %v4166_v5 = vmul.f32 (!%p150_p6), -1.442695, %v201_v1  ;;  %v202_v7 = vld [vmem:[%s7523_s0 + $0x8] sm:$0xff] (!%p150_p6) }
   0xc   : > { %v4169_v6 = vmul.f32 (!%p150_p6), -1.442695, %v204_v2  ;;  %v206_v8 = vld [vmem:[%s7523_s0 + $0x28] sm:$0xff] (!%p150_p6)  ;;  %v205_v9 = vld [vmem:[%s7523_s0 + $0x20] sm:$0xff] (!%p150_p6)  ;;  %v4167_v10 = vmul.f32 (!%p150_p6), -1.442695, %v202_v7 }
   0xd   : > { %5041 = vpow2.f32 (!%p150_p6), %v4168_v4  ;;  %v4171_v11 = vmul.f32 (!%p150_p6), -1.442695, %v206_v8  ;;  %v4170_v12 = vmul.f32 (!%p150_p6), -1.442695, %v205_v9  ;;  %v208_v13 = vld [vmem:[%s7523_s0 + $0x38] sm:$0xff] (!%p150_p6)  ;;  %v207_v14 = vld [vmem:[%s7523_s0 + $0x30] sm:$0xff] (!%p150_p6) }
   0xe   : > { %5043 = vpow2.f32 (!%p150_p6), %v4166_v5  ;;  %v210_v15 = vld [vmem:[%s7523_s0 + $0x48] sm:$0xff] (!%p150_p6)  ;;  %v4173_v16 = vmul.f32 (!%p150_p6), -1.442695, %v208_v13  ;;  %v4172_v17 = vmul.f32 (!%p150_p6), -1.442695, %v207_v14  ;;  %v209_v18 = vld [vmem:[%s7523_s0 + $0x40] sm:$0xff] (!%p150_p6) }
   0xf   : > { %5045 = vpow2.f32 (!%p150_p6), %v4169_v6  ;;  %v212_v19 = vld [vmem:[%s7523_s0 + $0x58] sm:$0xff] (!%p150_p6)  ;;  %v4175_v20 = vmul.f32 (!%p150_p6), -1.442695, %v210_v15  ;;  %v211_v21 = vld [vmem:[%s7523_s0 + $0x50] sm:$0xff] (!%p150_p6)  ;;  %v4174_v22 = vmul.f32 (!%p150_p6), -1.442695, %v209_v18 }
  0x10   : > { %5047 = vpow2.f32 (!%p150_p6), %v4167_v10  ;;  %v214_v23 = vld [vmem:[%s7523_s0 + $0x68] sm:$0xff] (!%p150_p6)  ;;  %v4177_v24 = vmul.f32 (!%p150_p6), -1.442695, %v212_v19  ;;  %v4176_v25 = vmul.f32 (!%p150_p6), -1.442695, %v211_v21  ;;  %v213_v46 = vld [vmem:[%s7523_s0 + $0x60] sm:$0xff] (!%p150_p6) }
  0x11   : > { %5049 = vpow2.f32 (!%p150_p6), %v4171_v11  ;;  %v4179_v26 = vmul.f32 (!%p150_p6), -1.442695, %v214_v23  ;;  %v216_v49 = vld [vmem:[%s7523_s0 + $0x78] sm:$0xff] (!%p150_p6)  ;;  %v215_v52 = vld [vmem:[%s7523_s0 + $0x70] sm:$0xff] (!%p150_p6)  ;;  %v4178_v55 = vmul.f32 (!%p150_p6), -1.442695, %v213_v46 }
  0x12   : > { %5051 = vpow2.f32 %v4170_v12  ;;  %v218_v56 = vld [vmem:[%s7523_s0 + $0x88] sm:$0xff]  ;;  %v4181_v59 = vmul.f32 -1.442695, %v216_v49  ;;  %v217_v60 = vld [vmem:[%s7523_s0 + $0x80] sm:$0xff]  ;;  %v4180_v62 = vmul.f32 -1.442695, %v215_v52 }
  0x13   : > { %5053 = vpow2.f32 %v4173_v16  ;;  %v220_v63 = vld [vmem:[%s7523_s0 + $0x98] sm:$0xff]  ;;  %v4183_v1 = vmul.f32 -1.442695, %v218_v56  ;;  %v219_v2 = vld [vmem:[%s7523_s0 + $0x90] sm:$0xff]  ;;  %v4182_v4 = vmul.f32 -1.442695, %v217_v60 }
  0x14   : > { %5055 = vpow2.f32 %v4172_v17  ;;  %v222_v5 = vld [vmem:[%s7523_s0 + $0xa8] sm:$0xff]  ;;  %v4185_v7 = vmul.f32 -1.442695, %v220_v63  ;;  %v221_v8 = vld [vmem:[%s7523_s0 + $0xa0] sm:$0xff]  ;;  %v4184_v10 = vmul.f32 -1.442695, %v219_v2 }
  0x15   : > { %5057 = vpow2.f32 %v4175_v20  ;;  %v224_v11 = vld [vmem:[%s7523_s0 + $0xb8] sm:$0xff]  ;;  %v4187_v13 = vmul.f32 -1.442695, %v222_v5  ;;  %v223_v14 = vld [vmem:[%s7523_s0 + $0xb0] sm:$0xff]  ;;  %v4186_v16 = vmul.f32 -1.442695, %v221_v8 }
  0x16   : > { %5059 = vpow2.f32 %v4174_v22  ;;  %v226_v17 = vld [vmem:[%s7523_s0 + $0xc8] sm:$0xff]  ;;  %v4189_v19 = vmul.f32 -1.442695, %v224_v11  ;;  %v225_v20 = vld [vmem:[%s7523_s0 + $0xc0] sm:$0xff]  ;;  %v4188_v22 = vmul.f32 -1.442695, %v223_v14 }
  0x17   : > { %v5042_v27 = vpop.eup %5041  ;;  %5061 = vpow2.f32 %v4177_v24  ;;  %v4191_v24 = vmul.f32 -1.442695, %v226_v17  ;;  %p184_p7 = scmp.lt.s32.totalorder %s6110_s30, 28  ;;  %vm3867_vm1 = vcmask 400384   ;;  %s4453_s24 = sshll.u32 (%p5871_p4), %s5859_s15, 7 }
  0x18   : > { %v5044_v28 = vpop.eup %5043  ;;  %v899_v29 = vadd.f32 1.0, %v5042_v27  ;;  %5063 = vpow2.f32 %v4176_v25  ;;  %s7430_s28 = scalar_lea.vmem (%p5871_p4), %s7526_s3, %s4453_s24  }
  0x19   : > { %v5046_v30 = vpop.eup %5045  ;;  %v897_v31 = vadd.f32 1.0, %v5044_v28  ;;  %5065 = vpow2.f32 %v4179_v26  ;;  %v4190_v26 = vmul.f32 -1.442695, %v225_v20  ;;  %s185_s6 = scalar_select %p184_p7, %s6110_s30, 28 }
  0x1a   : > { %v5048_v32 = vpop.eup %5047  ;;  %5067 = vrcp.f32 %v899_v29  ;;  %v900_v33 = vadd.f32 1.0, %v5046_v30 }
  0x1b   : > { %v5050_v34 = vpop.eup %5049  ;;  %5069 = vrcp.f32 %v897_v31  ;;  %v898_v35 = vadd.f32 1.0, %v5048_v32  ;;  %s4821_s11 = smul.u32 44, %s185_s6 }
  0x1c   : > { %v5052_v36 = vpop.eup %5051  ;;  %5071 = vrcp.f32 %v900_v33  ;;  %v902_v37 = vadd.f32 1.0, %v5050_v34 }
  0x1d   : > { %v5054_v38 = vpop.eup %5053  ;;  %5073 = vrcp.f32 %v898_v35  ;;  %v901_v39 = vadd.f32 1.0, %v5052_v36  ;;  %s6139_s26 = scalar_lea.vmem %s7525_s2, %s4821_s11 }
  0x1e   : > { %v5056_v40 = vpop.eup %5055  ;;  %5075 = vrcp.f32 %v902_v37  ;;  %v904_v41 = vadd.f32 1.0, %v5054_v38 }
  0x1f   : > { %v5058_v42 = vpop.eup %5057  ;;  %5077 = vrcp.f32 %v901_v39  ;;  %v903_v43 = vadd.f32 1.0, %v5056_v40 }
  0x20   : > { %v5060_v44 = vpop.eup %5059  ;;  %5079 = vrcp.f32 %v904_v41  ;;  %v906_v45 = vadd.f32 1.0, %v5058_v42 }
  0x21   : > { %v5062_v47 = vpop.eup %5061  ;;  %5081 = vrcp.f32 %v903_v43  ;;  %v905_v48 = vadd.f32 1.0, %v5060_v44 }
  0x22   : > { %v5064_v50 = vpop.eup %5063  ;;  %5083 = vrcp.f32 %v906_v45  ;;  %v908_v51 = vadd.f32 1.0, %v5062_v47  ;;  %v228_v47 = vld [vmem:[%s7523_s0 + $0xd8] sm:$0xff] }
  0x23   : > { %v5066_v53 = vpop.eup %5065  ;;  %5085 = vrcp.f32 %v905_v48  ;;  %v907_v54 = vadd.f32 1.0, %v5064_v50  ;;  %v227_v50 = vld [vmem:[%s7523_s0 + $0xd0] sm:$0xff]  ;;  %v4193_v56 = vmul.f32 -1.442695, %v228_v47 }
  0x24   : > { %v5068_v57 = vpop.eup %5067  ;;  %5087 = vrcp.f32 %v908_v51  ;;  %v910_v58 = vadd.f32 1.0, %v5066_v53  ;;  %v230_v53 = vld [vmem:[%s7523_s0 + $0xe8] sm:$0xff]  ;;  %v4192_v60 = vmul.f32 -1.442695, %v227_v50 }
  0x25   : > { %v5070_v61 = vpop.eup %5069  ;;  %1605 = vperm.xlu1 %4912, %v5068_v57   ;;  %5089 = vrcp.f32 %v907_v54  ;;  %v229_v57 = vld [vmem:[%s7523_s0 + $0xe0] sm:$0xff]  ;;  %v4195_v63 = vmul.f32 -1.442695, %v230_v53 }
  0x26   : > { %v5072_v0 = vpop.eup %5071  ;;  %1595 = vperm.xlu0 %4911, %v5070_v61   ;;  %5091 = vrcp.f32 %v910_v58  ;;  %v232_v61 = vld [vmem:[%s7523_s0 + $0xf8] sm:$0xff]  ;;  %v4194_v2 = vmul.f32 -1.442695, %v229_v57 }
  0x27   : > { %v5074_v3 = vpop.eup %5073  ;;  %5093 = vpow2.f32 %v4178_v55  ;;  %v4197_v5 = vmul.f32 -1.442695, %v232_v61 }
  0x28   : > { %v5076_v6 = vpop.eup %5075  ;;  %5095 = vpow2.f32 %v4181_v59 }
  0x29   : > { %v5078_v9 = vpop.eup %5077  ;;  %1610 = vperm.xlu1 %4912, %v5072_v0   ;;  %5097 = vpow2.f32 %v4180_v62  ;;  %v231_v0 = vld [vmem:[%s7523_s0 + $0xf0] sm:$0xff] }
  0x2a   : > { %v5080_v12 = vpop.eup %5079  ;;  %1600 = vperm.xlu0 %4911, %v5074_v3   ;;  %5099 = vpow2.f32 %v4183_v1  ;;  %v234_v3 = vld [vmem:[%s7523_s0 + $0x108] sm:$0xff]  ;;  %v4196_v8 = vmul.f32 -1.442695, %v231_v0 }
  0x2b   : > { %v5082_v15 = vpop.eup %5081  ;;  %5101 = vpow2.f32 %v4182_v4  ;;  %v4199_v11 = vmul.f32 -1.442695, %v234_v3 }
  0x2c   : > { %v5084_v18 = vpop.eup %5083  ;;  %5103 = vpow2.f32 %v4185_v7 }
  0x2d   : > { %v5086_v21 = vpop.eup %5085  ;;  %1620 = vperm.xlu1 %4912, %v5076_v6   ;;  %5105 = vpow2.f32 %v4184_v10  ;;  %v233_v6 = vld [vmem:[%s7523_s0 + $0x100] sm:$0xff] }
  0x2e   : > { %v5088_v23 = vpop.eup %5087  ;;  %1615 = vperm.xlu0 %4911, %v5078_v9   ;;  %5107 = vpow2.f32 %v4187_v13  ;;  %v236_v9 = vld [vmem:[%s7523_s0 + $0x118] sm:$0xff]  ;;  %v4198_v14 = vmul.f32 -1.442695, %v233_v6 }
  0x2f   : > { %v5090_v25 = vpop.eup %5089  ;;  %5109 = vpow2.f32 %v4186_v16  ;;  %v4201_v17 = vmul.f32 -1.442695, %v236_v9 }
  0x30   : > { %v5092_v27 = vpop.eup %5091  ;;  %5111 = vpow2.f32 %v4189_v19 }
  0x31   : > { %v5094_v28 = vpop.eup %5093  ;;  %1630 = vperm.xlu1 %4912, %v5080_v12   ;;  %5113 = vpow2.f32 %v4188_v22  ;;  %v235_v12 = vld [vmem:[%s7523_s0 + $0x110] sm:$0xff] }
  0x32   : > { %v5096_v29 = vpop.eup %5095  ;;  %1625 = vperm.xlu0 %4911, %v5082_v15   ;;  %v909_v30 = vadd.f32 1.0, %v5094_v28  ;;  %5115 = vpow2.f32 %v4191_v24  ;;  %v238_v15 = vld [vmem:[%s7523_s0 + $0x128] sm:$0xff]  ;;  %v4200_v20 = vmul.f32 -1.442695, %v235_v12 }
  0x33   : > { %v5098_v31 = vpop.eup %5097  ;;  %v912_v32 = vadd.f32 1.0, %v5096_v29  ;;  %5117 = vpow2.f32 %v4190_v26 }
  0x34   : > { %v5100_v33 = vpop.eup %5099  ;;  %5119 = vrcp.f32 %v909_v30  ;;  %v911_v34 = vadd.f32 1.0, %v5098_v31 }
  0x35   : > { %v5102_v35 = vpop.eup %5101  ;;  %1640 = vperm.xlu1 %4912, %v5084_v18   ;;  %5121 = vrcp.f32 %v912_v32  ;;  %v914_v36 = vadd.f32 1.0, %v5100_v33  ;;  %v237_v18 = vld [vmem:[%s7523_s0 + $0x120] sm:$0xff] }
  0x36   : > { %v5104_v37 = vpop.eup %5103  ;;  %1635 = vperm.xlu0 %4911, %v5086_v21   ;;  %5123 = vrcp.f32 %v911_v34  ;;  %v913_v38 = vadd.f32 1.0, %v5102_v35  ;;  %v240_v21 = vld [vmem:[%s7523_s0 + $0x138] sm:$0xff] }
  0x37   : > { %v5106_v39 = vpop.eup %5105  ;;  %5125 = vrcp.f32 %v914_v36  ;;  %v916_v40 = vadd.f32 1.0, %v5104_v37 }
  0x38   : > { %v5108_v41 = vpop.eup %5107  ;;  %5127 = vrcp.f32 %v913_v38  ;;  %v915_v42 = vadd.f32 1.0, %v5106_v39 }
  0x39   : > { %v5110_v43 = vpop.eup %5109  ;;  %1650 = vperm.xlu1 %4912, %v5088_v23   ;;  %5129 = vrcp.f32 %v916_v40  ;;  %v918_v44 = vadd.f32 1.0, %v5108_v41  ;;  %v4203_v23 = vmul.f32 -1.442695, %v238_v15 }
  0x3a   : > { %v5112_v45 = vpop.eup %5111  ;;  %1645 = vperm.xlu0 %4911, %v5090_v25   ;;  %5131 = vrcp.f32 %v915_v42  ;;  %v917_v46 = vadd.f32 1.0, %v5110_v43  ;;  %v4202_v25 = vmul.f32 -1.442695, %v237_v18 }
  0x3b   : > { %v5114_v48 = vpop.eup %5113  ;;  %5133 = vrcp.f32 %v918_v44  ;;  %v920_v49 = vadd.f32 1.0, %v5112_v45 }
  0x3c   : > { %v5116_v51 = vpop.eup %5115  ;;  %5135 = vrcp.f32 %v917_v46  ;;  %v919_v52 = vadd.f32 1.0, %v5114_v48  ;;  %v239_v48 = vld [vmem:[%s7523_s0 + $0x130] sm:$0xff] }
  0x3d   : > { %v5118_v54 = vpop.eup %5117  ;;  %1660 = vperm.xlu1 %4912, %v5092_v27   ;;  %5137 = vrcp.f32 %v920_v49  ;;  %v922_v55 = vadd.f32 1.0, %v5116_v51  ;;  %v4205_v27 = vmul.f32 -1.442695, %v240_v21  ;;  %v242_v51 = vld [vmem:[%s7523_s0 + $0x148] sm:$0xff]  ;;  %v4204_v57 = vmul.f32 -1.442695, %v239_v48 }
  0x3e   : > { %v5120_v58 = vpop.eup %5119  ;;  %5139 = vrcp.f32 %v919_v52  ;;  %v921_v59 = vadd.f32 1.0, %v5118_v54  ;;  %v241_v54 = vld [vmem:[%s7523_s0 + $0x140] sm:$0xff]  ;;  %v4207_v61 = vmul.f32 -1.442695, %v242_v51 }
  0x3f   : > { %v5122_v62 = vpop.eup %5121  ;;  %1655 = vperm.xlu0 %4911, %v5120_v58   ;;  %5141 = vrcp.f32 %v922_v55  ;;  %v244_v58 = vld [vmem:[%s7523_s0 + $0x158] sm:$0xff]  ;;  %v4206_v0 = vmul.f32 -1.442695, %v241_v54 }
  0x40   : > { %v5124_v1 = vpop.eup %5123  ;;  %5143 = vrcp.f32 %v921_v59  ;;  %v4209_v3 = vmul.f32 -1.442695, %v244_v58 }
  0x41   : > { %v5126_v4 = vpop.eup %5125  ;;  %1670 = vperm.xlu1 %4912, %v5122_v62   ;;  %5145 = vpow2.f32 %v4193_v56  ;;  %v243_v62 = vld [vmem:[%s7523_s0 + $0x150] sm:$0xff] }
  0x42   : > { %v5128_v7 = vpop.eup %5127  ;;  %5147 = vpow2.f32 %v4192_v60  ;;  %v4208_v6 = vmul.f32 -1.442695, %v243_v62 }
  0x43   : > { %v5130_v10 = vpop.eup %5129  ;;  %1665 = vperm.xlu0 %4911, %v5124_v1   ;;  %5149 = vpow2.f32 %v4195_v63  ;;  %v246_v1 = vld [vmem:[%s7523_s0 + $0x168] sm:$0xff] }
  0x44   : > { %v5132_v13 = vpop.eup %5131  ;;  %5151 = vpow2.f32 %v4194_v2  ;;  %v4211_v9 = vmul.f32 -1.442695, %v246_v1 }
  0x45   : > { %v5134_v16 = vpop.eup %5133  ;;  %1680 = vperm.xlu1 %4912, %v5126_v4   ;;  %5153 = vpow2.f32 %v4197_v5  ;;  %v245_v4 = vld [vmem:[%s7523_s0 + $0x160] sm:$0xff] }
  0x46   : > { %v5136_v19 = vpop.eup %5135  ;;  %5155 = vpow2.f32 %v4196_v8  ;;  %v4210_v12 = vmul.f32 -1.442695, %v245_v4 }
  0x47   : > { %v5138_v22 = vpop.eup %5137  ;;  %1675 = vperm.xlu0 %4911, %v5128_v7   ;;  %5157 = vpow2.f32 %v4199_v11  ;;  %v248_v7 = vld [vmem:[%s7523_s0 + $0x178] sm:$0xff] }
  0x48   : > { %v5140_v24 = vpop.eup %5139  ;;  %5159 = vpow2.f32 %v4198_v14  ;;  %v4213_v15 = vmul.f32 -1.442695, %v248_v7 }
  0x49   : > { %v5142_v26 = vpop.eup %5141  ;;  %1690 = vperm.xlu1 %4912, %v5130_v10   ;;  %5161 = vpow2.f32 %v4201_v17  ;;  %v247_v10 = vld [vmem:[%s7523_s0 + $0x170] sm:$0xff] }
  0x4a   : > { %v5144_v28 = vpop.eup %5143  ;;  %5163 = vpow2.f32 %v4200_v20  ;;  %v4212_v18 = vmul.f32 -1.442695, %v247_v10 }
  0x4b   : > { %v5146_v29 = vpop.eup %5145  ;;  %1685 = vperm.xlu0 %4911, %v5132_v13   ;;  %5165 = vpow2.f32 %v4203_v23  ;;  %v250_v13 = vld [vmem:[%s7523_s0 + $0x188] sm:$0xff] }
  0x4c   : > { %v5148_v30 = vpop.eup %5147  ;;  %v924_v31 = vadd.f32 1.0, %v5146_v29  ;;  %5167 = vpow2.f32 %v4202_v25  ;;  %v4215_v21 = vmul.f32 -1.442695, %v250_v13 }
  0x4d   : > { %v5150_v32 = vpop.eup %5149  ;;  %1700 = vperm.xlu1 %4912, %v5134_v16   ;;  %v923_v33 = vadd.f32 1.0, %v5148_v30  ;;  %5169 = vpow2.f32 %v4205_v27  ;;  %v249_v16 = vld [vmem:[%s7523_s0 + $0x180] sm:$0xff] }
  0x4e   : > { %v5152_v34 = vpop.eup %5151  ;;  %5171 = vrcp.f32 %v924_v31  ;;  %v926_v35 = vadd.f32 1.0, %v5150_v32 }
  0x4f   : > { %v5154_v36 = vpop.eup %5153  ;;  %1695 = vperm.xlu0 %4911, %v5136_v19   ;;  %5173 = vrcp.f32 %v923_v33  ;;  %v925_v37 = vadd.f32 1.0, %v5152_v34  ;;  %v252_v19 = vld [vmem:[%s7523_s0 + $0x198] sm:$0xff] }
  0x50   : > { %v5156_v38 = vpop.eup %5155  ;;  %5175 = vrcp.f32 %v926_v35  ;;  %v928_v39 = vadd.f32 1.0, %v5154_v36 }
  0x51   : > { %v5158_v40 = vpop.eup %5157  ;;  %1710 = vperm.xlu1 %4912, %v5138_v22   ;;  %5177 = vrcp.f32 %v925_v37  ;;  %v927_v41 = vadd.f32 1.0, %v5156_v38  ;;  %v251_v22 = vld [vmem:[%s7523_s0 + $0x190] sm:$0xff] }
  0x52   : > { %v5160_v42 = vpop.eup %5159  ;;  %5179 = vrcp.f32 %v928_v39  ;;  %v930_v43 = vadd.f32 1.0, %v5158_v40 }
  0x53   : > { %v5162_v44 = vpop.eup %5161  ;;  %1705 = vperm.xlu0 %4911, %v5140_v24   ;;  %5181 = vrcp.f32 %v927_v41  ;;  %v929_v45 = vadd.f32 1.0, %v5160_v42  ;;  %v4214_v24 = vmul.f32 -1.442695, %v249_v16 }
  0x54   : > { %v5164_v46 = vpop.eup %5163  ;;  %5183 = vrcp.f32 %v930_v43  ;;  %v932_v47 = vadd.f32 1.0, %v5162_v44 }
  0x55   : > { %v5166_v49 = vpop.eup %5165  ;;  %1720 = vperm.xlu1 %4912, %v5142_v26   ;;  %5185 = vrcp.f32 %v929_v45  ;;  %v931_v50 = vadd.f32 1.0, %v5164_v46  ;;  %v4217_v26 = vmul.f32 -1.442695, %v252_v19 }
  0x56   : > { %v5168_v52 = vpop.eup %5167  ;;  %5187 = vrcp.f32 %v932_v47  ;;  %v934_v53 = vadd.f32 1.0, %v5166_v49  ;;  %v254_v49 = vld [vmem:[%s7523_s0 + $0x1a8] sm:$0xff] }
  0x57   : > { %v5170_v55 = vpop.eup %5169  ;;  %1715 = vperm.xlu0 %4911, %v5144_v28   ;;  %5189 = vrcp.f32 %v931_v50  ;;  %v933_v56 = vadd.f32 1.0, %v5168_v52  ;;  %v4216_v28 = vmul.f32 -1.442695, %v251_v22  ;;  %v253_v52 = vld [vmem:[%s7523_s0 + $0x1a0] sm:$0xff]  ;;  %v4219_v58 = vmul.f32 -1.442695, %v254_v49 }
  0x58   : > { %v5172_v59 = vpop.eup %5171  ;;  %5191 = vrcp.f32 %v934_v53  ;;  %v936_v60 = vadd.f32 1.0, %v5170_v55  ;;  %v256_v55 = vld [vmem:[%s7523_s0 + $0x1b8] sm:$0xff]  ;;  %v4218_v62 = vmul.f32 -1.442695, %v253_v52 }
  0x59   : > { %v5174_v63 = vpop.eup %5173  ;;  %1730 = vperm.xlu1 %4912, %v5172_v59   ;;  %5193 = vrcp.f32 %v933_v56  ;;  %v255_v59 = vld [vmem:[%s7523_s0 + $0x1b0] sm:$0xff]  ;;  %v4221_v1 = vmul.f32 -1.442695, %v256_v55 }
  0x5a   : > { %v5176_v2 = vpop.eup %5175  ;;  %5195 = vrcp.f32 %v936_v60  ;;  %v4220_v4 = vmul.f32 -1.442695, %v255_v59 }
  0x5b   : > { %v5178_v5 = vpop.eup %5177  ;;  %1725 = vperm.xlu0 %4911, %v5174_v63   ;;  %5197 = vpow2.f32 %v4204_v57  ;;  %v258_v63 = vld [vmem:[%s7523_s0 + $0x1c8] sm:$0xff] }
  0x5c   : > { %v5180_v8 = vpop.eup %5179  ;;  %5199 = vpow2.f32 %v4207_v61  ;;  %v4223_v7 = vmul.f32 -1.442695, %v258_v63 }
  0x5d   : > { %v5182_v11 = vpop.eup %5181  ;;  %1740 = vperm.xlu1 %4912, %v5176_v2   ;;  %5201 = vpow2.f32 %v4206_v0  ;;  %v257_v2 = vld [vmem:[%s7523_s0 + $0x1c0] sm:$0xff] }
  0x5e   : > { %v5184_v14 = vpop.eup %5183  ;;  %5203 = vpow2.f32 %v4209_v3  ;;  %v4222_v10 = vmul.f32 -1.442695, %v257_v2 }
  0x5f   : > { %v5186_v17 = vpop.eup %5185  ;;  %1735 = vperm.xlu0 %4911, %v5178_v5   ;;  %5205 = vpow2.f32 %v4208_v6  ;;  %v260_v5 = vld [vmem:[%s7523_s0 + $0x1d8] sm:$0xff] }
  0x60   : > { %v5188_v20 = vpop.eup %5187  ;;  %5207 = vpow2.f32 %v4211_v9  ;;  %v4225_v13 = vmul.f32 -1.442695, %v260_v5 }
  0x61   : > { %v5190_v23 = vpop.eup %5189  ;;  %1750 = vperm.xlu1 %4912, %v5180_v8   ;;  %5209 = vpow2.f32 %v4210_v12  ;;  %v259_v8 = vld [vmem:[%s7523_s0 + $0x1d0] sm:$0xff] }
  0x62   : > { %v5192_v25 = vpop.eup %5191  ;;  %5211 = vpow2.f32 %v4213_v15  ;;  %v4224_v16 = vmul.f32 -1.442695, %v259_v8 }
  0x63   : > { %v5194_v27 = vpop.eup %5193  ;;  %1745 = vperm.xlu0 %4911, %v5182_v11   ;;  %5213 = vpow2.f32 %v4212_v18  ;;  %v262_v11 = vld [vmem:[%s7523_s0 + $0x1e8] sm:$0xff] }
  0x64   : > { %v5196_v29 = vpop.eup %5195  ;;  %5215 = vpow2.f32 %v4215_v21  ;;  %v4227_v19 = vmul.f32 -1.442695, %v262_v11 }
  0x65   : > { %v5198_v30 = vpop.eup %5197  ;;  %1760 = vperm.xlu1 %4912, %v5184_v14   ;;  %5217 = vpow2.f32 %v4214_v24  ;;  %v261_v14 = vld [vmem:[%s7523_s0 + $0x1e0] sm:$0xff] }
  0x66   : > { %v5200_v31 = vpop.eup %5199  ;;  %v935_v32 = vadd.f32 1.0, %v5198_v30  ;;  %5219 = vpow2.f32 %v4217_v26  ;;  %v4226_v22 = vmul.f32 -1.442695, %v261_v14 }
  0x67   : > { %v5202_v33 = vpop.eup %5201  ;;  %1755 = vperm.xlu0 %4911, %v5186_v17   ;;  %v938_v34 = vadd.f32 1.0, %v5200_v31  ;;  %5221 = vpow2.f32 %v4216_v28  ;;  %v264_v17 = vld [vmem:[%s7523_s0 + $0x1f8] sm:$0xff] }
  0x68   : > { %v5204_v35 = vpop.eup %5203  ;;  %5223 = vrcp.f32 %v935_v32  ;;  %v937_v36 = vadd.f32 1.0, %v5202_v33 }
  0x69   : > { %v5206_v37 = vpop.eup %5205  ;;  %1770 = vperm.xlu1 %4912, %v5188_v20   ;;  %5225 = vrcp.f32 %v938_v34  ;;  %v940_v38 = vadd.f32 1.0, %v5204_v35  ;;  %v263_v20 = vld [vmem:[%s7523_s0 + $0x1f0] sm:$0xff] }
  0x6a   : > { %v5208_v39 = vpop.eup %5207  ;;  %5227 = vrcp.f32 %v937_v36  ;;  %v939_v40 = vadd.f32 1.0, %v5206_v37 }
  0x6b   : > { %v5210_v41 = vpop.eup %5209  ;;  %1765 = vperm.xlu0 %4911, %v5190_v23   ;;  %5229 = vrcp.f32 %v940_v38  ;;  %v942_v42 = vadd.f32 1.0, %v5208_v39  ;;  %v282_v23 = vld [vmem:[%s7523_s0 + $0x288] sm:$0xff] }
  0x6c   : > { %v5212_v43 = vpop.eup %5211  ;;  %5231 = vrcp.f32 %v939_v40  ;;  %v941_v44 = vadd.f32 1.0, %v5210_v41 }
  0x6d   : > { %v5214_v45 = vpop.eup %5213  ;;  %1780 = vperm.xlu1 %4912, %v5192_v25   ;;  %5233 = vrcp.f32 %v942_v42  ;;  %v944_v46 = vadd.f32 1.0, %v5212_v43  ;;  %v4229_v25 = vmul.f32 -1.442695, %v264_v17 }
  0x6e   : > { %v5216_v47 = vpop.eup %5215  ;;  %5235 = vrcp.f32 %v941_v44  ;;  %v943_v48 = vadd.f32 1.0, %v5214_v45 }
  0x6f   : > { %v5218_v50 = vpop.eup %5217  ;;  %1775 = vperm.xlu0 %4911, %v5194_v27   ;;  %5237 = vrcp.f32 %v944_v46  ;;  %v946_v51 = vadd.f32 1.0, %v5216_v47  ;;  %v4228_v27 = vmul.f32 -1.442695, %v263_v20 }
  0x70   : > { %v5220_v53 = vpop.eup %5219  ;;  %5239 = vrcp.f32 %v943_v48  ;;  %v945_v54 = vadd.f32 1.0, %v5218_v50  ;;  %v281_v50 = vld [vmem:[%s7523_s0 + $0x280] sm:$0xff] }
  0x71   : > { %v5222_v56 = vpop.eup %5221  ;;  %1790 = vperm.xlu1 %4912, %v5196_v29   ;;  %5241 = vrcp.f32 %v946_v51  ;;  %v948_v57 = vadd.f32 1.0, %v5220_v53  ;;  %v4247_v29 = vmul.f32 -1.442695, %v282_v23  ;;  %v266_v53 = vld [vmem:[%s7523_s0 + $0x208] sm:$0xff]  ;;  %v4246_v59 = vmul.f32 -1.442695, %v281_v50 }
  0x72   : > { %v5224_v60 = vpop.eup %5223  ;;  %5243 = vrcp.f32 %v945_v54  ;;  %v947_v61 = vadd.f32 1.0, %v5222_v56  ;;  %v265_v56 = vld [vmem:[%s7523_s0 + $0x200] sm:$0xff]  ;;  %v4231_v63 = vmul.f32 -1.442695, %v266_v53 }
  0x73   : > { %v5226_v0 = vpop.eup %5225  ;;  %1785 = vperm.xlu0 %4911, %v5224_v60   ;;  %5245 = vrcp.f32 %v948_v57  ;;  %v284_v60 = vld [vmem:[%s7523_s0 + $0x298] sm:$0xff]  ;;  %v4230_v2 = vmul.f32 -1.442695, %v265_v56 }
  0x74   : > { %v5228_v3 = vpop.eup %5227  ;;  %5247 = vrcp.f32 %v947_v61  ;;  %v4249_v5 = vmul.f32 -1.442695, %v284_v60 }
  0x75   : > { %v5230_v6 = vpop.eup %5229  ;;  %1800 = vperm.xlu1 %4912, %v5226_v0   ;;  %5249 = vpow2.f32 %v4219_v58  ;;  %v283_v0 = vld [vmem:[%s7523_s0 + $0x290] sm:$0xff] }
  0x76   : > { %v5232_v9 = vpop.eup %5231  ;;  %5251 = vpow2.f32 %v4218_v62  ;;  %v4248_v8 = vmul.f32 -1.442695, %v283_v0 }
  0x77   : > { %v5234_v12 = vpop.eup %5233  ;;  %1795 = vperm.xlu0 %4911, %v5228_v3   ;;  %5253 = vpow2.f32 %v4221_v1  ;;  %v268_v3 = vld [vmem:[%s7523_s0 + $0x218] sm:$0xff] }
  0x78   : > { %v5236_v15 = vpop.eup %5235  ;;  %5255 = vpow2.f32 %v4220_v4  ;;  %v4233_v11 = vmul.f32 -1.442695, %v268_v3  ;;  %v274_v3 = vld [vmem:[%s7523_s0 + $0x248] sm:$0xff] }
  0x79   : > { %v5238_v18 = vpop.eup %5237  ;;  %1810 = vperm.xlu1 %4912, %v5230_v6   ;;  %5257 = vpow2.f32 %v4223_v7  ;;  %v267_v6 = vld [vmem:[%s7523_s0 + $0x210] sm:$0xff] }
  0x7a   : > { %v5240_v21 = vpop.eup %5239  ;;  %5259 = vpow2.f32 %v4222_v10  ;;  %v4232_v14 = vmul.f32 -1.442695, %v267_v6 }
  0x7b   : > { %v5242_v24 = vpop.eup %5241  ;;  %1805 = vperm.xlu0 %4911, %v5232_v9   ;;  %5261 = vpow2.f32 %v4225_v13  ;;  %v286_v9 = vld [vmem:[%s7523_s0 + $0x2a8] sm:$0xff] }
  0x7c   : > { %v5244_v26 = vpop.eup %5243  ;;  %5263 = vpow2.f32 %v4224_v16  ;;  %v4251_v17 = vmul.f32 -1.442695, %v286_v9 }
  0x7d   : > { %v5246_v28 = vpop.eup %5245  ;;  %1820 = vperm.xlu1 %4912, %v5234_v12   ;;  %5265 = vpow2.f32 %v4227_v19  ;;  %v285_v12 = vld [vmem:[%s7523_s0 + $0x2a0] sm:$0xff] }
  0x7e   : > { %v5248_v30 = vpop.eup %5247  ;;  %5267 = vpow2.f32 %v4226_v22  ;;  %v4250_v20 = vmul.f32 -1.442695, %v285_v12 }
  0x7f   : > { %v5250_v31 = vpop.eup %5249  ;;  %1815 = vperm.xlu0 %4911, %v5236_v15   ;;  %5269 = vpow2.f32 %v4229_v25  ;;  %v270_v15 = vld [vmem:[%s7523_s0 + $0x228] sm:$0xff] }
  0x80   : > { %v5252_v32 = vpop.eup %5251  ;;  %v950_v33 = vadd.f32 1.0, %v5250_v31  ;;  %5271 = vpow2.f32 %v4228_v27  ;;  %v4235_v23 = vmul.f32 -1.442695, %v270_v15  ;;  %v291_v15 = vld [vmem:[%s7523_s0 + $0x2d0] sm:$0xff] }
  0x81   : > { %v5254_v34 = vpop.eup %5253  ;;  %1830 = vperm.xlu1 %4912, %v5238_v18   ;;  %v949_v35 = vadd.f32 1.0, %v5252_v32  ;;  %5273 = vpow2.f32 %v4247_v29  ;;  %v269_v18 = vld [vmem:[%s7523_s0 + $0x220] sm:$0xff] }
  0x82   : > { %v5256_v36 = vpop.eup %5255  ;;  %5275 = vrcp.f32 %v950_v33  ;;  %v952_v37 = vadd.f32 1.0, %v5254_v34 }
  0x83   : > { %v5258_v38 = vpop.eup %5257  ;;  %1825 = vperm.xlu0 %4911, %v5240_v21   ;;  %5277 = vrcp.f32 %v949_v35  ;;  %v951_v39 = vadd.f32 1.0, %v5256_v36  ;;  %v288_v21 = vld [vmem:[%s7523_s0 + $0x2b8] sm:$0xff] }
  0x84   : > { %v5260_v40 = vpop.eup %5259  ;;  %5279 = vrcp.f32 %v952_v37  ;;  %v954_v41 = vadd.f32 1.0, %v5258_v38 }
  0x85   : > { %v5262_v42 = vpop.eup %5261  ;;  %1840 = vperm.xlu1 %4912, %v5242_v24   ;;  %5281 = vrcp.f32 %v951_v39  ;;  %v953_v43 = vadd.f32 1.0, %v5260_v40  ;;  %v287_v24 = vld [vmem:[%s7523_s0 + $0x2b0] sm:$0xff] }
  0x86   : > { %v5264_v44 = vpop.eup %5263  ;;  %5283 = vrcp.f32 %v954_v41  ;;  %v956_v45 = vadd.f32 1.0, %v5262_v42 }
  0x87   : > { %v5266_v46 = vpop.eup %5265  ;;  %1835 = vperm.xlu0 %4911, %v5244_v26   ;;  %5285 = vrcp.f32 %v953_v43  ;;  %v955_v47 = vadd.f32 1.0, %v5264_v44  ;;  %v4234_v26 = vmul.f32 -1.442695, %v269_v18 }
  0x88   : > { %v5268_v48 = vpop.eup %5267  ;;  %5287 = vrcp.f32 %v956_v45  ;;  %v958_v49 = vadd.f32 1.0, %v5266_v46 }
  0x89   : > { %v5270_v51 = vpop.eup %5269  ;;  %1850 = vperm.xlu1 %4912, %v5246_v28   ;;  %5289 = vrcp.f32 %v955_v47  ;;  %v957_v52 = vadd.f32 1.0, %v5268_v48  ;;  %v4253_v28 = vmul.f32 -1.442695, %v288_v21 }
  0x8a   : > { %v5272_v54 = vpop.eup %5271  ;;  %5291 = vrcp.f32 %v958_v49  ;;  %v960_v55 = vadd.f32 1.0, %v5270_v51  ;;  %v272_v51 = vld [vmem:[%s7523_s0 + $0x238] sm:$0xff] }
  0x8b   : > { %v5274_v57 = vpop.eup %5273  ;;  %1845 = vperm.xlu0 %4911, %v5248_v30   ;;  %5293 = vrcp.f32 %v957_v52  ;;  %v959_v58 = vadd.f32 1.0, %v5272_v54  ;;  %v4252_v30 = vmul.f32 -1.442695, %v287_v24  ;;  %v271_v54 = vld [vmem:[%s7523_s0 + $0x230] sm:$0xff]  ;;  %v4256_v24 = vmul.f32 -1.442695, %v291_v15 }
  0x8c   : > { %v5276_v61 = vpop.eup %5275  ;;  %5295 = vrcp.f32 %v960_v55  ;;  %v978_v62 = vadd.f32 1.0, %v5274_v57 }
  0x8d   : > { %v5278_v1 = vpop.eup %5277  ;;  %1860 = vperm.xlu1 %4912, %v5276_v61   ;;  %5297 = vrcp.f32 %v959_v58  ;;  %v290_v58 = vld [vmem:[%s7523_s0 + $0x2c8] sm:$0xff] }
  0x8e   : > { %v5280_v4 = vpop.eup %5279  ;;  %5299 = vrcp.f32 %v978_v62  ;;  %v4237_v62 = vmul.f32 -1.442695, %v272_v51  ;;  %v4255_v6 = vmul.f32 -1.442695, %v290_v58 }
  0x8f   : > { %v5282_v7 = vpop.eup %5281  ;;  %1855 = vperm.xlu0 %4911, %v5278_v1   ;;  %5301 = vpow2.f32 %v4246_v59 }
  0x90   : > { %v5284_v10 = vpop.eup %5283  ;;  %5303 = vpow2.f32 %v4231_v63  ;;  %v289_v63 = vld [vmem:[%s7523_s0 + $0x2c0] sm:$0xff] }
  0x91   : > { %v5286_v13 = vpop.eup %5285  ;;  %1870 = vperm.xlu1 %4912, %v5280_v4   ;;  %5305 = vpow2.f32 %v4230_v2  ;;  %v4236_v2 = vmul.f32 -1.442695, %v271_v54  ;;  %v273_v4 = vld [vmem:[%s7523_s0 + $0x240] sm:$0xff] }
  0x92   : > { %v5288_v16 = vpop.eup %5287  ;;  %5307 = vpow2.f32 %v4249_v5 }
  0x93   : > { %v5290_v19 = vpop.eup %5289  ;;  %1865 = vperm.xlu0 %4911, %v5282_v7   ;;  %5309 = vpow2.f32 %v4248_v8  ;;  %v4915_v7 = vld [vmem:[%s6139_s26 + $0x4] ss:$44 sps:$4 sm:$0xff]  }
  0x94   : > { %v5292_v22 = vpop.eup %5291  ;;  %5311 = vpow2.f32 %v4233_v11  ;;  %v292_v11 = vld [vmem:[%s7523_s0 + $0x2d8] sm:$0xff]  ;;  %3317 = vmatprep.mubr.bf16.mxu0 %v4915_v7 }
  0x95   : > { %v5294_v25 = vpop.eup %5293  ;;  %1880 = vperm.xlu1 %4912, %v5284_v10   ;;  %5313 = vpow2.f32 %v4232_v14  ;;  %v4254_v10 = vmul.f32 -1.442695, %v289_v63  ;;  %v4239_v14 = vmul.f32 -1.442695, %v274_v3  ;;  %v4257_v21 = vmul.f32 -1.442695, %v292_v11 }
  0x96   : > { %v5296_v27 = vpop.eup %5295  ;;  %5315 = vpow2.f32 %v4251_v17  ;;  %v275_v17 = vld [vmem:[%s7523_s0 + $0x250] sm:$0xff]  ;;  %v296_v7 = vld [vmem:[%s7523_s0 + $0x2f8] sm:$0xff] }
  0x97   : > { %v5298_v29 = vpop.eup %5297  ;;  %1875 = vperm.xlu0 %4911, %v5286_v13   ;;  %5317 = vpow2.f32 %v4250_v20 }
  0x98   : > { %v5300_v31 = vpop.eup %5299  ;;  %5319 = vpow2.f32 %v4235_v23 }
  0x99   : > { %v5302_v32 = vpop.eup %5301  ;;  %1890 = vperm.xlu1 %4912, %v5288_v16   ;;  %5321 = vpow2.f32 %v4234_v26  ;;  %v276_v16 = vld [vmem:[%s7523_s0 + $0x258] sm:$0xff] }
  0x9a   : > { %v5304_v33 = vpop.eup %5303  ;;  %v977_v34 = vadd.f32 1.0, %v5302_v32  ;;  %5323 = vpow2.f32 %v4253_v28  ;;  %v4241_v28 = vmul.f32 -1.442695, %v276_v16  ;;  %v4240_v32 = vmul.f32 -1.442695, %v275_v17  ;;  %v280_v17 = vld [vmem:[%s7523_s0 + $0x278] sm:$0xff] }
  0x9b   : > { %v5306_v35 = vpop.eup %5305  ;;  %1885 = vperm.xlu0 %4911, %v5290_v19   ;;  %v962_v36 = vadd.f32 1.0, %v5304_v33  ;;  %5325 = vpow2.f32 %v4252_v30  ;;  %v4238_v19 = vmul.f32 -1.442695, %v273_v4  ;;  %v278_v30 = vld [vmem:[%s7523_s0 + $0x268] sm:$0xff]  ;;  %v277_v4 = vld [vmem:[%s7523_s0 + $0x260] sm:$0xff] }
  0x9c   : > { %v5308_v37 = vpop.eup %5307  ;;  %5327 = vrcp.f32 %v977_v34  ;;  %v961_v38 = vadd.f32 1.0, %v5306_v35  ;;  %v4242_v16 = vmul.f32 -1.442695, %v277_v4 }
  0x9d   : > { %v5310_v39 = vpop.eup %5309  ;;  %1900 = vperm.xlu1 %4912, %v5292_v22   ;;  %5329 = vrcp.f32 %v962_v36  ;;  %v980_v40 = vadd.f32 1.0, %v5308_v37 }
  0x9e   : > { %v5312_v41 = vpop.eup %5311  ;;  %5331 = vrcp.f32 %v961_v38  ;;  %v979_v42 = vadd.f32 1.0, %v5310_v39 }
  0x9f   : > { %v5314_v43 = vpop.eup %5313  ;;  %1895 = vperm.xlu0 %4911, %v5294_v25   ;;  %5333 = vrcp.f32 %v980_v40  ;;  %v964_v44 = vadd.f32 1.0, %v5312_v41  ;;  %v294_v25 = vld [vmem:[%s7523_s0 + $0x2e8] sm:$0xff]  ;;  %v4243_v40 = vmul.f32 -1.442695, %v278_v30  ;;  %v313_v30 = vld [vmem:[%s7523_s0 + $0x380] sm:$0xff] }
  0xa0   : > { %v5316_v45 = vpop.eup %5315  ;;  %5335 = vrcp.f32 %v979_v42  ;;  %v963_v46 = vadd.f32 1.0, %v5314_v43  ;;  %v4259_v34 = vmul.f32 -1.442695, %v294_v25  ;;  %v314_v25 = vld [vmem:[%s7523_s0 + $0x388] sm:$0xff] }
  0xa1   : > { %v5318_v47 = vpop.eup %5317  ;;  %1910 = vperm.xlu1 %4912, %v5296_v27   ;;  %5337 = vrcp.f32 %v964_v44  ;;  %v982_v48 = vadd.f32 1.0, %v5316_v45 }
  0xa2   : > { %v5320_v49 = vpop.eup %5319  ;;  %5339 = vrcp.f32 %v963_v46  ;;  %v981_v50 = vadd.f32 1.0, %v5318_v47 }
  0xa3   : > { %v5322_v52 = vpop.eup %5321  ;;  %1905 = vperm.xlu0 %4911, %v5298_v29   ;;  %5341 = vrcp.f32 %v982_v48  ;;  %v966_v53 = vadd.f32 1.0, %v5320_v49  ;;  %v293_v29 = vld [vmem:[%s7523_s0 + $0x2e0] sm:$0xff] }
  0xa4   : > { %v5324_v55 = vpop.eup %5323  ;;  %v6120_v56 = vpop.permute.xlu1 %1605  ;;  %5343 = vrcp.f32 %v981_v50  ;;  %v965_v57 = vadd.f32 1.0, %v5322_v52  ;;  %v4258_v37 = vmul.f32 -1.442695, %v293_v29 }
  0xa5   : > { %v5326_v59 = vpop.eup %5325  ;;  %v6125_v60 = vpop.permute.xlu0 %1595  ;;  %2000 = vperm.xlu1 %4912, %v5300_v31   ;;  %5345 = vrcp.f32 %v966_v53  ;;  %v984_v61 = vadd.f32 1.0, %v5324_v55 }
  0xa6   : > { %v5328_v0 = vpop.eup %5327  ;;  %5347 = vrcp.f32 %v965_v57  ;;  %v983_v1 = vadd.f32 1.0, %v5326_v59 }
  0xa7   : > { %v5330_v5 = vpop.eup %5329  ;;  %1995 = vperm.xlu0 %4911, %v5328_v0   ;;  %5349 = vrcp.f32 %v984_v61 }
  0xa8   : > { %v5332_v8 = vpop.eup %5331  ;;  %v6142_v9 = vpop.permute.xlu1 %1610  ;;  %5351 = vrcp.f32 %v983_v1 }
  0xa9   : > { %v5334_v12 = vpop.eup %5333  ;;  %v6147_v13 = vpop.permute.xlu0 %1600  ;;  %1920 = vperm.xlu1 %4912, %v5330_v5   ;;  %5353 = vpow2.f32 %v4237_v62 }
  0xaa   : > { %v5336_v18 = vpop.eup %5335  ;;  %5355 = vpow2.f32 %v4236_v2 }
  0xab   : > { %v5338_v20 = vpop.eup %5337  ;;  %1915 = vperm.xlu0 %4911, %v5332_v8   ;;  %5357 = vpow2.f32 %v4255_v6  ;;  %v295_v8 = vld [vmem:[%s7523_s0 + $0x2f0] sm:$0xff] }
  0xac   : > { %v5340_v22 = vpop.eup %5339  ;;  %v6158_v23 = vpop.permute.xlu1 %1620  ;;  %5359 = vpow2.f32 %v4254_v10  ;;  %v4260_v29 = vmul.f32 -1.442695, %v295_v8 }
  0xad   : > { %v5342_v26 = vpop.eup %5341  ;;  %v6163_v27 = vpop.permute.xlu0 %1615  ;;  %2010 = vperm.xlu1 %4912, %v5334_v12   ;;  %5361 = vpow2.f32 %v4239_v14 }
  0xae   : > { %v5344_v31 = vpop.eup %5343  ;;  %5363 = vpow2.f32 %v4238_v19 }
  0xaf   : > { %v5346_v33 = vpop.eup %5345  ;;  %2005 = vperm.xlu0 %4911, %v5336_v18   ;;  %5365 = vpow2.f32 %v4257_v21 }
  0xb0   : > { %v5348_v35 = vpop.eup %5347  ;;  %v6171_v36 = vpop.permute.xlu1 %1630  ;;  %5367 = vpow2.f32 %v4256_v24  ;;  %v279_v24 = vld [vmem:[%s7523_s0 + $0x270] sm:$0xff] }
  0xb1   : > { %v5350_v38 = vpop.eup %5349  ;;  %v6173_v39 = vpop.permute.xlu0 %1625  ;;  %1930 = vperm.xlu1 %4912, %v5338_v20   ;;  %5369 = vpow2.f32 %v4241_v28  ;;  %v1436_v20 = vld [vmem:[%s7524_s1 + $0x88] sm:$0xff] }
  0xb2   : > { %v5352_v41 = vpop.eup %5351  ;;  %5371 = vpow2.f32 %v4240_v32  ;;  %v1420_v28 = vld [vmem:[%s7524_s1 + $0x8] sm:$0xff] }
  0xb3   : > { %v5354_v42 = vpop.eup %5353  ;;  %1925 = vperm.xlu0 %4911, %v5340_v22   ;;  %5373 = vpow2.f32 %v4259_v34  ;;  %v4261_v22 = vmul.f32 -1.442695, %v296_v7  ;;  %v1435_v34 = vld [vmem:[%s7524_s1 + $0x80] sm:$0xff]  ;;  %v1437_v7 = vld [vmem:[%s7524_s1 + $0x90] sm:$0xff] }
  0xb4   : > { %v5356_v43 = vpop.eup %5355  ;;  %v6175_v44 = vpop.permute.xlu1 %1640  ;;  %v968_v45 = vadd.f32 1.0, %v5354_v42  ;;  %5375 = vpow2.f32 %v4258_v37 }
  0xb5   : > { %v5358_v46 = vpop.eup %5357  ;;  %v6177_v47 = vpop.permute.xlu0 %1635  ;;  %2020 = vperm.xlu1 %4912, %v5342_v26   ;;  %v967_v48 = vadd.f32 1.0, %v5356_v43  ;;  %5377 = vpow2.f32 %v4243_v40  ;;  %v4244_v40 = vmul.f32 -1.442695, %v279_v24  ;;  %v1438_v43 = vld [vmem:[%s7524_s1 + $0x98] sm:$0xff] }
  0xb6   : > { %v5360_v49 = vpop.eup %5359  ;;  %5379 = vrcp.f32 %v968_v45  ;;  %v986_v50 = vadd.f32 1.0, %v5358_v46  ;;  %v4279_v45 = vmul.f32 -1.442695, %v314_v25  ;;  %v297_v46 = vld [vmem:[%s7523_s0 + $0x300] sm:$0xff] }
  0xb7   : > { %v5362_v51 = vpop.eup %5361  ;;  %2015 = vperm.xlu0 %4911, %v5344_v31   ;;  %5381 = vrcp.f32 %v967_v48  ;;  %v985_v52 = vadd.f32 1.0, %v5360_v49  ;;  %v298_v31 = vld [vmem:[%s7523_s0 + $0x308] sm:$0xff]  ;;  %v1422_v49 = vld [vmem:[%s7524_s1 + $0x18] sm:$0xff] }
  0xb8   : > { %v5364_v53 = vpop.eup %5363  ;;  %v6179_v54 = vpop.permute.xlu1 %1650  ;;  %5383 = vrcp.f32 %v986_v50  ;;  %v970_v55 = vadd.f32 1.0, %v5362_v51  ;;  %v4278_v51 = vmul.f32 -1.442695, %v313_v30 }
  0xb9   : > { %v5366_v57 = vpop.eup %5365  ;;  %v6181_v58 = vpop.permute.xlu0 %1645  ;;  %1940 = vperm.xlu1 %4912, %v5346_v33   ;;  %5385 = vrcp.f32 %v985_v52  ;;  %v969_v59 = vadd.f32 1.0, %v5364_v53  ;;  %v316_v52 = vld [vmem:[%s7523_s0 + $0x398] sm:$0xff]  ;;  %v315_v53 = vld [vmem:[%s7523_s0 + $0x390] sm:$0xff] }
  0xba   : > { %v5368_v61 = vpop.eup %5367  ;;  %5387 = vrcp.f32 %v970_v55  ;;  %v988_v62 = vadd.f32 1.0, %v5366_v57  ;;  %v2464_v57 = vmul.f32 %v6147_v13, %v1420_v28  ;;  %v4281_v8 = vmul.f32 -1.442695, %v316_v52 }
  0xbb   : > { %v5370_v63 = vpop.eup %5369  ;;  %1935 = vperm.xlu0 %4911, %v5348_v35   ;;  %5389 = vrcp.f32 %v969_v59  ;;  %v987_v0 = vadd.f32 1.0, %v5368_v61  ;;  %v4245_v35 = vmul.f32 -1.442695, %v280_v17  ;;  %v4263_v61 = vmul.f32 -1.442695, %v298_v31 }
  0xbc   : > { %v5372_v1 = vpop.eup %5371  ;;  %v6183_v2 = vpop.permute.xlu1 %1660  ;;  %5391 = vrcp.f32 %v988_v62  ;;  %v972_v3 = vadd.f32 1.0, %v5370_v63  ;;  %v1421_v63 = vld [vmem:[%s7524_s1 + $0x10] sm:$0xff]  ;;  %v4280_v17 = vmul.f32 -1.442695, %v315_v53 }
  0xbd   : > { %v5374_v5 = vpop.eup %5373  ;;  %2030 = vperm.xlu1 %4912, %v5350_v38   ;;  %5393 = vrcp.f32 %v987_v0  ;;  %v971_v6 = vadd.f32 1.0, %v5372_v1  ;;  %v1419_v38 = vld [vmem:[%s7524_s1] sm:$0xff]  ;;  %v4262_v1 = vmul.f32 -1.442695, %v297_v46  ;;  %v2465_v30 = vmul.f32 %v6120_v56, %v1421_v63  ;;  %v1442_v56 = vld [vmem:[%s7524_s1 + $0xb8] sm:$0xff]  ;;  %v1425_v46 = vld [vmem:[%s7524_s1 + $0x30] sm:$0xff] }
  0xbe   : > { %v5376_v10 = vpop.eup %5375  ;;  %v6194_v11 = vpop.permute.xlu0 %1655  ;;  %5395 = vrcp.f32 %v972_v3  ;;  %v990_v12 = vadd.f32 1.0, %v5374_v5  ;;  %v300_v3 = vld [vmem:[%s7523_s0 + $0x318] sm:$0xff]  ;;  %v2463_v13 = vmul.f32 %v6125_v60, %v1419_v38  ;;  %v1424_v5 = vld [vmem:[%s7524_s1 + $0x28] sm:$0xff]  ;;  %v1423_v60 = vld [vmem:[%s7524_s1 + $0x20] sm:$0xff] }
  0xbf   : > { %v5378_v14 = vpop.eup %5377  ;;  %2025 = vperm.xlu0 %4911, %v5352_v41   ;;  %5397 = vrcp.f32 %v971_v6  ;;  %v989_v15 = vadd.f32 1.0, %v5376_v10  ;;  %v299_v10 = vld [vmem:[%s7523_s0 + $0x310] sm:$0xff]  ;;  %v4265_v24 = vmul.f32 -1.442695, %v300_v3  ;;  %v2468_v31 = vmul.f32 %v6158_v23, %v1424_v5  ;;  %v318_v23 = vld [vmem:[%s7523_s0 + $0x3a8] sm:$0xff] }
  0xc0   : > { %v5380_v18 = vpop.eup %5379  ;;  %v6199_v19 = vpop.permute.xlu1 %1670  ;;  %5399 = vrcp.f32 %v990_v12  ;;  %v974_v21 = vadd.f32 1.0, %v5378_v14  ;;  %v4264_v28 = vmul.f32 -1.442695, %v299_v10  ;;  %v1441_v53 = vld [vmem:[%s7524_s1 + $0xb0] sm:$0xff]  ;;  %v2469_v5 = vmul.f32 %v6173_v39, %v1425_v46  ;;  %v317_v10 = vld [vmem:[%s7523_s0 + $0x3a0] sm:$0xff] }
  0xc1   : > { %v5382_v26 = vpop.eup %5381  ;;  %1950 = vperm.xlu1 %4912, %v5380_v18   ;;  %5401 = vrcp.f32 %v989_v15  ;;  %v1431_v46 = vld [vmem:[%s7524_s1 + $0x60] sm:$0xff] }
  0xc2   : > { %v5384_v32 = vpop.eup %5383  ;;  %v6219_v33 = vpop.permute.xlu0 %1665  ;;  %5403 = vrcp.f32 %v974_v21 }
  0xc3   : > { %v5386_v37 = vpop.eup %5385  ;;  %1945 = vperm.xlu0 %4911, %v5382_v26   ;;  %5405 = vpow2.f32 %v4242_v16  ;;  %v1440_v16 = vld [vmem:[%s7524_s1 + $0xa8] sm:$0xff] }
  0xc4   : > { %v5388_v41 = vpop.eup %5387  ;;  %v1681_v42 = vpop.permute.xlu1 %1680  ;;  %5407 = vpow2.f32 %v4261_v22  ;;  %v2637_v22 = vpack.c.bf16 %v2464_v57, %v2463_v13  ;;  %v6297_v57 = vmul.f32 -1.442695, %v318_v23 }
  0xc5   : > { %v5390_v48 = vpop.eup %5389  ;;  %v2480_v50 = vmul.f32 %v1681_v42, %v1436_v20  ;;  %2040 = vperm.xlu1 %4912, %v5384_v32   ;;  %5409 = vpow2.f32 %v4260_v29  ;;  %v2466_v20 = vmul.f32 %v6142_v9, %v1422_v49  ;;  %v2467_v32 = vmul.f32 %v6163_v27, %v1423_v60 }
  0xc6   : > { %v5392_v55 = vpop.eup %5391  ;;  %v1676_v59 = vpop.permute.xlu0 %1675  ;;  %5411 = vpow2.f32 %v4245_v35 }
  0xc7   : > { %v5394_v62 = vpop.eup %5393  ;;  %v2479_v0 = vmul.f32 %v1676_v59, %v1435_v34  ;;  %2035 = vperm.xlu0 %4911, %v5386_v37   ;;  %5413 = vpow2.f32 %v4244_v40  ;;  %v1439_v34 = vld [vmem:[%s7524_s1 + $0xa0] sm:$0xff]  ;;  %v1426_v37 = vld [vmem:[%s7524_s1 + $0x38] sm:$0xff] }
  0xc8   : > { %v6249_v4 = vpop.eup %5395  ;;  %v1691_v6 = vpop.permute.xlu1 %1690  ;;  %5415 = vpow2.f32 %v4279_v45  ;;  %v2470_v13 = vmul.f32 %v6171_v36, %v1426_v37 }
  0xc9   : > { %v6261_v12 = vpop.eup %5397  ;;  %v2482_v14 = vmul.f32 %v1691_v6, %v1438_v43  ;;  %1960 = vperm.xlu1 %4912, %v5388_v41   ;;  %v2645_v15 = vpack.c.bf16 %v2480_v50, %v2479_v0  ;;  %5417 = vpow2.f32 %v4278_v51  ;;  %v2638_v41 = vpack.c.bf16 %v2466_v20, %v2465_v30 }
  0xca   : > { %v6269_v18 = vpop.eup %5399  ;;  %v1686_v21 = vpop.permute.xlu0 %1685  ;;  %5419 = vpow2.f32 %v4263_v61  ;;  %v2639_v51 = vpack.c.bf16 %v2468_v31, %v2467_v32  ;;  %v1428_v61 = vld [vmem:[%s7524_s1 + $0x48] sm:$0xff]  ;;  %v2640_v30 = vpack.c.bf16 %v2470_v13, %v2469_v5  ;;  %v1429_v31 = vld [vmem:[%s7524_s1 + $0x50] sm:$0xff]  ;;  %v304_v5 = vld [vmem:[%s7523_s0 + $0x338] sm:$0xff] }
  0xcb   : > { %v6272_v25 = vpop.eup %5401  ;;  %v2481_v26 = vmul.f32 %v1686_v21, %v1437_v7  ;;  %1955 = vperm.xlu0 %4911, %v5390_v48   ;;  %4456 = vmatprep.subr.bf16.mxu0 %v2645_v15  ;;  %5421 = vpow2.f32 %v4262_v1  ;;  %v1444_v7 = vld [vmem:[%s7524_s1 + $0xc8] sm:$0xff]  ;;  %v6316_v39 = vmul.f32 %v6175_v44, %v1428_v61  ;;  %v1430_v44 = vld [vmem:[%s7524_s1 + $0x58] sm:$0xff] }
  0xcc   : > { %v6274_v29 = vpop.eup %5403  ;;  %4457 = vmatpush3.bf16.msra.mxu0 %v2637_v22  ;;  %v1701_v9 = vpop.permute.xlu1 %1700  ;;  %5423 = vpow2.f32 %v4281_v8 }
  0xcd   : > { %v5406_v35 = vpop.eup %5405  ;;  %v2646_v38 = vpack.c.bf16 %v2482_v14, %v2481_v26  ;;  %v2484_v40 = vmul.f32 %v1701_v9, %v1440_v16  ;;  %2050 = vperm.xlu1 %4912, %v5392_v55   ;;  %5425 = vpow2.f32 %v4280_v17  ;;  %v1443_v17 = vld [vmem:[%s7524_s1 + $0xc0] sm:$0xff]  ;;  %v1446_v9 = vld [vmem:[%s7524_s1 + $0xd8] sm:$0xff] }
  0xce   : > { %v5408_v27 = vpop.eup %5407  ;;  %v1696_v42 = vpop.permute.xlu0 %1695  ;;  %v973_v43 = vadd.f32 1.0, %v5406_v35  ;;  %5427 = vpow2.f32 %v4265_v24  ;;  %v301_v26 = vld [vmem:[%s7523_s0 + $0x320] sm:$0xff] }
  0xcf   : > { %v5410_v45 = vpop.eup %5409  ;;  %v2483_v48 = vmul.f32 %v1696_v42, %v1439_v34  ;;  %2045 = vperm.xlu0 %4911, %v5394_v62   ;;  %4458 = vmatprep.subr.bf16.mxu0 %v2646_v38  ;;  %v992_v49 = vadd.f32 1.0, %v5408_v27  ;;  %5429 = vpow2.f32 %v4264_v28  ;;  %v1427_v62 = vld [vmem:[%s7524_s1 + $0x40] sm:$0xff] }
  0xd0   : > { %v5412_v50 = vpop.eup %5411  ;;  %4459 = vmatpush3.bf16.msra.mxu0 %v2638_v41  ;;  %v1711_v52 = vpop.permute.xlu1 %1710  ;;  %5431 = vrcp.f32 %v973_v43  ;;  %v991_v55 = vadd.f32 1.0, %v5410_v45  ;;  %v2471_v15 = vmul.f32 %v6177_v47, %v1427_v62  ;;  %v1445_v41 = vld [vmem:[%s7524_s1 + $0xd0] sm:$0xff]  ;;  %v4266_v43 = vmul.f32 -1.442695, %v301_v26  ;;  %v306_v26 = vld [vmem:[%s7523_s0 + $0x348] sm:$0xff] }
  0xd1   : > { %v5414_v59 = vpop.eup %5413  ;;  %v2647_v63 = vpack.c.bf16 %v2484_v40, %v2483_v48  ;;  %v2486_v0 = vmul.f32 %v1711_v52, %v1442_v56  ;;  %1970 = vperm.xlu1 %4912, %v6249_v4   ;;  %5433 = vrcp.f32 %v992_v49  ;;  %v976_v1 = vadd.f32 1.0, %v5412_v50  ;;  %v1448_v50 = vld [vmem:[%s7524_s1 + $0xe8] sm:$0xff]  ;;  %v320_v52 = vld [vmem:[%s7523_s0 + $0x3b8] sm:$0xff] }
  0xd2   : > { %v5416_v3 = vpop.eup %5415  ;;  %v1706_v6 = vpop.permute.xlu0 %1705  ;;  %5435 = vrcp.f32 %v991_v55  ;;  %v975_v8 = vadd.f32 1.0, %v5414_v59  ;;  %v2641_v23 = vpack.c.bf16 %v6316_v39, %v2471_v15  ;;  %v2474_v55 = vmul.f32 %v6179_v54, %v1430_v44 }
  0xd3   : > { %v5418_v60 = vpop.eup %5417  ;;  %v2485_v4 = vmul.f32 %v1706_v6, %v1441_v53  ;;  %1965 = vperm.xlu0 %4911, %v6261_v12   ;;  %4460 = vmatprep.subr.bf16.mxu0 %v2647_v63  ;;  %5437 = vrcp.f32 %v976_v1  ;;  %v1010_v36 = vadd.f32 1.0, %v5416_v3  ;;  %v302_v12 = vld [vmem:[%s7523_s0 + $0x328] sm:$0xff]  ;;  %v2473_v59 = vmul.f32 %v6181_v58, %v1429_v31  ;;  %v319_v63 = vld [vmem:[%s7523_s0 + $0x3b0] sm:$0xff]  ;;  %v1450_v58 = vld [vmem:[%s7524_s1 + $0xf8] sm:$0xff] }
  0xd4   : > { %v5420_v14 = vpop.eup %5419  ;;  %4461 = vmatpush3.bf16.msra.mxu0 %v2639_v51  ;;  %v1721_v16 = vpop.permute.xlu1 %1720  ;;  %5439 = vrcp.f32 %v975_v8  ;;  %v1009_v20 = vadd.f32 1.0, %v5418_v60  ;;  %v4267_v40 = vmul.f32 -1.442695, %v302_v12  ;;  %v4285_v13 = vmul.f32 -1.442695, %v320_v52  ;;  %v1433_v12 = vld [vmem:[%s7524_s1 + $0x70] sm:$0xff] }
  0xd5   : > { %v5422_v21 = vpop.eup %5421  ;;  %v2648_v22 = vpack.c.bf16 %v2486_v0, %v2485_v4  ;;  %v2488_v24 = vmul.f32 %v1721_v16, %v1444_v7  ;;  %2060 = vperm.xlu1 %4912, %v6269_v18   ;;  %5441 = vrcp.f32 %v1010_v36  ;;  %v994_v47 = vadd.f32 1.0, %v5420_v14  ;;  %v1434_v7 = vld [vmem:[%s7524_s1 + $0x78] sm:$0xff]  ;;  %v303_v4 = vld [vmem:[%s7523_s0 + $0x330] sm:$0xff]  ;;  %v322_v36 = vld [vmem:[%s7523_s0 + $0x3c8] sm:$0xff] }
  0xd6   : > { %v5424_v28 = vpop.eup %5423  ;;  %v1716_v32 = vpop.permute.xlu0 %1715  ;;  %5443 = vrcp.f32 %v1009_v20  ;;  %v993_v34 = vadd.f32 1.0, %v5422_v21  ;;  %v4282_v18 = vmul.f32 -1.442695, %v317_v10  ;;  %v4284_v60 = vmul.f32 -1.442695, %v319_v63 }
  0xd7   : > { %v5426_v35 = vpop.eup %5425  ;;  %v2487_v37 = vmul.f32 %v1716_v32, %v1443_v17  ;;  %2055 = vperm.xlu0 %4911, %v6272_v25   ;;  %4462 = vmatprep.subr.bf16.mxu0 %v2648_v22  ;;  %5445 = vrcp.f32 %v994_v47  ;;  %v1012_v38 = vadd.f32 1.0, %v5424_v28  ;;  %v1432_v25 = vld [vmem:[%s7524_s1 + $0x68] sm:$0xff]  ;;  %v2642_v39 = vpack.c.bf16 %v2474_v55, %v2473_v59 }
  0xd8   : > { %v5428_v56 = vpop.eup %5427  ;;  %4463 = vmatpush3.bf16.msra.mxu0 %v2640_v30  ;;  %v1731_v27 = vpop.permute.xlu1 %1730  ;;  %5447 = vrcp.f32 %v993_v34  ;;  %v1011_v42 = vadd.f32 1.0, %v5426_v35  ;;  %v2476_v15 = vmul.f32 %v6183_v2, %v1432_v25  ;;  %v2475_v16 = vmul.f32 %v6194_v11, %v1431_v46  ;;  %v1449_v11 = vld [vmem:[%s7524_s1 + $0xf0] sm:$0xff]  ;;  %v4916_v59 = vld [vmem:[%s6139_s26 + $0x5c] ss:$44 sps:$4 sm:$0xff]  }
  0xd9   : > { %v5430_v45 = vpop.eup %5429  ;;  %v2649_v48 = vpack.c.bf16 %v2488_v24, %v2487_v37  ;;  %v2490_v49 = vmul.f32 %v1731_v27, %v1446_v9  ;;  %1980 = vperm.xlu1 %4912, %v6274_v29   ;;  %5449 = vrcp.f32 %v1012_v38  ;;  %v996_v51 = vadd.f32 1.0, %v5428_v56  ;;  %v1447_v29 = vld [vmem:[%s7524_s1 + $0xe0] sm:$0xff] }
  0xda   : > { %v5432_v53 = vpop.eup %5431  ;;  %v1726_v61 = vpop.permute.xlu0 %1725  ;;  %5451 = vrcp.f32 %v1011_v42  ;;  %v995_v62 = vadd.f32 1.0, %v5430_v45  ;;  %v4269_v44 = vmul.f32 -1.442695, %v304_v5  ;;  %v4268_v24 = vmul.f32 -1.442695, %v303_v4  ;;  %v305_v9 = vld [vmem:[%s7523_s0 + $0x340] sm:$0xff] }
  0xdb   : > { %v5434_v0 = vpop.eup %5433  ;;  %v2489_v1 = vmul.f32 %v1726_v61, %v1445_v41  ;;  %1975 = vperm.xlu0 %4911, %v5432_v53   ;;  %4464 = vmatprep.subr.bf16.mxu0 %v2649_v48  ;;  %5453 = vrcp.f32 %v996_v51  ;;  %v4287_v47 = vmul.f32 -1.442695, %v322_v36  ;;  %v2478_v35 = vmul.f32 %v6199_v19, %v1434_v7  ;;  %v4913_v51 = vld [vmem:[%s6139_s26] ss:$44 sps:$4 sm:$0xff]   ;;  %v4918_v36 = vld [vmem:[%s6139_s26 + $0x58] ss:$44 sps:$4 sm:$0xff]  }
  0xdc   : > { %v5436_v3 = vpop.eup %5435  ;;  %4465 = vmatpush3.bf16.msra.mxu0 %v2641_v23  ;;  %v1741_v54 = vpop.permute.xlu1 %1740  ;;  %5455 = vrcp.f32 %v995_v62  ;;  %v2477_v37 = vmul.f32 %v6219_v33, %v1433_v12  ;;  %v4271_v27 = vmul.f32 -1.442695, %v306_v26  ;;  %v4270_v19 = vmul.f32 -1.442695, %v305_v9  ;;  %v4930_v33 = vld [vmem:[%s6139_s26 + $0xc] ss:$44 sps:$4 sm:$0xff]  }
  0xdd   : > { %v5438_v6 = vpop.eup %5437  ;;  %v2650_v8 = vpack.c.bf16 %v2490_v49, %v2489_v1  ;;  %v2492_v10 = vmul.f32 %v1741_v54, %v1448_v50  ;;  %2070 = vperm.xlu1 %4912, %v5434_v0   ;;  %5457 = vpow2.f32 %v6297_v57  ;;  %v321_v57 = vld [vmem:[%s7523_s0 + $0x3c0] sm:$0xff]  ;;  %3414 = vmatprep.mubr.bf16.mxu1 %v4930_v33  ;;  %v308_v12 = vld [vmem:[%s7523_s0 + $0x358] sm:$0xff]  ;;  %v326_v26 = vld [vmem:[%s7523_s0 + $0x3e8] sm:$0xff] }
  0xde   : > { %v5440_v14 = vpop.eup %5439  ;;  %v1736_v17 = vpop.permute.xlu0 %1735  ;;  %5459 = vpow2.f32 %v4282_v18  ;;  %v4286_v32 = vmul.f32 -1.442695, %v321_v57  ;;  %v2643_v18 = vpack.c.bf16 %v2476_v15, %v2475_v16  ;;  %v2644_v48 = vpack.c.bf16 %v2478_v35, %v2477_v37  ;;  %v323_v16 = vld [vmem:[%s7523_s0 + $0x3d0] sm:$0xff]  ;;  %v325_v9 = vld [vmem:[%s7523_s0 + $0x3e0] sm:$0xff]  ;;  %v310_v35 = vld [vmem:[%s7523_s0 + $0x368] sm:$0xff] }
  0xdf   : > { %v5442_v20 = vpop.eup %5441  ;;  %v2491_v21 = vmul.f32 %v1736_v17, %v1447_v29  ;;  %2065 = vperm.xlu0 %4911, %v5436_v3   ;;  %4466 = vmatprep.subr.bf16.mxu0 %v2650_v8  ;;  %5461 = vpow2.f32 %v4267_v40  ;;  %v324_v40 = vld [vmem:[%s7523_s0 + $0x3d8] sm:$0xff]  ;;  %v4919_v17 = vld [vmem:[%s6139_s26 + $0xb4] ss:$44 sps:$4 sm:$0xff]  }
  0xe0   : > { %v5444_v22 = vpop.eup %5443  ;;  %4467 = vmatpush3.bf16.msra.mxu0 %v2642_v39  ;;  %v1751_v2 = vpop.permute.xlu1 %1750  ;;  %5463 = vpow2.f32 %v4266_v43  ;;  %v4289_v25 = vmul.f32 -1.442695, %v324_v40  ;;  %v4291_v40 = vmul.f32 -1.442695, %v326_v26 }
  0xe1   : > { %v5446_v28 = vpop.eup %5445  ;;  %v2651_v30 = vpack.c.bf16 %v2492_v10, %v2491_v21  ;;  %v2494_v31 = vmul.f32 %v1751_v2, %v1450_v58  ;;  %1990 = vperm.xlu1 %4912, %v5438_v6   ;;  %5465 = vpow2.f32 %v4285_v13  ;;  %v307_v2 = vld [vmem:[%s7523_s0 + $0x350] sm:$0xff] }
  0xe2   : > { %v5448_v34 = vpop.eup %5447  ;;  %v1746_v38 = vpop.permute.xlu0 %1745  ;;  %5467 = vpow2.f32 %v4284_v60 }
  0xe3   : > { %v5450_v56 = vpop.eup %5449  ;;  %v2493_v23 = vmul.f32 %v1746_v38, %v1449_v11  ;;  %1985 = vperm.xlu0 %4911, %v5440_v14   ;;  %4468 = vmatprep.subr.bf16.mxu0 %v2651_v30  ;;  %5469 = vpow2.f32 %v4269_v44 }
  0xe4   : > { %v5452_v41 = vpop.eup %5451  ;;  %4469 = vmatpush3.bf16.msra.mxu0 %v2643_v18  ;;  %v6402_v42 = vpop.permute.xlu1 %1760  ;;  %5471 = vpow2.f32 %v4268_v24  ;;  %v4272_v18 = vmul.f32 -1.442695, %v307_v2 }
  0xe5   : > { %v5454_v43 = vpop.eup %5453  ;;  %v2652_v45 = vpack.c.bf16 %v2494_v31, %v2493_v23  ;;  %2160 = vperm.xlu1 %4912, %v5442_v20   ;;  %5473 = vpow2.f32 %v4287_v47  ;;  %v4288_v47 = vmul.f32 -1.442695, %v323_v16 }
  0xe6   : > { %v6405_v46 = vpop.eup %5455  ;;  %v6407_v49 = vpop.permute.xlu0 %1755  ;;  %5475 = vpow2.f32 %v4286_v32  ;;  %v4273_v32 = vmul.f32 -1.442695, %v308_v12 }
  0xe7   : > { %v5458_v50 = vpop.eup %5457  ;;  %2155 = vperm.xlu0 %4911, %v5444_v22   ;;  %4470 = vmatprep.subr.bf16.mxu0 %v2652_v45  ;;  %5477 = vpow2.f32 %v4271_v27  ;;  %v4290_v27 = vmul.f32 -1.442695, %v325_v9  ;;  %v4275_v45 = vmul.f32 -1.442695, %v310_v35 }
  0xe8   : > { %v5460_v52 = vpop.eup %5459  ;;  %4471 = vmatpush3.bf16.msra.mxu0 %v2644_v48  ;;  %v6410_v53 = vpop.permute.xlu1 %1770  ;;  %v1014_v55 = vadd.f32 1.0, %v5458_v50  ;;  %5479 = vpow2.f32 %v4270_v19  ;;  %v4921_v19 = vld [vmem:[%s6139_s26 + $0xb0] ss:$44 sps:$4 sm:$0xff]  }
  0xe9   : > { %v5462_v61 = vpop.eup %5461  ;;  %2080 = vperm.xlu1 %4912, %v5446_v28   ;;  %v1013_v29 = vadd.f32 1.0, %v5460_v52  ;;  %5481 = vpow2.f32 %v4289_v25  ;;  %v327_v25 = vld [vmem:[%s7523_s0 + $0x3f0] sm:$0xff] }
  0xea   : > { %v5464_v62 = vpop.eup %5463  ;;  %v6413_v63 = vpop.permute.xlu0 %1765  ;;  %5483 = vrcp.f32 %v1014_v55  ;;  %v998_v0 = vadd.f32 1.0, %v5462_v61  ;;  %v345_v61 = vld [vmem:[%s7523_s0 + $0x480] sm:$0xff] }
  0xeb   : > { %v5466_v1 = vpop.eup %5465  ;;  %2075 = vperm.xlu0 %4911, %v5448_v34   ;;  %5485 = vrcp.f32 %v1013_v29  ;;  %v997_v3 = vadd.f32 1.0, %v5464_v62  ;;  %3318 = vmatmul.mubr.bf16.vlgmr.msra.gmra.mrb[0].mxu0 %v4913_v51  ;;  %v346_v51 = vld [vmem:[%s7523_s0 + $0x488] sm:$0xff]  ;;  %v4292_v62 = vmul.f32 -1.442695, %v327_v25 }
  0xec   : > { %v5468_v54 = vpop.eup %5467  ;;  %v6415_v58 = vpop.permute.xlu1 %1780  ;;  %5487 = vrcp.f32 %v998_v0  ;;  %v1016_v13 = vadd.f32 1.0, %v5466_v1  ;;  %3325 = vmatprep.mubr.bf16.mxu0 %v4916_v59  ;;  %v312_v0 = vld [vmem:[%s7523_s0 + $0x378] sm:$0xff] }
  0xed   : > { %v5470_v5 = vpop.eup %5469  ;;  %2170 = vperm.xlu1 %4912, %v5450_v56   ;;  %5489 = vrcp.f32 %v997_v3  ;;  %v1015_v6 = vadd.f32 1.0, %v5468_v54  ;;  %v309_v56 = vld [vmem:[%s7523_s0 + $0x360] sm:$0xff]  ;;  %v4311_v54 = vmul.f32 -1.442695, %v346_v51 }
  0xee   : > { %v5472_v7 = vpop.eup %5471  ;;  %v6417_v8 = vpop.permute.xlu0 %1775  ;;  %5491 = vrcp.f32 %v1016_v13  ;;  %v1000_v10 = vadd.f32 1.0, %v5470_v5  ;;  %v4274_v50 = vmul.f32 -1.442695, %v309_v56  ;;  %v311_v13 = vld [vmem:[%s7523_s0 + $0x370] sm:$0xff] }
  0xef   : > { %v5474_v60 = vpop.eup %5473  ;;  %2165 = vperm.xlu0 %4911, %v5452_v41   ;;  %5493 = vrcp.f32 %v1015_v6  ;;  %v999_v4 = vadd.f32 1.0, %v5472_v7  ;;  %v328_v41 = vld [vmem:[%s7523_s0 + $0x3f8] sm:$0xff]  ;;  %v4310_v6 = vmul.f32 -1.442695, %v345_v61 }
  0xf0   : > { %v5476_v14 = vpop.eup %5475  ;;  %v6420_v39 = vpop.permute.xlu1 %1790  ;;  %5495 = vrcp.f32 %v1000_v10  ;;  %v1018_v15 = vadd.f32 1.0, %v5474_v60  ;;  %v4293_v59 = vmul.f32 -1.442695, %v328_v41  ;;  %v4277_v60 = vmul.f32 -1.442695, %v312_v0  ;;  %v1470_v41 = vld [vmem:[%s7524_s1 + $0x198] sm:$0xff] }
  0xf1   : > { %v5478_v57 = vpop.eup %5477  ;;  %2090 = vperm.xlu1 %4912, %v5454_v43   ;;  %5497 = vrcp.f32 %v999_v4  ;;  %v1017_v20 = vadd.f32 1.0, %v5476_v14  ;;  %v4924_v14 = vld [vmem:[%s6139_s26 + $0x108] ss:$44 sps:$4 sm:$0xff]  }
  0xf2   : > { %v5480_v21 = vpop.eup %5479  ;;  %v6429_v44 = vpop.permute.xlu0 %1785  ;;  %5499 = vrcp.f32 %v1018_v15  ;;  %v1002_v22 = vadd.f32 1.0, %v5478_v57  ;;  %v4931_v0 = vld [vmem:[%s6139_s26 + $0x1bc] ss:$44 sps:$4 sm:$0xff]  }
  0xf3   : > { %v5482_v11 = vpop.eup %5481  ;;  %2085 = vperm.xlu0 %4911, %v6405_v46   ;;  %5501 = vrcp.f32 %v1017_v20  ;;  %v1001_v24 = vadd.f32 1.0, %v5480_v21  ;;  %3326 = vmatmul.mubr.bf16.gmra.mrb[4].mxu0 %v4918_v36  ;;  %v4922_v46 = vld [vmem:[%s6139_s26 + $0x10c] ss:$44 sps:$4 sm:$0xff]   ;;  %v4276_v36 = vmul.f32 -1.442695, %v311_v13 }
  0xf4   : > { %v5484_v28 = vpop.eup %5483  ;;  %v6438_v30 = vpop.permute.xlu1 %1800  ;;  %5503 = vrcp.f32 %v1002_v22  ;;  %v1020_v31 = vadd.f32 1.0, %v5482_v11  ;;  %3333 = vmatprep.mubr.bf16.mxu0 %v4919_v17  ;;  %v4925_v17 = vld [vmem:[%s6139_s26 + $0x164] ss:$44 sps:$4 sm:$0xff]   ;;  %v1468_v21 = vld [vmem:[%s7524_s1 + $0x188] sm:$0xff] }
  0xf5   : > { %v5486_v34 = vpop.eup %5485  ;;  %2180 = vperm.xlu1 %4912, %v5484_v28   ;;  %5505 = vrcp.f32 %v1001_v24  ;;  %v1452_v11 = vld [vmem:[%s7524_s1 + $0x108] sm:$0xff]  ;;  %v1451_v24 = vld [vmem:[%s7524_s1 + $0x100] sm:$0xff] }
  0xf6   : > { %v5488_v37 = vpop.eup %5487  ;;  %v6446_v38 = vpop.permute.xlu0 %1795  ;;  %5507 = vrcp.f32 %v1020_v31  ;;  %v1467_v31 = vld [vmem:[%s7524_s1 + $0x180] sm:$0xff]  ;;  %v2496_v56 = vmul.f32 %v6402_v42, %v1452_v11 }
  0xf7   : > { %v5490_v23 = vpop.eup %5489  ;;  %2175 = vperm.xlu0 %4911, %v5486_v34   ;;  %5509 = vpow2.f32 %v4288_v47  ;;  %v1454_v34 = vld [vmem:[%s7524_s1 + $0x118] sm:$0xff] }
  0xf8   : > { %v5492_v33 = vpop.eup %5491  ;;  %v6455_v43 = vpop.permute.xlu1 %1810  ;;  %5511 = vpow2.f32 %v4273_v32 }
  0xf9   : > { %v5494_v48 = vpop.eup %5493  ;;  %2100 = vperm.xlu1 %4912, %v5488_v37   ;;  %5513 = vpow2.f32 %v4272_v18  ;;  %v1453_v18 = vld [vmem:[%s7524_s1 + $0x110] sm:$0xff] }
  0xfa   : > { %v5496_v52 = vpop.eup %5495  ;;  %v6464_v55 = vpop.permute.xlu0 %1805  ;;  %5515 = vpow2.f32 %v4291_v40  ;;  %v6518_v42 = vmul.f32 %v6413_v63, %v1453_v18 }
  0xfb   : > { %v5498_v29 = vpop.eup %5497  ;;  %2095 = vperm.xlu0 %4911, %v5490_v23   ;;  %5517 = vpow2.f32 %v4290_v27  ;;  %3334 = vmatmul.mubr.bf16.gmra.mrb[8].mxu0 %v4921_v19  ;;  %v2495_v23 = vmul.f32 %v6407_v49, %v1451_v24 }
  0xfc   : > { %v5500_v1 = vpop.eup %5499  ;;  %v6472_v3 = vpop.permute.xlu1 %1820  ;;  %5519 = vpow2.f32 %v4275_v45  ;;  %3341 = vmatprep.mubr.bf16.mxu0 %v4922_v46 }
  0xfd   : > { %v5502_v5 = vpop.eup %5501  ;;  %2190 = vperm.xlu1 %4912, %v5492_v33   ;;  %5521 = vpow2.f32 %v4274_v50  ;;  %v1469_v50 = vld [vmem:[%s7524_s1 + $0x190] sm:$0xff]  ;;  %v2653_v13 = vpack.c.bf16 %v2496_v56, %v2495_v23 }
  0xfe   : > { %v6477_v7 = vpop.eup %5503  ;;  %v6479_v10 = vpop.permute.xlu0 %1815  ;;  %5523 = vpow2.f32 %v4293_v59  ;;  %v4927_v59 = vld [vmem:[%s6139_s26 + $0x160] ss:$44 sps:$4 sm:$0xff]  }
  0xff   : > { %v6481_v4 = vpop.eup %5505  ;;  %2185 = vperm.xlu0 %4911, %v5494_v48   ;;  %5525 = vpow2.f32 %v4292_v62  ;;  %v6515_v48 = vmul.f32 %v6410_v53, %v1454_v34  ;;  %v329_v62 = vld [vmem:[%s7523_s0 + $0x400] sm:$0xff] }
 0x100   : > { %v6484_v15 = vpop.eup %5507  ;;  %v6486_v16 = vpop.permute.xlu1 %1830  ;;  %5527 = vpow2.f32 %v4311_v54  ;;  %v4294_v24 = vmul.f32 -1.442695, %v329_v62 }
 0x101   : > { %v5510_v57 = vpop.eup %5509  ;;  %2110 = vperm.xlu1 %4912, %v5496_v52   ;;  %5529 = vpow2.f32 %v4310_v6  ;;  %v330_v52 = vld [vmem:[%s7523_s0 + $0x408] sm:$0xff] }
 0x102   : > { %v5512_v20 = vpop.eup %5511  ;;  %v6489_v12 = vpop.permute.xlu0 %1825  ;;  %v1019_v22 = vadd.f32 1.0, %v5510_v57  ;;  %5531 = vpow2.f32 %v4277_v60  ;;  %v4295_v57 = vmul.f32 -1.442695, %v330_v52 }
 0x103   : > { %v5514_v2 = vpop.eup %5513  ;;  %2105 = vperm.xlu0 %4911, %v5498_v29   ;;  %v1004_v47 = vadd.f32 1.0, %v5512_v20  ;;  %5533 = vpow2.f32 %v4276_v36  ;;  %3342 = vmatmul.mubr.bf16.gmra.mrb[12].mxu0 %v4924_v14  ;;  %v1455_v36 = vld [vmem:[%s7524_s1 + $0x120] sm:$0xff] }
 0x104   : > { %v5516_v26 = vpop.eup %5515  ;;  %v1841_v28 = vpop.permute.xlu1 %1840  ;;  %5535 = vrcp.f32 %v1019_v22  ;;  %v1003_v32 = vadd.f32 1.0, %v5514_v2  ;;  %3349 = vmatprep.mubr.bf16.mxu0 %v4925_v17  ;;  %v1471_v2 = vld [vmem:[%s7524_s1 + $0x1a0] sm:$0xff] }
 0x105   : > { %v5518_v9 = vpop.eup %5517  ;;  %v2512_v35 = vmul.f32 %v1841_v28, %v1468_v21  ;;  %2200 = vperm.xlu1 %4912, %v5500_v1   ;;  %5537 = vrcp.f32 %v1004_v47  ;;  %v1022_v37 = vadd.f32 1.0, %v5516_v26  ;;  %v2654_v21 = vpack.c.bf16 %v6515_v48, %v6518_v42  ;;  %v347_v47 = vld [vmem:[%s7523_s0 + $0x490] sm:$0xff]  ;;  %v350_v48 = vld [vmem:[%s7523_s0 + $0x4a8] sm:$0xff]  ;;  %v4933_v42 = vld [vmem:[%s6139_s26 + $0x1b8] ss:$44 sps:$4 sm:$0xff]  }
 0x106   : > { %v5520_v40 = vpop.eup %5519  ;;  %v1836_v27 = vpop.permute.xlu0 %1835  ;;  %5539 = vrcp.f32 %v1003_v32  ;;  %v1021_v19 = vadd.f32 1.0, %v5518_v9  ;;  %v332_v9 = vld [vmem:[%s7523_s0 + $0x418] sm:$0xff] }
 0x107   : > { %v5522_v33 = vpop.eup %5521  ;;  %v2511_v45 = vmul.f32 %v1836_v27, %v1467_v31  ;;  %2195 = vperm.xlu0 %4911, %v5502_v5   ;;  %5541 = vrcp.f32 %v1022_v37  ;;  %v1006_v25 = vadd.f32 1.0, %v5520_v40  ;;  %v1472_v5 = vld [vmem:[%s7524_s1 + $0x1a8] sm:$0xff]  ;;  %v1474_v40 = vld [vmem:[%s7524_s1 + $0x1b8] sm:$0xff] }
 0x108   : > { %v5524_v46 = vpop.eup %5523  ;;  %v1851_v49 = vpop.permute.xlu1 %1850  ;;  %5543 = vrcp.f32 %v1021_v19  ;;  %v1005_v51 = vadd.f32 1.0, %v5522_v33  ;;  %v1458_v27 = vld [vmem:[%s7524_s1 + $0x138] sm:$0xff]  ;;  %v4312_v19 = vmul.f32 -1.442695, %v347_v47 }
 0x109   : > { %v5526_v61 = vpop.eup %5525  ;;  %v2514_v29 = vmul.f32 %v1851_v49, %v1470_v41  ;;  %2120 = vperm.xlu1 %4912, %v6477_v7   ;;  %v2661_v53 = vpack.c.bf16 %v2512_v35, %v2511_v45  ;;  %5545 = vrcp.f32 %v1006_v25  ;;  %v1024_v63 = vadd.f32 1.0, %v5524_v46  ;;  %v1456_v7 = vld [vmem:[%s7524_s1 + $0x128] sm:$0xff]  ;;  %v1473_v25 = vld [vmem:[%s7524_s1 + $0x1b0] sm:$0xff] }
 0x10a   : > { %v5528_v1 = vpop.eup %5527  ;;  %v1846_v54 = vpop.permute.xlu0 %1845  ;;  %5547 = vrcp.f32 %v1005_v51  ;;  %v1023_v6 = vadd.f32 1.0, %v5526_v61  ;;  %v2500_v18 = vmul.f32 %v6415_v58, %v1456_v7  ;;  %v2499_v35 = vmul.f32 %v6417_v8, %v1455_v36  ;;  %v1457_v58 = vld [vmem:[%s7524_s1 + $0x130] sm:$0xff]  ;;  %v334_v61 = vld [vmem:[%s7523_s0 + $0x428] sm:$0xff] }
 0x10b   : > { %v5530_v60 = vpop.eup %5529  ;;  %v2513_v14 = vmul.f32 %v1846_v54, %v1469_v50  ;;  %2115 = vperm.xlu0 %4911, %v6481_v4   ;;  %4520 = vmatprep.subr.bf16.mxu1 %v2661_v53  ;;  %5549 = vrcp.f32 %v1024_v63  ;;  %v1042_v17 = vadd.f32 1.0, %v5528_v1  ;;  %v348_v4 = vld [vmem:[%s7523_s0 + $0x498] sm:$0xff]  ;;  %v4297_v46 = vmul.f32 -1.442695, %v332_v9  ;;  %v1476_v54 = vld [vmem:[%s7524_s1 + $0x1c8] sm:$0xff] }
 0x10c   : > { %v5532_v20 = vpop.eup %5531  ;;  %4521 = vmatpush3.bf16.msra.mxu1 %v2653_v13  ;;  %v1861_v22 = vpop.permute.xlu1 %1860  ;;  %5551 = vrcp.f32 %v1023_v6  ;;  %v1041_v11 = vadd.f32 1.0, %v5530_v60  ;;  %3350 = vmatmul.mubr.bf16.gmra.mrb[16].mxu0 %v4927_v59  ;;  %v4313_v41 = vmul.f32 -1.442695, %v348_v4  ;;  %v349_v59 = vld [vmem:[%s7523_s0 + $0x4a0] sm:$0xff]  ;;  %v2655_v63 = vpack.c.bf16 %v2500_v18, %v2499_v35  ;;  %v1460_v6 = vld [vmem:[%s7524_s1 + $0x148] sm:$0xff]  ;;  %v336_v9 = vld [vmem:[%s7523_s0 + $0x438] sm:$0xff] }
 0x10d   : > { %v5534_v26 = vpop.eup %5533  ;;  %v2662_v28 = vpack.c.bf16 %v2514_v29, %v2513_v14  ;;  %v2516_v31 = vmul.f32 %v1861_v22, %v1472_v5  ;;  %2210 = vperm.xlu1 %4912, %v6484_v15   ;;  %5553 = vrcp.f32 %v1042_v17  ;;  %v1008_v32 = vadd.f32 1.0, %v5532_v20  ;;  %3357 = vmatprep.mubr.bf16.mxu0 %v4931_v0  ;;  %v331_v15 = vld [vmem:[%s7523_s0 + $0x410] sm:$0xff]  ;;  %v333_v13 = vld [vmem:[%s7523_s0 + $0x420] sm:$0xff]  ;;  %v352_v20 = vld [vmem:[%s7523_s0 + $0x4b8] sm:$0xff] }
 0x10e   : > { %v5536_v34 = vpop.eup %5535  ;;  %v1856_v37 = vpop.permute.xlu0 %1855  ;;  %5555 = vrcp.f32 %v1041_v11  ;;  %v1007_v56 = vadd.f32 1.0, %v5534_v26  ;;  %v4296_v52 = vmul.f32 -1.442695, %v331_v15  ;;  %v4936_v29 = vld [vmem:[%s6139_s26 + $0x214] ss:$44 sps:$4 sm:$0xff]   ;;  %v2502_v62 = vmul.f32 %v6420_v39, %v1458_v27  ;;  %v1462_v18 = vld [vmem:[%s7524_s1 + $0x158] sm:$0xff] }
 0x10f   : > { %v5538_v23 = vpop.eup %5537  ;;  %v2515_v8 = vmul.f32 %v1856_v37, %v1471_v2  ;;  %2205 = vperm.xlu0 %4911, %v5536_v34   ;;  %4522 = vmatprep.subr.bf16.mxu1 %v2662_v28  ;;  %5557 = vrcp.f32 %v1008_v32  ;;  %v2501_v0 = vmul.f32 %v6429_v44, %v1457_v58  ;;  %v1459_v39 = vld [vmem:[%s7524_s1 + $0x140] sm:$0xff]  ;;  %v4315_v60 = vmul.f32 -1.442695, %v350_v48  ;;  %v1478_v32 = vld [vmem:[%s7524_s1 + $0x1d8] sm:$0xff]  ;;  %v1464_v58 = vld [vmem:[%s7524_s1 + $0x168] sm:$0xff] }
 0x110   : > { %v5540_v33 = vpop.eup %5539  ;;  %4523 = vmatpush3.bf16.msra.mxu1 %v2654_v21  ;;  %v1871_v45 = vpop.permute.xlu1 %1870  ;;  %5559 = vrcp.f32 %v1007_v56  ;;  %v1475_v14 = vld [vmem:[%s7524_s1 + $0x1c0] sm:$0xff]  ;;  %v4314_v17 = vmul.f32 -1.442695, %v349_v59  ;;  %v4298_v11 = vmul.f32 -1.442695, %v333_v13  ;;  %v2504_v26 = vmul.f32 %v6438_v30, %v1460_v6  ;;  %v1461_v30 = vld [vmem:[%s7524_s1 + $0x150] sm:$0xff] }
 0x111   : > { %v5542_v49 = vpop.eup %5541  ;;  %v2663_v50 = vpack.c.bf16 %v2516_v31, %v2515_v8  ;;  %v2518_v51 = vmul.f32 %v1871_v45, %v1474_v40  ;;  %2130 = vperm.xlu1 %4912, %v5538_v23   ;;  %5561 = vpow2.f32 %v4295_v57  ;;  %v4299_v57 = vmul.f32 -1.442695, %v334_v61  ;;  %v1477_v56 = vld [vmem:[%s7524_s1 + $0x1d0] sm:$0xff]  ;;  %v1463_v8 = vld [vmem:[%s7524_s1 + $0x160] sm:$0xff]  ;;  %v4942_v45 = vld [vmem:[%s6139_s26 + $0x26c] ss:$44 sps:$4 sm:$0xff]  }
 0x112   : > { %v5544_v53 = vpop.eup %5543  ;;  %v1866_v1 = vpop.permute.xlu0 %1865  ;;  %5563 = vpow2.f32 %v4294_v24  ;;  %v351_v24 = vld [vmem:[%s7523_s0 + $0x4b0] sm:$0xff]  ;;  %v2656_v47 = vpack.c.bf16 %v2502_v62, %v2501_v0  ;;  %v2503_v28 = vmul.f32 %v6446_v38, %v1459_v39  ;;  %v4317_v35 = vmul.f32 -1.442695, %v352_v20  ;;  %v1482_v13 = vld [vmem:[%s7524_s1 + $0x1f8] sm:$0xff] }
 0x113   : > { %v5546_v5 = vpop.eup %5545  ;;  %v2517_v44 = vmul.f32 %v1866_v1, %v1473_v25  ;;  %2125 = vperm.xlu0 %4911, %v5540_v33   ;;  %4524 = vmatprep.subr.bf16.mxu1 %v2663_v50  ;;  %5565 = vpow2.f32 %v4313_v41  ;;  %v4316_v15 = vmul.f32 -1.442695, %v351_v24  ;;  %v4939_v23 = vld [vmem:[%s6139_s26 + $0x210] ss:$44 sps:$4 sm:$0xff]   ;;  %v4301_v33 = vmul.f32 -1.442695, %v336_v9 }
 0x114   : > { %v5548_v7 = vpop.eup %5547  ;;  %4525 = vmatpush3.bf16.msra.mxu1 %v2655_v63  ;;  %v1881_v36 = vpop.permute.xlu1 %1880  ;;  %5567 = vpow2.f32 %v4312_v19  ;;  %3358 = vmatmul.mubr.bf16.gmra.mrb[20].mxu0 %v4933_v42  ;;  %v2506_v48 = vmul.f32 %v6455_v43, %v1462_v18  ;;  %v2505_v42 = vmul.f32 %v6464_v55, %v1461_v30  ;;  %v1480_v50 = vld [vmem:[%s7524_s1 + $0x1e8] sm:$0xff]  ;;  %v2508_v61 = vmul.f32 %v6472_v3, %v1464_v58  ;;  %v1479_v55 = vld [vmem:[%s7524_s1 + $0x1e0] sm:$0xff]  ;;  %v1466_v39 = vld [vmem:[%s7524_s1 + $0x178] sm:$0xff] }
 0x115   : > { %v6605_v21 = vpop.eup %5549  ;;  %v2664_v22 = vpack.c.bf16 %v2518_v51, %v2517_v44  ;;  %v2520_v2 = vmul.f32 %v1881_v36, %v1476_v54  ;;  %2220 = vperm.xlu1 %4912, %v5542_v49   ;;  %5569 = vpow2.f32 %v4297_v46  ;;  %3365 = vmatprep.mubr.bf16.mxu0 %v4936_v29  ;;  %v2657_v46 = vpack.c.bf16 %v2504_v26, %v2503_v28  ;;  %v1465_v44 = vld [vmem:[%s7524_s1 + $0x170] sm:$0xff]  ;;  %v354_v58 = vld [vmem:[%s7523_s0 + $0x4c8] sm:$0xff] }
 0x116   : > { %v6610_v4 = vpop.eup %5551  ;;  %v1876_v31 = vpop.permute.xlu0 %1875  ;;  %5571 = vpow2.f32 %v4296_v52  ;;  %v2507_v29 = vmul.f32 %v6479_v10, %v1463_v8  ;;  %v2658_v54 = vpack.c.bf16 %v2506_v48, %v2505_v42  ;;  %v2510_v26 = vmul.f32 %v6486_v16, %v1466_v39  ;;  %v1499_v16 = vld [vmem:[%s7524_s1 + $0x280] sm:$0xff] }
 0x117   : > { %v6620_v34 = vpop.eup %5553  ;;  %v2519_v38 = vmul.f32 %v1876_v31, %v1475_v14  ;;  %2215 = vperm.xlu0 %4911, %v5544_v53   ;;  %4526 = vmatprep.subr.bf16.mxu1 %v2664_v22  ;;  %5573 = vpow2.f32 %v4315_v60  ;;  %v2509_v28 = vmul.f32 %v6489_v12, %v1465_v44  ;;  %v1483_v42 = vld [vmem:[%s7524_s1 + $0x200] sm:$0xff] }
 0x118   : > { %v6628_v37 = vpop.eup %5555  ;;  %4527 = vmatpush3.bf16.msra.mxu1 %v2656_v47  ;;  %v1891_v40 = vpop.permute.xlu1 %1890  ;;  %5575 = vpow2.f32 %v4314_v17  ;;  %v2659_v14 = vpack.c.bf16 %v2508_v61, %v2507_v29  ;;  %v4319_v29 = vmul.f32 -1.442695, %v354_v58 }
 0x119   : > { %v6634_v27 = vpop.eup %5557  ;;  %v2665_v41 = vpack.c.bf16 %v2520_v2, %v2519_v38  ;;  %v2522_v19 = vmul.f32 %v1891_v40, %v1478_v32  ;;  %2140 = vperm.xlu1 %4912, %v5546_v5   ;;  %5577 = vpow2.f32 %v4299_v57  ;;  %v1481_v57 = vld [vmem:[%s7524_s1 + $0x1f0] sm:$0xff]  ;;  %v1500_v32 = vld [vmem:[%s7524_s1 + $0x288] sm:$0xff] }
 0x11a   : > { %v6643_v25 = vpop.eup %5559  ;;  %v1886_v49 = vpop.permute.xlu0 %1885  ;;  %5579 = vpow2.f32 %v4298_v11  ;;  %v335_v40 = vld [vmem:[%s7523_s0 + $0x430] sm:$0xff] }
 0x11b   : > { %v5562_v51 = vpop.eup %5561  ;;  %v2521_v52 = vmul.f32 %v1886_v49, %v1477_v56  ;;  %2135 = vperm.xlu0 %4911, %v5548_v7   ;;  %4528 = vmatprep.subr.bf16.mxu1 %v2665_v41  ;;  %5581 = vpow2.f32 %v4317_v35  ;;  %v2660_v41 = vpack.c.bf16 %v2510_v26, %v2509_v28  ;;  %v357_v28 = vld [vmem:[%s7523_s0 + $0x4e0] sm:$0xff] }
 0x11c   : > { %v5564_v59 = vpop.eup %5563  ;;  %4529 = vmatpush3.bf16.msra.mxu1 %v2657_v46  ;;  %v1901_v43 = vpop.permute.xlu1 %1900  ;;  %v1026_v53 = vadd.f32 1.0, %v5562_v51  ;;  %5583 = vpow2.f32 %v4316_v15  ;;  %3366 = vmatmul.mubr.bf16.gmra.mrb[24].mxu0 %v4939_v23  ;;  %v338_v51 = vld [vmem:[%s7523_s0 + $0x448] sm:$0xff] }
 0x11d   : > { %v5566_v63 = vpop.eup %5565  ;;  %v2666_v62 = vpack.c.bf16 %v2522_v19, %v2521_v52  ;;  %v2524_v0 = vmul.f32 %v1901_v43, %v1480_v50  ;;  %2230 = vperm.xlu1 %4912, %v6605_v21   ;;  %v1025_v1 = vadd.f32 1.0, %v5564_v59  ;;  %5585 = vpow2.f32 %v4301_v33  ;;  %3373 = vmatprep.mubr.bf16.mxu0 %v4942_v45  ;;  %v4945_v21 = vld [vmem:[%s6139_s26 + $0x268] ss:$44 sps:$4 sm:$0xff]  }
 0x11e   : > { %v5568_v3 = vpop.eup %5567  ;;  %v1896_v10 = vpop.permute.xlu0 %1895  ;;  %5587 = vrcp.f32 %v1026_v53  ;;  %v1044_v5 = vadd.f32 1.0, %v5566_v63  ;;  %v1484_v33 = vld [vmem:[%s7524_s1 + $0x208] sm:$0xff]  ;;  %v4300_v50 = vmul.f32 -1.442695, %v335_v40 }
 0x11f   : > { %v5570_v6 = vpop.eup %5569  ;;  %v2523_v60 = vmul.f32 %v1896_v10, %v1479_v55  ;;  %2225 = vperm.xlu0 %4911, %v6610_v4   ;;  %4530 = vmatprep.subr.bf16.mxu1 %v2666_v62  ;;  %5589 = vrcp.f32 %v1025_v1  ;;  %v1043_v7 = vadd.f32 1.0, %v5568_v3  ;;  %v4951_v4 = vld [vmem:[%s6139_s26 + $0x14] ss:$44 sps:$4 sm:$0xff]   ;;  %v4934_v1 = vld [vmem:[%s6139_s26 + $0x64] ss:$44 sps:$4 sm:$0xff]   ;;  %v1502_v10 = vld [vmem:[%s7524_s1 + $0x298] sm:$0xff] }
 0x120   : > { %v5572_v36 = vpop.eup %5571  ;;  %4531 = vmatpush3.bf16.msra.mxu1 %v2658_v54  ;;  %v1911_v17 = vpop.permute.xlu1 %1910  ;;  %5591 = vrcp.f32 %v1044_v5  ;;  %v1028_v20 = vadd.f32 1.0, %v5570_v6  ;;  %v4928_v43 = vld [vmem:[%s6139_s26 + $0x8] ss:$44 sps:$4 sm:$0xff]  }
 0x121   : > { %v5574_v22 = vpop.eup %5573  ;;  %v2667_v2 = vpack.c.bf16 %v2524_v0, %v2523_v60  ;;  %v2526_v11 = vmul.f32 %v1911_v17, %v1482_v13  ;;  %2320 = vperm.xlu1 %4912, %v6620_v34   ;;  %5593 = vrcp.f32 %v1043_v7  ;;  %v1027_v24 = vadd.f32 1.0, %v5572_v36  ;;  %v356_v0 = vld [vmem:[%s7523_s0 + $0x4d8] sm:$0xff]  ;;  %v355_v5 = vld [vmem:[%s7523_s0 + $0x4d0] sm:$0xff] }
 0x122   : > { %v5576_v47 = vpop.eup %5575  ;;  %v1906_v31 = vpop.permute.xlu0 %1905  ;;  %5595 = vrcp.f32 %v1028_v20  ;;  %v1046_v9 = vadd.f32 1.0, %v5574_v22  ;;  %v4303_v13 = vmul.f32 -1.442695, %v338_v51  ;;  %v340_v60 = vld [vmem:[%s7523_s0 + $0x458] sm:$0xff]  ;;  %v4321_v17 = vmul.f32 -1.442695, %v356_v0 }
 0x123   : > { %v5578_v18 = vpop.eup %5577  ;;  %v2525_v30 = vmul.f32 %v1906_v31, %v1481_v57  ;;  %2315 = vperm.xlu0 %4911, %v6628_v37   ;;  %4532 = vmatprep.subr.bf16.mxu1 %v2667_v2  ;;  %5597 = vrcp.f32 %v1027_v24  ;;  %v1045_v34 = vadd.f32 1.0, %v5576_v47  ;;  %v339_v57 = vld [vmem:[%s7523_s0 + $0x450] sm:$0xff]  ;;  %v4320_v2 = vmul.f32 -1.442695, %v355_v5  ;;  %v1486_v47 = vld [vmem:[%s7524_s1 + $0x218] sm:$0xff] }
 0x124   : > { %v5580_v38 = vpop.eup %5579  ;;  %4533 = vmatpush3.bf16.msra.mxu1 %v2659_v14  ;;  %v2001_v35 = vpop.permute.xlu1 %2000  ;;  %5599 = vrcp.f32 %v1046_v9  ;;  %v1030_v12 = vadd.f32 1.0, %v5578_v18  ;;  %3374 = vmatmul.mubr.bf16.gmra.mrb[28].mxu0 %v4945_v21  ;;  %v1501_v14 = vld [vmem:[%s7524_s1 + $0x290] sm:$0xff]  ;;  %v4305_v26 = vmul.f32 -1.442695, %v340_v60  ;;  %v4304_v9 = vmul.f32 -1.442695, %v339_v57 }
 0x125   : > { %v5582_v56 = vpop.eup %5581  ;;  %v2668_v15 = vpack.c.bf16 %v2526_v11, %v2525_v30  ;;  %v2544_v37 = vmul.f32 %v2001_v35, %v1500_v32  ;;  %2150 = vperm.xlu1 %4912, %v6634_v27   ;;  %5601 = vrcp.f32 %v1045_v34  ;;  %v1029_v23 = vadd.f32 1.0, %v5580_v38  ;;  %3511 = vmatprep.mubr.bf16.mxu0 %v4951_v4  ;;  %v353_v27 = vld [vmem:[%s7523_s0 + $0x4c0] sm:$0xff]  ;;  %v358_v11 = vld [vmem:[%s7523_s0 + $0x4e8] sm:$0xff]  ;;  %v1485_v38 = vld [vmem:[%s7524_s1 + $0x210] sm:$0xff] }
 0x126   : > { %v5584_v8 = vpop.eup %5583  ;;  %v1996_v19 = vpop.permute.xlu0 %1995  ;;  %5603 = vrcp.f32 %v1030_v12  ;;  %v1048_v45 = vadd.f32 1.0, %v5582_v56  ;;  %v4318_v62 = vmul.f32 -1.442695, %v353_v27  ;;  %v342_v18 = vld [vmem:[%s7523_s0 + $0x468] sm:$0xff]  ;;  %v4323_v35 = vmul.f32 -1.442695, %v358_v11 }
 0x127   : > { %v5586_v46 = vpop.eup %5585  ;;  %v2543_v48 = vmul.f32 %v1996_v19, %v1499_v16  ;;  %2145 = vperm.xlu0 %4911, %v6643_v25   ;;  %4534 = vmatprep.subr.bf16.mxu1 %v2668_v15  ;;  %5605 = vrcp.f32 %v1029_v23  ;;  %v1047_v49 = vadd.f32 1.0, %v5584_v8  ;;  %v337_v25 = vld [vmem:[%s7523_s0 + $0x440] sm:$0xff]  ;;  %v4940_v23 = vld [vmem:[%s6139_s26 + $0xbc] ss:$44 sps:$4 sm:$0xff]   ;;  %v4307_v19 = vmul.f32 -1.442695, %v342_v18 }
 0x128   : > { %v5588_v52 = vpop.eup %5587  ;;  %4535 = vmatpush3.bf16.msra.mxu1 %v2660_v41  ;;  %v1921_v59 = vpop.permute.xlu1 %1920  ;;  %5607 = vrcp.f32 %v1048_v45  ;;  %v1032_v61 = vadd.f32 1.0, %v5586_v46  ;;  %v4302_v44 = vmul.f32 -1.442695, %v337_v25  ;;  %v341_v16 = vld [vmem:[%s7523_s0 + $0x460] sm:$0xff]  ;;  %v1504_v41 = vld [vmem:[%s7524_s1 + $0x2a8] sm:$0xff]  ;;  %v1489_v18 = vld [vmem:[%s7524_s1 + $0x230] sm:$0xff] }
 0x129   : > { %v5590_v55 = vpop.eup %5589  ;;  %v2677_v53 = vpack.c.bf16 %v2544_v37, %v2543_v48  ;;  %v2528_v63 = vmul.f32 %v1921_v59, %v1484_v33  ;;  %2240 = vperm.xlu1 %4912, %v5588_v52   ;;  %5609 = vrcp.f32 %v1047_v49  ;;  %v4938_v12 = vld [vmem:[%s6139_s26 + $0x60] ss:$44 sps:$4 sm:$0xff]   ;;  %v4322_v37 = vmul.f32 -1.442695, %v357_v28  ;;  %v1490_v28 = vld [vmem:[%s7524_s1 + $0x238] sm:$0xff] }
 0x12a   : > { %v5592_v3 = vpop.eup %5591  ;;  %v1916_v54 = vpop.permute.xlu0 %1915  ;;  %5611 = vrcp.f32 %v1032_v61  ;;  %v4306_v27 = vmul.f32 -1.442695, %v341_v16  ;;  %v1488_v61 = vld [vmem:[%s7524_s1 + $0x228] sm:$0xff]  ;;  %v4946_v5 = vld [vmem:[%s6139_s26 + $0x114] ss:$44 sps:$4 sm:$0xff]  }
 0x12b   : > { %v5594_v6 = vpop.eup %5593  ;;  %v2527_v39 = vmul.f32 %v1916_v54, %v1483_v42  ;;  %2235 = vperm.xlu0 %4911, %v5590_v55   ;;  %4584 = vmatprep.subr.bf16.mxu0 %v2677_v53  ;;  %5613 = vpow2.f32 %v4300_v50  ;;  %v1503_v42 = vld [vmem:[%s7524_s1 + $0x2a0] sm:$0xff] }
 0x12c   : > { %v5596_v7 = vpop.eup %5595  ;;  %v2011_v36 = vpop.permute.xlu1 %2010  ;;  %5615 = vpow2.f32 %v4319_v29  ;;  %3415 = vmatmul.mubr.bf16.vlgmr.msra.gmra.mrb[0].mxu1 %v4928_v43 }
 0x12d   : > { %v5598_v20 = vpop.eup %5597  ;;  %v2669_v21 = vpack.c.bf16 %v2528_v63, %v2527_v39  ;;  %v2546_v22 = vmul.f32 %v2011_v36, %v1502_v10  ;;  %2330 = vperm.xlu1 %4912, %v5592_v3   ;;  %5617 = vpow2.f32 %v4318_v62  ;;  %3422 = vmatprep.mubr.bf16.mxu1 %v4934_v1  ;;  %v1487_v62 = vld [vmem:[%s7524_s1 + $0x220] sm:$0xff] }
 0x12e   : > { %v5600_v24 = vpop.eup %5599  ;;  %v2006_v4 = vpop.permute.xlu0 %2005  ;;  %5619 = vpow2.f32 %v4303_v13  ;;  %v4944_v1 = vld [vmem:[%s6139_s26 + $0xb8] ss:$44 sps:$4 sm:$0xff]  }
 0x12f   : > { %v5602_v31 = vpop.eup %5601  ;;  %v2545_v32 = vmul.f32 %v2006_v4, %v1501_v14  ;;  %2325 = vperm.xlu0 %4911, %v5594_v6   ;;  %4585 = vmatpush3.bf16.msra.mxu0 %v2669_v21  ;;  %5621 = vpow2.f32 %v4302_v44  ;;  %v1506_v44 = vld [vmem:[%s7524_s1 + $0x2b8] sm:$0xff] }
 0x130   : > { %v5604_v30 = vpop.eup %5603  ;;  %v1931_v34 = vpop.permute.xlu1 %1930  ;;  %5623 = vpow2.f32 %v4321_v17  ;;  %v360_v4 = vld [vmem:[%s7523_s0 + $0x4f8] sm:$0xff] }
 0x131   : > { %v5606_v40 = vpop.eup %5605  ;;  %v2678_v56 = vpack.c.bf16 %v2546_v22, %v2545_v32  ;;  %v2530_v15 = vmul.f32 %v1931_v34, %v1486_v47  ;;  %2250 = vperm.xlu1 %4912, %v5596_v7   ;;  %5625 = vpow2.f32 %v4320_v2  ;;  %v359_v34 = vld [vmem:[%s7523_s0 + $0x4f0] sm:$0xff] }
 0x132   : > { %v6744_v58 = vpop.eup %5607  ;;  %v1926_v8 = vpop.permute.xlu0 %1925  ;;  %5627 = vpow2.f32 %v4305_v26 }
 0x133   : > { %v6749_v33 = vpop.eup %5609  ;;  %v2529_v45 = vmul.f32 %v1926_v8, %v1485_v38  ;;  %2245 = vperm.xlu0 %4911, %v5598_v20   ;;  %4586 = vmatprep.subr.bf16.mxu0 %v2678_v56  ;;  %5629 = vpow2.f32 %v4304_v9  ;;  %v1505_v20 = vld [vmem:[%s7524_s1 + $0x2b0] sm:$0xff] }
 0x134   : > { %v6751_v46 = vpop.eup %5611  ;;  %v2021_v48 = vpop.permute.xlu1 %2020  ;;  %5631 = vpow2.f32 %v4323_v35  ;;  %3423 = vmatmul.mubr.bf16.gmra.mrb[4].mxu1 %v4938_v12  ;;  %v4325_v12 = vmul.f32 -1.442695, %v360_v4  ;;  %v4948_v56 = vld [vmem:[%s6139_s26 + $0x110] ss:$44 sps:$4 sm:$0xff]  }
 0x135   : > { %v5614_v49 = vpop.eup %5613  ;;  %v2670_v50 = vpack.c.bf16 %v2530_v15, %v2529_v45  ;;  %v2548_v51 = vmul.f32 %v2021_v48, %v1504_v41  ;;  %2340 = vperm.xlu1 %4912, %v5600_v24   ;;  %5633 = vpow2.f32 %v4322_v37  ;;  %3430 = vmatprep.mubr.bf16.mxu1 %v4940_v23  ;;  %v343_v8 = vld [vmem:[%s7523_s0 + $0x470] sm:$0xff]  ;;  %v4952_v41 = vld [vmem:[%s6139_s26 + $0x16c] ss:$44 sps:$4 sm:$0xff]   ;;  %v4324_v48 = vmul.f32 -1.442695, %v359_v34 }
 0x136   : > { %v5616_v52 = vpop.eup %5615  ;;  %v2016_v59 = vpop.permute.xlu0 %2015  ;;  %v1031_v29 = vadd.f32 1.0, %v5614_v49  ;;  %5635 = vpow2.f32 %v4307_v19  ;;  %v1508_v45 = vld [vmem:[%s7524_s1 + $0x2c8] sm:$0xff] }
 0x137   : > { %v5618_v25 = vpop.eup %5617  ;;  %v2547_v43 = vmul.f32 %v2016_v59, %v1503_v42  ;;  %2335 = vperm.xlu0 %4911, %v5602_v31   ;;  %4587 = vmatpush3.bf16.msra.mxu0 %v2670_v50  ;;  %v1050_v55 = vadd.f32 1.0, %v5616_v52  ;;  %5637 = vpow2.f32 %v4306_v27 }
 0x138   : > { %v5620_v53 = vpop.eup %5619  ;;  %v1941_v63 = vpop.permute.xlu1 %1940  ;;  %5639 = vrcp.f32 %v1031_v29  ;;  %v1049_v0 = vadd.f32 1.0, %v5618_v25  ;;  %v4308_v29 = vmul.f32 -1.442695, %v343_v8  ;;  %v364_v25 = vld [vmem:[%s7523_s0 + $0x518] sm:$0xff] }
 0x139   : > { %v5622_v3 = vpop.eup %5621  ;;  %v2679_v54 = vpack.c.bf16 %v2548_v51, %v2547_v43  ;;  %v2532_v10 = vmul.f32 %v1941_v63, %v1488_v61  ;;  %2260 = vperm.xlu1 %4912, %v5604_v30   ;;  %5641 = vrcp.f32 %v1050_v55  ;;  %v1034_v13 = vadd.f32 1.0, %v5620_v53  ;;  %v361_v51 = vld [vmem:[%s7523_s0 + $0x500] sm:$0xff] }
 0x13a   : > { %v5624_v6 = vpop.eup %5623  ;;  %v1936_v39 = vpop.permute.xlu0 %1935  ;;  %5643 = vrcp.f32 %v1049_v0  ;;  %v1033_v60 = vadd.f32 1.0, %v5622_v3  ;;  %v1507_v61 = vld [vmem:[%s7524_s1 + $0x2c0] sm:$0xff]  ;;  %v1492_v3 = vld [vmem:[%s7524_s1 + $0x248] sm:$0xff] }
 0x13b   : > { %v5626_v7 = vpop.eup %5625  ;;  %v2531_v36 = vmul.f32 %v1936_v39, %v1487_v62  ;;  %2255 = vperm.xlu0 %4911, %v5606_v40   ;;  %4588 = vmatprep.subr.bf16.mxu0 %v2679_v54  ;;  %5645 = vrcp.f32 %v1034_v13  ;;  %v1052_v14 = vadd.f32 1.0, %v5624_v6  ;;  %v344_v40 = vld [vmem:[%s7523_s0 + $0x478] sm:$0xff]  ;;  %v363_v62 = vld [vmem:[%s7523_s0 + $0x510] sm:$0xff]  ;;  %v4326_v54 = vmul.f32 -1.442695, %v361_v51  ;;  %v365_v39 = vld [vmem:[%s7523_s0 + $0x520] sm:$0xff] }
 0x13c   : > { %v5628_v17 = vpop.eup %5627  ;;  %v2031_v57 = vpop.permute.xlu1 %2030  ;;  %5647 = vrcp.f32 %v1033_v60  ;;  %v1051_v21 = vadd.f32 1.0, %v5626_v7  ;;  %3431 = vmatmul.mubr.bf16.gmra.mrb[8].mxu1 %v4944_v1  ;;  %v4309_v50 = vmul.f32 -1.442695, %v344_v40  ;;  %v4329_v6 = vmul.f32 -1.442695, %v364_v25  ;;  %v1491_v7 = vld [vmem:[%s7524_s1 + $0x240] sm:$0xff] }
 0x13d   : > { %v5630_v22 = vpop.eup %5629  ;;  %v2671_v2 = vpack.c.bf16 %v2532_v10, %v2531_v36  ;;  %v2550_v11 = vmul.f32 %v2031_v57, %v1506_v44  ;;  %2350 = vperm.xlu1 %4912, %v6744_v58   ;;  %5649 = vrcp.f32 %v1052_v14  ;;  %v1036_v24 = vadd.f32 1.0, %v5628_v17  ;;  %3438 = vmatprep.mubr.bf16.mxu1 %v4946_v5  ;;  %v366_v10 = vld [vmem:[%s7523_s0 + $0x528] sm:$0xff]  ;;  %v1494_v40 = vld [vmem:[%s7524_s1 + $0x258] sm:$0xff] }
 0x13e   : > { %v5632_v47 = vpop.eup %5631  ;;  %v2026_v26 = vpop.permute.xlu0 %2025  ;;  %5651 = vrcp.f32 %v1051_v21  ;;  %v1035_v31 = vadd.f32 1.0, %v5630_v22  ;;  %v4328_v36 = vmul.f32 -1.442695, %v363_v62  ;;  %v4954_v14 = vld [vmem:[%s6139_s26 + $0x168] ss:$44 sps:$4 sm:$0xff]  }
 0x13f   : > { %v5634_v32 = vpop.eup %5633  ;;  %v2549_v9 = vmul.f32 %v2026_v26, %v1505_v20  ;;  %2345 = vperm.xlu0 %4911, %v6749_v33   ;;  %4589 = vmatpush3.bf16.msra.mxu0 %v2671_v2  ;;  %5653 = vrcp.f32 %v1036_v24  ;;  %v1054_v30 = vadd.f32 1.0, %v5632_v47  ;;  %v4331_v21 = vmul.f32 -1.442695, %v366_v10  ;;  %v4958_v22 = vld [vmem:[%s6139_s26 + $0x1c4] ss:$44 sps:$4 sm:$0xff]   ;;  %v1510_v24 = vld [vmem:[%s7524_s1 + $0x2d8] sm:$0xff] }
 0x140   : > { %v5636_v38 = vpop.eup %5635  ;;  %v1951_v35 = vpop.permute.xlu1 %1950  ;;  %5655 = vrcp.f32 %v1035_v31  ;;  %v1053_v16 = vadd.f32 1.0, %v5634_v32  ;;  %v4330_v4 = vmul.f32 -1.442695, %v365_v39  ;;  %v368_v47 = vld [vmem:[%s7523_s0 + $0x538] sm:$0xff]  ;;  %v1512_v51 = vld [vmem:[%s7524_s1 + $0x2e8] sm:$0xff] }
 0x141   : > { %v5638_v15 = vpop.eup %5637  ;;  %v2680_v37 = vpack.c.bf16 %v2550_v11, %v2549_v9  ;;  %v2534_v23 = vmul.f32 %v1951_v35, %v1490_v28  ;;  %2270 = vperm.xlu1 %4912, %v6751_v46   ;;  %5657 = vrcp.f32 %v1054_v30  ;;  %v1038_v58 = vadd.f32 1.0, %v5636_v38  ;;  %v362_v46 = vld [vmem:[%s7523_s0 + $0x508] sm:$0xff]  ;;  %v1509_v9 = vld [vmem:[%s7524_s1 + $0x2d0] sm:$0xff] }
 0x142   : > { %v5640_v19 = vpop.eup %5639  ;;  %v1946_v33 = vpop.permute.xlu0 %1945  ;;  %5659 = vrcp.f32 %v1053_v16  ;;  %v1037_v27 = vadd.f32 1.0, %v5638_v15  ;;  %v4327_v63 = vmul.f32 -1.442695, %v362_v46  ;;  %v4333_v38 = vmul.f32 -1.442695, %v368_v47  ;;  %v367_v35 = vld [vmem:[%s7523_s0 + $0x530] sm:$0xff] }
 0x143   : > { %v5642_v42 = vpop.eup %5641  ;;  %v2533_v49 = vmul.f32 %v1946_v33, %v1489_v18  ;;  %2265 = vperm.xlu0 %4911, %v5640_v19   ;;  %4590 = vmatprep.subr.bf16.mxu0 %v2680_v37  ;;  %5661 = vrcp.f32 %v1038_v58  ;;  %v1493_v37 = vld [vmem:[%s7524_s1 + $0x250] sm:$0xff]  ;;  %v370_v19 = vld [vmem:[%s7523_s0 + $0x548] sm:$0xff] }
 0x144   : > { %v5644_v52 = vpop.eup %5643  ;;  %v2041_v59 = vpop.permute.xlu1 %2040  ;;  %5663 = vrcp.f32 %v1037_v27  ;;  %3439 = vmatmul.mubr.bf16.gmra.mrb[12].mxu1 %v4948_v56  ;;  %v4960_v33 = vld [vmem:[%s6139_s26 + $0x1c0] ss:$44 sps:$4 sm:$0xff]   ;;  %v4335_v25 = vmul.f32 -1.442695, %v370_v19  ;;  %v371_v47 = vld [vmem:[%s7523_s0 + $0x550] sm:$0xff] }
 0x145   : > { %v5646_v43 = vpop.eup %5645  ;;  %v2672_v55 = vpack.c.bf16 %v2534_v23, %v2533_v49  ;;  %v2552_v53 = vmul.f32 %v2041_v59, %v1508_v45  ;;  %2360 = vperm.xlu1 %4912, %v5642_v42   ;;  %5665 = vpow2.f32 %v4325_v12  ;;  %3446 = vmatprep.mubr.bf16.mxu1 %v4952_v41  ;;  %v4332_v41 = vmul.f32 -1.442695, %v367_v35  ;;  %v4964_v42 = vld [vmem:[%s6139_s26 + $0x21c] ss:$44 sps:$4 sm:$0xff]  }
 0x146   : > { %v5648_v0 = vpop.eup %5647  ;;  %v2036_v1 = vpop.permute.xlu0 %2035  ;;  %5667 = vpow2.f32 %v4324_v48  ;;  %v1496_v10 = vld [vmem:[%s7524_s1 + $0x268] sm:$0xff] }
 0x147   : > { %v5650_v13 = vpop.eup %5649  ;;  %v2551_v5 = vmul.f32 %v2036_v1, %v1507_v61  ;;  %2355 = vperm.xlu0 %4911, %v5644_v52   ;;  %4591 = vmatpush3.bf16.msra.mxu0 %v2672_v55  ;;  %5669 = vpow2.f32 %v4309_v50 }
 0x148   : > { %v5652_v44 = vpop.eup %5651  ;;  %v1961_v60 = vpop.permute.xlu1 %1960  ;;  %5671 = vpow2.f32 %v4308_v29 }
 0x149   : > { %v5654_v17 = vpop.eup %5653  ;;  %v2681_v57 = vpack.c.bf16 %v2552_v53, %v2551_v5  ;;  %v2536_v20 = vmul.f32 %v1961_v60, %v1492_v3  ;;  %2280 = vperm.xlu1 %4912, %v5646_v43   ;;  %5673 = vpow2.f32 %v4327_v63  ;;  %v1511_v53 = vld [vmem:[%s7524_s1 + $0x2e0] sm:$0xff] }
 0x14a   : > { %v5656_v2 = vpop.eup %5655  ;;  %v1956_v11 = vpop.permute.xlu0 %1955  ;;  %5675 = vpow2.f32 %v4326_v54 }
 0x14b   : > { %v5658_v26 = vpop.eup %5657  ;;  %v2535_v28 = vmul.f32 %v1956_v11, %v1491_v7  ;;  %2275 = vperm.xlu0 %4911, %v5648_v0   ;;  %4592 = vmatprep.subr.bf16.mxu0 %v2681_v57  ;;  %5677 = vpow2.f32 %v4329_v6  ;;  %v1495_v7 = vld [vmem:[%s7524_s1 + $0x260] sm:$0xff] }
 0x14c   : > { %v6831_v31 = vpop.eup %5659  ;;  %v2051_v32 = vpop.permute.xlu1 %2050  ;;  %5679 = vpow2.f32 %v4328_v36  ;;  %3447 = vmatmul.mubr.bf16.gmra.mrb[16].mxu1 %v4954_v14  ;;  %v369_v14 = vld [vmem:[%s7523_s0 + $0x540] sm:$0xff] }
 0x14d   : > { %v6836_v18 = vpop.eup %5661  ;;  %v2673_v30 = vpack.c.bf16 %v2536_v20, %v2535_v28  ;;  %v2554_v34 = vmul.f32 %v2051_v32, %v1510_v24  ;;  %2370 = vperm.xlu1 %4912, %v5650_v13   ;;  %5681 = vpow2.f32 %v4331_v21  ;;  %3454 = vmatprep.mubr.bf16.mxu1 %v4958_v22  ;;  %v372_v22 = vld [vmem:[%s7523_s0 + $0x558] sm:$0xff]  ;;  %v374_v32 = vld [vmem:[%s7523_s0 + $0x568] sm:$0xff] }
 0x14e   : > { %v6841_v16 = vpop.eup %5663  ;;  %v2046_v12 = vpop.permute.xlu0 %2045  ;;  %5683 = vpow2.f32 %v4330_v4  ;;  %v1514_v24 = vld [vmem:[%s7524_s1 + $0x2f8] sm:$0xff] }
 0x14f   : > { %v5666_v56 = vpop.eup %5665  ;;  %v2553_v15 = vmul.f32 %v2046_v12, %v1509_v9  ;;  %2365 = vperm.xlu0 %4911, %v5652_v44   ;;  %4593 = vmatpush3.bf16.msra.mxu0 %v2673_v30  ;;  %5685 = vpow2.f32 %v4333_v38  ;;  %v1513_v30 = vld [vmem:[%s7524_s1 + $0x2f0] sm:$0xff]  ;;  %v373_v38 = vld [vmem:[%s7523_s0 + $0x560] sm:$0xff] }
 0x150   : > { %v5668_v23 = vpop.eup %5667  ;;  %v1971_v58 = vpop.permute.xlu1 %1970  ;;  %v1056_v8 = vadd.f32 1.0, %v5666_v56 }
 0x151   : > { %v5670_v45 = vpop.eup %5669  ;;  %v2682_v27 = vpack.c.bf16 %v2554_v34, %v2553_v15  ;;  %v2538_v48 = vmul.f32 %v1971_v58, %v1494_v40  ;;  %2290 = vperm.xlu1 %4912, %v5654_v17   ;;  %v1055_v46 = vadd.f32 1.0, %v5668_v23  ;;  %v4966_v17 = vld [vmem:[%s6139_s26 + $0x218] ss:$44 sps:$4 sm:$0xff]   ;;  %v4337_v34 = vmul.f32 -1.442695, %v372_v22 }
 0x152   : > { %v5672_v49 = vpop.eup %5671  ;;  %v1966_v50 = vpop.permute.xlu0 %1965  ;;  %5687 = vrcp.f32 %v1056_v8  ;;  %v1040_v52 = vadd.f32 1.0, %v5670_v45  ;;  %v4336_v40 = vmul.f32 -1.442695, %v371_v47  ;;  %v4339_v23 = vmul.f32 -1.442695, %v374_v32  ;;  %v1497_v45 = vld [vmem:[%s7524_s1 + $0x270] sm:$0xff] }
 0x153   : > { %v5674_v59 = vpop.eup %5673  ;;  %v2537_v61 = vmul.f32 %v1966_v50, %v1493_v37  ;;  %2285 = vperm.xlu0 %4911, %v5656_v2   ;;  %4594 = vmatprep.subr.bf16.mxu0 %v2682_v27  ;;  %5689 = vrcp.f32 %v1055_v46  ;;  %v1039_v29 = vadd.f32 1.0, %v5672_v49  ;;  %v4970_v2 = vld [vmem:[%s6139_s26 + $0x274] ss:$44 sps:$4 sm:$0xff]   ;;  %v1498_v37 = vld [vmem:[%s7524_s1 + $0x278] sm:$0xff] }
 0x154   : > { %v5676_v43 = vpop.eup %5675  ;;  %v2061_v55 = vpop.permute.xlu1 %2060  ;;  %5691 = vrcp.f32 %v1040_v52  ;;  %v1058_v63 = vadd.f32 1.0, %v5674_v59  ;;  %3455 = vmatmul.mubr.bf16.gmra.mrb[20].mxu1 %v4960_v33  ;;  %v4978_v50 = vld [vmem:[%s6139_s26 + $0x1c] ss:$44 sps:$4 sm:$0xff]   ;;  %v1533_v47 = vld [vmem:[%s7524_s1 + $0x390] sm:$0xff] }
 0x155   : > { %v5678_v62 = vpop.eup %5677  ;;  %v2674_v0 = vpack.c.bf16 %v2538_v48, %v2537_v61  ;;  %v2556_v1 = vmul.f32 %v2061_v55, %v1512_v51  ;;  %2380 = vperm.xlu1 %4912, %v5658_v26   ;;  %5693 = vpow2.f32 %v4332_v41  ;;  %3462 = vmatprep.mubr.bf16.mxu1 %v4964_v42  ;;  %v1057_v13 = vadd.f32 1.0, %v5676_v43  ;;  %v4972_v48 = vld [vmem:[%s6139_s26 + $0x270] ss:$44 sps:$4 sm:$0xff]   ;;  %v1532_v59 = vld [vmem:[%s7524_s1 + $0x388] sm:$0xff]  ;;  %v1531_v55 = vld [vmem:[%s7524_s1 + $0x380] sm:$0xff] }
 0x156   : > { %v5680_v3 = vpop.eup %5679  ;;  %v2056_v54 = vpop.permute.xlu0 %2055  ;;  %5695 = vrcp.f32 %v1039_v29  ;;  %v1060_v39 = vadd.f32 1.0, %v5678_v62  ;;  %v4338_v41 = vmul.f32 -1.442695, %v373_v38 }
 0x157   : > { %v5682_v5 = vpop.eup %5681  ;;  %v2555_v6 = vmul.f32 %v2056_v54, %v1511_v53  ;;  %2375 = vperm.xlu0 %4911, %v6831_v31   ;;  %4595 = vmatpush3.bf16.msra.mxu0 %v2674_v0  ;;  %5697 = vpow2.f32 %v4335_v25  ;;  %v1059_v36 = vadd.f32 1.0, %v5680_v3  ;;  %v4334_v31 = vmul.f32 -1.442695, %v369_v14  ;;  %v1516_v54 = vld [vmem:[%s7524_s1 + $0x308] sm:$0xff] }
 0x158   : > { %v5684_v44 = vpop.eup %5683  ;;  %v1981_v60 = vpop.permute.xlu1 %1980  ;;  %5699 = vrcp.f32 %v1058_v63  ;;  %v1062_v21 = vadd.f32 1.0, %v5682_v5 }
 0x159   : > { %v2683_v57 = vpack.c.bf16 %v2556_v1, %v2555_v6  ;;  %v2540_v20 = vmul.f32 %v1981_v60, %v1496_v10  ;;  %2300 = vperm.xlu1 %4912, %v6836_v18   ;;  %5701 = vrcp.f32 %v1057_v13  ;;  %v1061_v4 = vadd.f32 1.0, %v5684_v44  ;;  %v5686_v26 = vpop.eup %5685  ;;  %v4949_v10 = vld [vmem:[%s6139_s26 + $0x10] ss:$44 sps:$4 sm:$0xff]   ;;  %v1515_v44 = vld [vmem:[%s7524_s1 + $0x300] sm:$0xff]  ;;  %v4955_v60 = vld [vmem:[%s6139_s26 + $0x6c] ss:$44 sps:$4 sm:$0xff]  }
 0x15a   : > { %v1976_v11 = vpop.permute.xlu0 %1975  ;;  %5703 = vrcp.f32 %v1060_v39  ;;  %v1064_v27 = vadd.f32 1.0, %v5686_v26 }
 0x15b   : > { %v2539_v28 = vmul.f32 %v1976_v11, %v1495_v7  ;;  %2295 = vperm.xlu0 %4911, %v6841_v16   ;;  %4596 = vmatprep.subr.bf16.mxu0 %v2683_v57  ;;  %5705 = vrcp.f32 %v1059_v36 }
 0x15c   : > { %v5688_v9 = vpop.eup %5687  ;;  %v2071_v18 = vpop.permute.xlu1 %2070  ;;  %3463 = vmatmul.mubr.bf16.gmra.mrb[24].mxu1 %v4966_v17  ;;  %5707 = vrcp.f32 %v1062_v21 }
 0x15d   : > { %v5690_v35 = vpop.eup %5689  ;;  %v2675_v16 = vpack.c.bf16 %v2540_v20, %v2539_v28  ;;  %v2558_v12 = vmul.f32 %v2071_v18, %v1514_v24  ;;  %2390 = vperm.xlu1 %4912, %v5688_v9   ;;  %3470 = vmatprep.mubr.bf16.mxu1 %v4970_v2  ;;  %5709 = vrcp.f32 %v1061_v4  ;;  %v1534_v20 = vld [vmem:[%s7524_s1 + $0x398] sm:$0xff] }
 0x15e   : > { %v5692_v56 = vpop.eup %5691  ;;  %v2066_v15 = vpop.permute.xlu0 %2065  ;;  %5711 = vpow2.f32 %v4334_v31 }
 0x15f   : > { %v5694_v58 = vpop.eup %5693  ;;  %v2557_v8 = vmul.f32 %v2066_v15, %v1513_v30  ;;  %2385 = vperm.xlu0 %4911, %v5690_v35   ;;  %4597 = vmatpush3.bf16.msra.mxu0 %v2675_v16  ;;  %5713 = vpow2.f32 %v4337_v34  ;;  %v1518_v34 = vld [vmem:[%s7524_s1 + $0x318] sm:$0xff]  ;;  %v4957_v35 = vld [vmem:[%s6139_s26 + $0x68] ss:$44 sps:$4 sm:$0xff]   ;;  %v4961_v15 = vld [vmem:[%s6139_s26 + $0xc4] ss:$44 sps:$4 sm:$0xff]  }
 0x160   : > { %v5696_v19 = vpop.eup %5695  ;;  %v1991_v33 = vpop.permute.xlu1 %1990  ;;  %5715 = vpow2.f32 %v4336_v40  ;;  %v1063_v61 = vadd.f32 1.0, %v5694_v58 }
 0x161   : > { %v5698_v46 = vpop.eup %5697  ;;  %v2684_v42 = vpack.c.bf16 %v2558_v12, %v2557_v8  ;;  %v2542_v49 = vmul.f32 %v1991_v33, %v1498_v37  ;;  %2310 = vperm.xlu1 %4912, %v5692_v56   ;;  %5717 = vpow2.f32 %v4339_v23  ;;  %v1517_v56 = vld [vmem:[%s7524_s1 + $0x310] sm:$0xff] }
 0x162   : > { %v5700_v51 = vpop.eup %5699  ;;  %v1986_v52 = vpop.permute.xlu0 %1985  ;;  %5719 = vpow2.f32 %v4338_v41  ;;  %v1066_v53 = vadd.f32 1.0, %v5698_v46  ;;  %v1536_v41 = vld [vmem:[%s7524_s1 + $0x3a8] sm:$0xff] }
 0x163   : > { %v2541_v29 = vmul.f32 %v1986_v52, %v1497_v45  ;;  %2305 = vperm.xlu0 %4911, %v5696_v19   ;;  %4598 = vmatprep.subr.bf16.mxu0 %v2684_v42  ;;  %v5702_v25 = vpop.eup %5701  ;;  %5721 = vrcp.f32 %v1064_v27  ;;  %v1535_v45 = vld [vmem:[%s7524_s1 + $0x3a0] sm:$0xff] }
 0x164   : > { %v2161_v43 = vpop.permute.xlu1 %2160  ;;  %3471 = vmatmul.mubr.bf16.gmra.mrb[28].mxu1 %v4972_v48  ;;  %v5704_v63 = vpop.eup %5703  ;;  %5723 = vrcp.f32 %v1063_v61 }
 0x165   : > { %v2676_v62 = vpack.c.bf16 %v2542_v49, %v2541_v29  ;;  %v2576_v0 = vmul.f32 %v2161_v43, %v1532_v59  ;;  %2400 = vperm.xlu1 %4912, %v5700_v51   ;;  %3608 = vmatprep.mubr.bf16.mxu1 %v4978_v50  ;;  %v5706_v1 = vpop.eup %5705  ;;  %5725 = vrcp.f32 %v1066_v53  ;;  %v1520_v49 = vld [vmem:[%s7524_s1 + $0x328] sm:$0xff]  ;;  %v1519_v29 = vld [vmem:[%s7524_s1 + $0x320] sm:$0xff] }
 0x166   : > { %v2156_v3 = vpop.permute.xlu0 %2155  ;;  %v5708_v13 = vpop.eup %5707  ;;  %v4963_v50 = vld [vmem:[%s6139_s26 + $0xc0] ss:$44 sps:$4 sm:$0xff]  }
 0x167   : > { %v2575_v5 = vmul.f32 %v2156_v3, %v1531_v55  ;;  %2395 = vperm.xlu0 %4911, %v5702_v25   ;;  %4599 = vmatpush3.bf16.msra.mxu0 %v2676_v62  ;;  %v5710_v6 = vpop.eup %5709  ;;  %v4967_v25 = vld [vmem:[%s6139_s26 + $0x11c] ss:$44 sps:$4 sm:$0xff]  }
 0x168   : > { %v2081_v39 = vpop.permute.xlu1 %2080  ;;  %v5712_v7 = vpop.eup %5711  ;;  %v1538_v62 = vld [vmem:[%s7524_s1 + $0x3b8] sm:$0xff] }
 0x169   : > { %v2693_v36 = vpack.c.bf16 %v2576_v0, %v2575_v5  ;;  %v2560_v14 = vmul.f32 %v2081_v39, %v1516_v54  ;;  %2410 = vperm.xlu1 %4912, %v5704_v63   ;;  %v5714_v17 = vpop.eup %5713  ;;  %v1065_v21 = vadd.f32 1.0, %v5712_v7  ;;  %v1537_v54 = vld [vmem:[%s7524_s1 + $0x3b0] sm:$0xff]  ;;  %v4969_v39 = vld [vmem:[%s6139_s26 + $0x118] ss:$44 sps:$4 sm:$0xff]  }
 0x16a   : > { %v2076_v57 = vpop.permute.xlu0 %2075  ;;  %3512 = vmatmul.mubr.bf16.vlgmr.msra.gmra.mrb[32].mxu0 %v4949_v10  ;;  %v5716_v22 = vpop.eup %5715  ;;  %v1068_v11 = vadd.f32 1.0, %v5714_v17 }
 0x16b   : > { %v2559_v2 = vmul.f32 %v2076_v57, %v1515_v44  ;;  %2405 = vperm.xlu0 %4911, %v5706_v1   ;;  %4648 = vmatprep.subr.bf16.mxu1 %v2693_v36  ;;  %v5718_v24 = vpop.eup %5717  ;;  %5727 = vrcp.f32 %v1065_v21  ;;  %v1067_v26 = vadd.f32 1.0, %v5716_v22  ;;  %v1521_v36 = vld [vmem:[%s7524_s1 + $0x330] sm:$0xff] }
 0x16c   : > { %v2171_v4 = vpop.permute.xlu1 %2170  ;;  %3519 = vmatprep.mubr.bf16.mxu0 %v4955_v60  ;;  %v5720_v28 = vpop.eup %5719  ;;  %5729 = vrcp.f32 %v1068_v11  ;;  %v1070_v9 = vadd.f32 1.0, %v5718_v24  ;;  %v4973_v60 = vld [vmem:[%s6139_s26 + $0x174] ss:$44 sps:$4 sm:$0xff]  }
 0x16d   : > { %v2685_v31 = vpack.c.bf16 %v2560_v14, %v2559_v2  ;;  %v2578_v32 = vmul.f32 %v2171_v4, %v1534_v20  ;;  %2420 = vperm.xlu1 %4912, %v5708_v13   ;;  %v5722_v18 = vpop.eup %5721  ;;  %5731 = vrcp.f32 %v1067_v26  ;;  %v1069_v38 = vadd.f32 1.0, %v5720_v28  ;;  %v1540_v20 = vld [vmem:[%s7524_s1 + $0x3c8] sm:$0xff]  ;;  %v1539_v2 = vld [vmem:[%s7524_s1 + $0x3c0] sm:$0xff]  ;;  %v4975_v26 = vld [vmem:[%s6139_s26 + $0x170] ss:$44 sps:$4 sm:$0xff]  }
 0x16e   : > { %v2166_v30 = vpop.permute.xlu0 %2165  ;;  %v5724_v12 = vpop.eup %5723  ;;  %5733 = vrcp.f32 %v1070_v9  ;;  %v1523_v9 = vld [vmem:[%s7524_s1 + $0x340] sm:$0xff] }
 0x16f   : > { %v2577_v16 = vmul.f32 %v2166_v30, %v1533_v47  ;;  %2415 = vperm.xlu0 %4911, %v5710_v6   ;;  %4649 = vmatpush3.bf16.msra.mxu1 %v2685_v31  ;;  %v5726_v58 = vpop.eup %5725  ;;  %5735 = vrcp.f32 %v1069_v38  ;;  %v1522_v6 = vld [vmem:[%s7524_s1 + $0x338] sm:$0xff]  ;;  %v1524_v47 = vld [vmem:[%s7524_s1 + $0x348] sm:$0xff] }
 0x170   : > { %v2091_v40 = vpop.permute.xlu1 %2090  ;;  %v4979_v31 = vld [vmem:[%s6139_s26 + $0x1cc] ss:$44 sps:$4 sm:$0xff]  }
 0x171   : > { %v2694_v37 = vpack.c.bf16 %v2578_v32, %v2577_v16  ;;  %v2562_v23 = vmul.f32 %v2091_v40, %v1518_v34  ;;  %2430 = vperm.xlu1 %4912, %v5722_v18   ;;  %v1542_v38 = vld [vmem:[%s7524_s1 + $0x3d8] sm:$0xff] }
 0x172   : > { %v2086_v8 = vpop.permute.xlu0 %2085  ;;  %3520 = vmatmul.mubr.bf16.gmra.mrb[36].mxu0 %v4957_v35 }
 0x173   : > { %v2561_v19 = vmul.f32 %v2086_v8, %v1517_v56  ;;  %2425 = vperm.xlu0 %4911, %v5724_v12   ;;  %4650 = vmatprep.subr.bf16.mxu1 %v2694_v37  ;;  %v1541_v12 = vld [vmem:[%s7524_s1 + $0x3d0] sm:$0xff]  ;;  %v1526_v37 = vld [vmem:[%s7524_s1 + $0x358] sm:$0xff] }
 0x174   : > { %v2181_v33 = vpop.permute.xlu1 %2180  ;;  %3527 = vmatprep.mubr.bf16.mxu0 %v4961_v15  ;;  %v4984_v8 = vld [vmem:[%s6139_s26 + $0x224] ss:$44 sps:$4 sm:$0xff]  }
 0x175   : > { %v2686_v27 = vpack.c.bf16 %v2562_v23, %v2561_v19  ;;  %v2580_v48 = vmul.f32 %v2181_v33, %v1536_v41  ;;  %2440 = vperm.xlu1 %4912, %v5726_v58   ;;  %v5728_v46 = vpop.eup %5727  ;;  %v4981_v23 = vld [vmem:[%s6139_s26 + $0x1c8] ss:$44 sps:$4 sm:$0xff]  }
 0x176   : > { %v2176_v42 = vpop.permute.xlu0 %2175  ;;  %v5730_v51 = vpop.eup %5729  ;;  %v1525_v19 = vld [vmem:[%s7524_s1 + $0x350] sm:$0xff] }
 0x177   : > { %v2579_v52 = vmul.f32 %v2176_v42, %v1535_v45  ;;  %2435 = vperm.xlu0 %4911, %v5728_v46   ;;  %4651 = vmatpush3.bf16.msra.mxu1 %v2686_v27  ;;  %v5732_v59 = vpop.eup %5731 }
 0x178   : > { %v2101_v61 = vpop.permute.xlu1 %2100  ;;  %v5734_v53 = vpop.eup %5733 }
 0x179   : > { %v2695_v43 = vpack.c.bf16 %v2580_v48, %v2579_v52  ;;  %v2564_v55 = vmul.f32 %v2101_v61, %v1520_v49  ;;  %2450 = vperm.xlu1 %4912, %v5730_v51   ;;  %v5736_v1 = vpop.eup %5735  ;;  %v1544_v48 = vld [vmem:[%s7524_s1 + $0x3e8] sm:$0xff]  ;;  %v1543_v49 = vld [vmem:[%s7524_s1 + $0x3e0] sm:$0xff] }
 0x17a   : > { %v2096_v63 = vpop.permute.xlu0 %2095  ;;  %3528 = vmatmul.mubr.bf16.gmra.mrb[40].mxu0 %v4963_v50  ;;  %v4987_v61 = vld [vmem:[%s6139_s26 + $0x220] ss:$44 sps:$4 sm:$0xff]  }
 0x17b   : > { %v2563_v0 = vmul.f32 %v2096_v63, %v1519_v29  ;;  %2445 = vperm.xlu0 %4911, %v5732_v59   ;;  %4652 = vmatprep.subr.bf16.mxu1 %v2695_v43  ;;  %v1528_v59 = vld [vmem:[%s7524_s1 + $0x368] sm:$0xff] }
 0x17c   : > { %v2191_v3 = vpop.permute.xlu1 %2190  ;;  %3535 = vmatprep.mubr.bf16.mxu0 %v4967_v25  ;;  %v4990_v25 = vld [vmem:[%s6139_s26 + $0x27c] ss:$44 sps:$4 sm:$0xff]  }
 0x17d   : > { %v2687_v10 = vpack.c.bf16 %v2564_v55, %v2563_v0  ;;  %v2582_v13 = vmul.f32 %v2191_v3, %v1538_v62  ;;  %2460 = vperm.xlu1 %4912, %v5734_v53   ;;  %v1527_v55 = vld [vmem:[%s7524_s1 + $0x360] sm:$0xff]  ;;  %v1546_v0 = vld [vmem:[%s7524_s1 + $0x3f8] sm:$0xff] }
 0x17e   : > { %v2186_v5 = vpop.permute.xlu0 %2185 }
 0x17f   : > { %v2581_v44 = vmul.f32 %v2186_v5, %v1537_v54  ;;  %2455 = vperm.xlu0 %4911, %v5736_v1   ;;  %4653 = vmatpush3.bf16.msra.mxu1 %v2687_v10  ;;  %v1545_v54 = vld [vmem:[%s7524_s1 + $0x3f0] sm:$0xff] }
 0x180   : > { %v2111_v7 = vpop.permute.xlu1 %2110 }
 0x181   : > { %v2696_v14 = vpack.c.bf16 %v2582_v13, %v2581_v44  ;;  %v2566_v17 = vmul.f32 %v2111_v7, %v1522_v6  ;;  %v1564_v6 = vld [vmem:[%s7524_s1 + $0x488] sm:$0xff] }
 0x182   : > { %v2106_v57 = vpop.permute.xlu0 %2105  ;;  %3536 = vmatmul.mubr.bf16.gmra.mrb[44].mxu0 %v4969_v39  ;;  %v4993_v39 = vld [vmem:[%s6139_s26 + $0x278] ss:$44 sps:$4 sm:$0xff]  }
 0x183   : > { %v2565_v21 = vmul.f32 %v2106_v57, %v1521_v36  ;;  %4654 = vmatprep.subr.bf16.mxu1 %v2696_v14  ;;  %3543 = vmatprep.mubr.bf16.mxu0 %v4973_v60  ;;  %v5011_v60 = vld [vmem:[%s6139_s26 + $0x24] ss:$44 sps:$4 sm:$0xff]  }
 0x184   : > { %v2201_v22 = vpop.permute.xlu1 %2200  ;;  %v1563_v36 = vld [vmem:[%s7524_s1 + $0x480] sm:$0xff] }
 0x185   : > { %v2688_v11 = vpack.c.bf16 %v2566_v17, %v2565_v21  ;;  %v2584_v24 = vmul.f32 %v2201_v22, %v1540_v20  ;;  %v1530_v20 = vld [vmem:[%s7524_s1 + $0x378] sm:$0xff] }
 0x186   : > { %v2196_v4 = vpop.permute.xlu0 %2195 }
 0x187   : > { %v2583_v28 = vmul.f32 %v2196_v4, %v1539_v2  ;;  %4655 = vmatpush3.bf16.msra.mxu1 %v2688_v11  ;;  %v1529_v2 = vld [vmem:[%s7524_s1 + $0x370] sm:$0xff] }
 0x188   : > { %v2121_v32 = vpop.permute.xlu1 %2120 }
 0x189   : > { %v2697_v18 = vpack.c.bf16 %v2584_v24, %v2583_v28  ;;  %v2568_v30 = vmul.f32 %v2121_v32, %v1524_v47  ;;  %v1548_v47 = vld [vmem:[%s7524_s1 + $0x408] sm:$0xff] }
 0x18a   : > { %v2116_v34 = vpop.permute.xlu0 %2115  ;;  %3544 = vmatmul.mubr.bf16.gmra.mrb[48].mxu0 %v4975_v26 }
 0x18b   : > { %v2567_v35 = vmul.f32 %v2116_v34, %v1523_v9  ;;  %4656 = vmatprep.subr.bf16.mxu1 %v2697_v18  ;;  %3551 = vmatprep.mubr.bf16.mxu0 %v4979_v31  ;;  %v1547_v31 = vld [vmem:[%s7524_s1 + $0x400] sm:$0xff]  ;;  %v1566_v34 = vld [vmem:[%s7524_s1 + $0x498] sm:$0xff] }
 0x18c   : > { %v2211_v16 = vpop.permute.xlu1 %2210 }
 0x18d   : > { %v2689_v40 = vpack.c.bf16 %v2568_v30, %v2567_v35  ;;  %v2586_v56 = vmul.f32 %v2211_v16, %v1542_v38  ;;  %v4976_v30 = vld [vmem:[%s6139_s26 + $0x18] ss:$44 sps:$4 sm:$0xff]   ;;  %v4982_v35 = vld [vmem:[%s6139_s26 + $0x74] ss:$44 sps:$4 sm:$0xff]  }
 0x18e   : > { %v2206_v15 = vpop.permute.xlu0 %2205 }
 0x18f   : > { %v2585_v58 = vmul.f32 %v2206_v15, %v1541_v12  ;;  %4657 = vmatpush3.bf16.msra.mxu1 %v2689_v40  ;;  %v1565_v12 = vld [vmem:[%s7524_s1 + $0x490] sm:$0xff] }
 0x190   : > { %v2131_v41 = vpop.permute.xlu1 %2130 }
 0x191   : > { %v2698_v33 = vpack.c.bf16 %v2586_v56, %v2585_v58  ;;  %v2570_v45 = vmul.f32 %v2131_v41, %v1526_v37  ;;  %v1550_v37 = vld [vmem:[%s7524_s1 + $0x418] sm:$0xff] }
 0x192   : > { %v2126_v27 = vpop.permute.xlu0 %2125  ;;  %3552 = vmatmul.mubr.bf16.gmra.mrb[52].mxu0 %v4981_v23 }
 0x193   : > { %v2569_v46 = vmul.f32 %v2126_v27, %v1525_v19  ;;  %4658 = vmatprep.subr.bf16.mxu1 %v2698_v33  ;;  %3559 = vmatprep.mubr.bf16.mxu0 %v4984_v8  ;;  %v1549_v8 = vld [vmem:[%s7524_s1 + $0x410] sm:$0xff] }
 0x194   : > { %v2221_v42 = vpop.permute.xlu1 %2220  ;;  %v4986_v27 = vld [vmem:[%s6139_s26 + $0x70] ss:$44 sps:$4 sm:$0xff]  }
 0x195   : > { %v2690_v50 = vpack.c.bf16 %v2570_v45, %v2569_v46  ;;  %v2588_v51 = vmul.f32 %v2221_v42, %v1544_v48  ;;  %v1568_v45 = vld [vmem:[%s7524_s1 + $0x4a8] sm:$0xff] }
 0x196   : > { %v2216_v52 = vpop.permute.xlu0 %2215  ;;  %v4988_v46 = vld [vmem:[%s6139_s26 + $0xcc] ss:$44 sps:$4 sm:$0xff]  }
 0x197   : > { %v2587_v29 = vmul.f32 %v2216_v52, %v1543_v49  ;;  %4659 = vmatpush3.bf16.msra.mxu1 %v2690_v50  ;;  %v1567_v49 = vld [vmem:[%s7524_s1 + $0x4a0] sm:$0xff] }
 0x198   : > { %v2141_v43 = vpop.permute.xlu1 %2140 }
 0x199   : > { %v2699_v53 = vpack.c.bf16 %v2588_v51, %v2587_v29  ;;  %v2572_v63 = vmul.f32 %v2141_v43, %v1528_v59  ;;  %v1552_v59 = vld [vmem:[%s7524_s1 + $0x428] sm:$0xff] }
 0x19a   : > { %v2136_v62 = vpop.permute.xlu0 %2135  ;;  %3560 = vmatmul.mubr.bf16.gmra.mrb[56].mxu0 %v4987_v61 }
 0x19b   : > { %v2571_v1 = vmul.f32 %v2136_v62, %v1527_v55  ;;  %4660 = vmatprep.subr.bf16.mxu1 %v2699_v53  ;;  %3567 = vmatprep.mubr.bf16.mxu0 %v4990_v25  ;;  %v1551_v25 = vld [vmem:[%s7524_s1 + $0x420] sm:$0xff]  ;;  %v4992_v62 = vld [vmem:[%s6139_s26 + $0xc8] ss:$44 sps:$4 sm:$0xff]  }
 0x19c   : > { %v2231_v3 = vpop.permute.xlu1 %2230 }
 0x19d   : > { %v2691_v10 = vpack.c.bf16 %v2572_v63, %v2571_v1  ;;  %v2590_v13 = vmul.f32 %v2231_v3, %v1546_v0  ;;  %v1570_v63 = vld [vmem:[%s7524_s1 + $0x4b8] sm:$0xff]  ;;  %v4994_v1 = vld [vmem:[%s6139_s26 + $0x124] ss:$44 sps:$4 sm:$0xff]  }
 0x19e   : > { %v2226_v5 = vpop.permute.xlu0 %2225 }
 0x19f   : > { %v2589_v44 = vmul.f32 %v2226_v5, %v1545_v54  ;;  %4661 = vmatpush3.bf16.msra.mxu1 %v2691_v10  ;;  %v1569_v54 = vld [vmem:[%s7524_s1 + $0x4b0] sm:$0xff] }
 0x1a0   : > { %v2321_v7 = vpop.permute.xlu1 %2320 }
 0x1a1   : > { %v2700_v14 = vpack.c.bf16 %v2590_v13, %v2589_v44  ;;  %v2608_v17 = vmul.f32 %v2321_v7, %v1564_v6  ;;  %v1554_v6 = vld [vmem:[%s7524_s1 + $0x438] sm:$0xff] }
 0x1a2   : > { %v2316_v57 = vpop.permute.xlu0 %2315  ;;  %3568 = vmatmul.mubr.bf16.gmra.mrb[60].mxu0 %v4993_v39 }
 0x1a3   : > { %v2607_v21 = vmul.f32 %v2316_v57, %v1563_v36  ;;  %4662 = vmatprep.subr.bf16.mxu1 %v2700_v14  ;;  %3705 = vmatprep.mubr.bf16.mxu0 %v5011_v60  ;;  %v1553_v36 = vld [vmem:[%s7524_s1 + $0x430] sm:$0xff] }
 0x1a4   : > { %v2151_v22 = vpop.permute.xlu1 %2150 }
 0x1a5   : > { %v2709_v11 = vpack.c.bf16 %v2608_v17, %v2607_v21  ;;  %v2574_v24 = vmul.f32 %v2151_v22, %v1530_v20 }
 0x1a6   : > { %v2146_v4 = vpop.permute.xlu0 %2145 }
 0x1a7   : > { %v2573_v26 = vmul.f32 %v2146_v4, %v1529_v2  ;;  %4712 = vmatprep.subr.bf16.mxu0 %v2709_v11  ;;  %v1572_v2 = vld [vmem:[%s7524_s1 + $0x4c8] sm:$0xff] }
 0x1a8   : > { %v2241_v28 = vpop.permute.xlu1 %2240  ;;  %v4996_v11 = vld [vmem:[%s6139_s26 + $0x120] ss:$44 sps:$4 sm:$0xff]  }
 0x1a9   : > { %v2692_v32 = vpack.c.bf16 %v2574_v24, %v2573_v26  ;;  %v2592_v9 = vmul.f32 %v2241_v28, %v1548_v47  ;;  %v4997_v47 = vld [vmem:[%s6139_s26 + $0x17c] ss:$44 sps:$4 sm:$0xff]   ;;  %v1571_v28 = vld [vmem:[%s7524_s1 + $0x4c0] sm:$0xff] }
 0x1aa   : > { %v2236_v18 = vpop.permute.xlu0 %2235 }
 0x1ab   : > { %v2591_v38 = vmul.f32 %v2236_v18, %v1547_v31  ;;  %4663 = vmatpush3.bf16.msra.mxu1 %v2692_v32  ;;  %v1556_v18 = vld [vmem:[%s7524_s1 + $0x448] sm:$0xff] }
 0x1ac   : > { %v2331_v16 = vpop.permute.xlu1 %2330 }
 0x1ad   : > { %v2701_v40 = vpack.c.bf16 %v2592_v9, %v2591_v38  ;;  %v2610_v56 = vmul.f32 %v2331_v16, %v1566_v34  ;;  %v1555_v16 = vld [vmem:[%s7524_s1 + $0x440] sm:$0xff] }
 0x1ae   : > { %v2326_v15 = vpop.permute.xlu0 %2325  ;;  %3609 = vmatmul.mubr.bf16.vlgmr.msra.gmra.mrb[32].mxu1 %v4976_v30 }
 0x1af   : > { %v2609_v23 = vmul.f32 %v2326_v15, %v1565_v12  ;;  %4713 = vmatpush3.bf16.msra.mxu0 %v2701_v40  ;;  %3616 = vmatprep.mubr.bf16.mxu1 %v4982_v35 }
 0x1b0   : > { %v2251_v58 = vpop.permute.xlu1 %2250 }
 0x1b1   : > { %v2710_v41 = vpack.c.bf16 %v2610_v56, %v2609_v23  ;;  %v2594_v19 = vmul.f32 %v2251_v58, %v1550_v37  ;;  %v1574_v58 = vld [vmem:[%s7524_s1 + $0x4d8] sm:$0xff] }
 0x1b2   : > { %v2246_v33 = vpop.permute.xlu0 %2245 }
 0x1b3   : > { %v2593_v48 = vmul.f32 %v2246_v33, %v1549_v8  ;;  %4714 = vmatprep.subr.bf16.mxu0 %v2710_v41  ;;  %v4999_v8 = vld [vmem:[%s6139_s26 + $0x178] ss:$44 sps:$4 sm:$0xff]   ;;  %v5000_v33 = vld [vmem:[%s6139_s26 + $0x1d4] ss:$44 sps:$4 sm:$0xff]  }
 0x1b4   : > { %v2341_v42 = vpop.permute.xlu1 %2340 }
 0x1b5   : > { %v2702_v50 = vpack.c.bf16 %v2594_v19, %v2593_v48  ;;  %v2612_v51 = vmul.f32 %v2341_v42, %v1568_v45 }
 0x1b6   : > { %v2336_v52 = vpop.permute.xlu0 %2335  ;;  %3617 = vmatmul.mubr.bf16.gmra.mrb[36].mxu1 %v4986_v27  ;;  %v1573_v27 = vld [vmem:[%s7524_s1 + $0x4d0] sm:$0xff] }
 0x1b7   : > { %v2611_v61 = vmul.f32 %v2336_v52, %v1567_v49  ;;  %4715 = vmatpush3.bf16.msra.mxu0 %v2702_v50  ;;  %3624 = vmatprep.mubr.bf16.mxu1 %v4988_v46  ;;  %v1558_v49 = vld [vmem:[%s7524_s1 + $0x458] sm:$0xff] }
 0x1b8   : > { %v2261_v29 = vpop.permute.xlu1 %2260 }
 0x1b9   : > { %v2711_v43 = vpack.c.bf16 %v2612_v51, %v2611_v61  ;;  %v2596_v55 = vmul.f32 %v2261_v29, %v1552_v59  ;;  %v1557_v61 = vld [vmem:[%s7524_s1 + $0x450] sm:$0xff] }
 0x1ba   : > { %v2256_v53 = vpop.permute.xlu0 %2255 }
 0x1bb   : > { %v2595_v0 = vmul.f32 %v2256_v53, %v1551_v25  ;;  %4716 = vmatprep.subr.bf16.mxu0 %v2711_v43 }
 0x1bc   : > { %v2351_v3 = vpop.permute.xlu1 %2350 }
 0x1bd   : > { %v2703_v10 = vpack.c.bf16 %v2596_v55, %v2595_v0  ;;  %v2614_v13 = vmul.f32 %v2351_v3, %v1570_v63  ;;  %v5002_v0 = vld [vmem:[%s6139_s26 + $0x1d0] ss:$44 sps:$4 sm:$0xff]  }
 0x1be   : > { %v2346_v5 = vpop.permute.xlu0 %2345  ;;  %3625 = vmatmul.mubr.bf16.gmra.mrb[40].mxu1 %v4992_v62  ;;  %v4472_v39 = vpop.f32.mrb[0].mxu0  ;;  %v1576_v62 = vld [vmem:[%s7524_s1 + $0x4e8] sm:$0xff] }
 0x1bf   : > { %v2613_v44 = vmul.f32 %v2346_v5, %v1569_v54  ;;  %4717 = vmatpush3.bf16.msra.mxu0 %v2703_v10  ;;  %3632 = vmatprep.mubr.bf16.mxu1 %v4994_v1  ;;  %v4473_v60 = vpop.f32.mrb[1].mxu0  ;;  %v5003_v54 = vld [vmem:[%s6139_s26 + $0x22c] ss:$44 sps:$4 sm:$0xff]  }
 0x1c0   : > { %v2271_v7 = vpop.permute.xlu1 %2270  ;;  %v7066_v14 = vadd.f32 %v4473_v60, %v4472_v39  ;;  %v4475_v17 = vpop.f32.mrb[2].mxu0 }
 0x1c1   : > { %v2712_v57 = vpack.c.bf16 %v2614_v13, %v2613_v44  ;;  %v2598_v20 = vmul.f32 %v2271_v7, %v1554_v6  ;;  %v4476_v21 = vpop.f32.mrb[3].mxu0  ;;  %v1575_v13 = vld [vmem:[%s7524_s1 + $0x4e0] sm:$0xff]  ;;  %v1560_v44 = vld [vmem:[%s7524_s1 + $0x468] sm:$0xff] }
 0x1c2   : > { %v2266_v22 = vpop.permute.xlu0 %2265  ;;  %v7072_v24 = vadd.f32 %v4476_v21, %v4475_v17 }
 0x1c3   : > { %v2597_v4 = vmul.f32 %v2266_v22, %v1553_v36  ;;  %4718 = vmatprep.subr.bf16.mxu0 %v2712_v57  ;;  %v1559_v57 = vld [vmem:[%s7524_s1 + $0x460] sm:$0xff] }
 0x1c4   : > { %v2361_v26 = vpop.permute.xlu1 %2360 }
 0x1c5   : > { %v2704_v31 = vpack.c.bf16 %v2598_v20, %v2597_v4  ;;  %v2616_v32 = vmul.f32 %v2361_v26, %v1572_v2  ;;  %v5005_v26 = vld [vmem:[%s6139_s26 + $0x228] ss:$44 sps:$4 sm:$0xff]  }
 0x1c6   : > { %v2356_v9 = vpop.permute.xlu0 %2355  ;;  %3633 = vmatmul.mubr.bf16.gmra.mrb[44].mxu1 %v4996_v11  ;;  %v4478_v30 = vpop.f32.mrb[4].mxu0 }
 0x1c7   : > { %v2615_v34 = vmul.f32 %v2356_v9, %v1571_v28  ;;  %4719 = vmatpush3.bf16.msra.mxu0 %v2704_v31  ;;  %3640 = vmatprep.mubr.bf16.mxu1 %v4997_v47  ;;  %v4479_v38 = vpop.f32.mrb[5].mxu0  ;;  %v1578_v47 = vld [vmem:[%s7524_s1 + $0x4f8] sm:$0xff] }
 0x1c8   : > { %v2281_v35 = vpop.permute.xlu1 %2280  ;;  %v7084_v12 = vadd.f32 %v4479_v38, %v4478_v30  ;;  %v4481_v40 = vpop.f32.mrb[6].mxu0 }
 0x1c9   : > { %v2713_v56 = vpack.c.bf16 %v2616_v32, %v2615_v34  ;;  %v2600_v15 = vmul.f32 %v2281_v35, %v1556_v18  ;;  %v4482_v37 = vpop.f32.mrb[7].mxu0  ;;  %v5006_v32 = vld [vmem:[%s6139_s26 + $0x284] ss:$44 sps:$4 sm:$0xff]   ;;  %v1562_v35 = vld [vmem:[%s7524_s1 + $0x478] sm:$0xff] }
 0x1ca   : > { %v2276_v23 = vpop.permute.xlu0 %2275  ;;  %v7090_v41 = vadd.f32 %v4482_v37, %v4481_v40  ;;  %v1577_v18 = vld [vmem:[%s7524_s1 + $0x4f0] sm:$0xff] }
 0x1cb   : > { %v2599_v19 = vmul.f32 %v2276_v23, %v1555_v16  ;;  %4720 = vmatprep.subr.bf16.mxu0 %v2713_v56 }
 0x1cc   : > { %v2371_v45 = vpop.permute.xlu1 %2370 }
 0x1cd   : > { %v2705_v48 = vpack.c.bf16 %v2600_v15, %v2599_v19  ;;  %v2618_v46 = vmul.f32 %v2371_v45, %v1574_v58  ;;  %v1561_v15 = vld [vmem:[%s7524_s1 + $0x470] sm:$0xff]  ;;  %v1580_v45 = vld [vmem:[%s7524_s1 + $0x508] sm:$0xff] }
 0x1ce   : > { %v2366_v42 = vpop.permute.xlu0 %2365  ;;  %3641 = vmatmul.mubr.bf16.gmra.mrb[48].mxu1 %v4999_v8  ;;  %v4484_v50 = vpop.f32.mrb[8].mxu0 }
 0x1cf   : > { %v2617_v51 = vmul.f32 %v2366_v42, %v1573_v27  ;;  %4721 = vmatpush3.bf16.msra.mxu0 %v2705_v48  ;;  %3648 = vmatprep.mubr.bf16.mxu1 %v5000_v33  ;;  %v4485_v52 = vpop.f32.mrb[9].mxu0  ;;  %v5008_v27 = vld [vmem:[%s6139_s26 + $0x280] ss:$44 sps:$4 sm:$0xff]   ;;  %v5021_v42 = vld [vmem:[%s6139_s26 + $0x28] ss:$44 sps:$4 sm:$0xff]  }
 0x1d0   : > { %v2291_v59 = vpop.permute.xlu1 %2290  ;;  %v7102_v29 = vadd.f32 %v4485_v52, %v4484_v50  ;;  %v4487_v25 = vpop.f32.mrb[10].mxu0 }
 0x1d1   : > { %v2714_v43 = vpack.c.bf16 %v2618_v46, %v2617_v51  ;;  %v2602_v55 = vmul.f32 %v2291_v59, %v1558_v49  ;;  %v4488_v53 = vpop.f32.mrb[11].mxu0  ;;  %v1579_v51 = vld [vmem:[%s7524_s1 + $0x500] sm:$0xff] }
 0x1d2   : > { %v2286_v63 = vpop.permute.xlu0 %2285  ;;  %v7108_v1 = vadd.f32 %v4488_v53, %v4487_v25  ;;  %v5009_v25 = vld [vmem:[%s6139_s26 + $0x20] ss:$44 sps:$4 sm:$0xff]   ;;  %v5012_v53 = vld [vmem:[%s6139_s26 + $0x7c] ss:$44 sps:$4 sm:$0xff]  }
 0x1d3   : > { %v2601_v3 = vmul.f32 %v2286_v63, %v1557_v61  ;;  %4722 = vmatprep.subr.bf16.mxu0 %v2714_v43  ;;  %v1582_v43 = vld [vmem:[%s7524_s1 + $0x518] sm:$0xff] }
 0x1d4   : > { %v2381_v10 = vpop.permute.xlu1 %2380 }
 0x1d5   : > { %v2706_v5 = vpack.c.bf16 %v2602_v55, %v2601_v3  ;;  %v2620_v6 = vmul.f32 %v2381_v10, %v1576_v62 }
 0x1d6   : > { %v2376_v39 = vpop.permute.xlu0 %2375  ;;  %3649 = vmatmul.mubr.bf16.gmra.mrb[52].mxu1 %v5002_v0  ;;  %v4490_v60 = vpop.f32.mrb[12].mxu0  ;;  %v1581_v0 = vld [vmem:[%s7524_s1 + $0x510] sm:$0xff] }
 0x1d7   : > { %v2619_v7 = vmul.f32 %v2376_v39, %v1575_v13  ;;  %4723 = vmatpush3.bf16.msra.mxu0 %v2706_v5  ;;  %3656 = vmatprep.mubr.bf16.mxu1 %v5003_v54  ;;  %v4491_v36 = vpop.f32.mrb[13].mxu0  ;;  %v1584_v39 = vld [vmem:[%s7524_s1 + $0x528] sm:$0xff] }
 0x1d8   : > { %v2301_v17 = vpop.permute.xlu1 %2300  ;;  %v7120_v20 = vadd.f32 %v4491_v36, %v4490_v60  ;;  %v4493_v21 = vpop.f32.mrb[14].mxu0 }
 0x1d9   : > { %v2715_v22 = vpack.c.bf16 %v2620_v6, %v2619_v7  ;;  %v2604_v2 = vmul.f32 %v2301_v17, %v1560_v44  ;;  %v4494_v11 = vpop.f32.mrb[15].mxu0  ;;  %v1583_v17 = vld [vmem:[%s7524_s1 + $0x520] sm:$0xff] }
 0x1da   : > { %v2296_v4 = vpop.permute.xlu0 %2295  ;;  %v7126_v28 = vadd.f32 %v4494_v11, %v4493_v21  ;;  %v5014_v11 = vld [vmem:[%s6139_s26 + $0x78] ss:$44 sps:$4 sm:$0xff]  }
 0x1db   : > { %v2603_v31 = vmul.f32 %v2296_v4, %v1559_v57  ;;  %4724 = vmatprep.subr.bf16.mxu0 %v2715_v22 }
 0x1dc   : > { %v2391_v9 = vpop.permute.xlu1 %2390 }
 0x1dd   : > { %v2707_v30 = vpack.c.bf16 %v2604_v2, %v2603_v31  ;;  %v2622_v34 = vmul.f32 %v2391_v9, %v1578_v47  ;;  %v1586_v2 = vld [vmem:[%s7524_s1 + $0x538] sm:$0xff]  ;;  %v5015_v47 = vld [vmem:[%s6139_s26 + $0xd4] ss:$44 sps:$4 sm:$0xff]  }
 0x1de   : > { %v2386_v38 = vpop.permute.xlu0 %2385  ;;  %3657 = vmatmul.mubr.bf16.gmra.mrb[56].mxu1 %v5005_v26 }
 0x1df   : > { %v2621_v16 = vmul.f32 %v2386_v38, %v1577_v18  ;;  %4725 = vmatpush3.bf16.msra.mxu0 %v2707_v30  ;;  %3664 = vmatprep.mubr.bf16.mxu1 %v5006_v32  ;;  %v4496_v40 = vpop.f32.mrb[16].mxu0  ;;  %v1585_v32 = vld [vmem:[%s7524_s1 + $0x530] sm:$0xff] }
 0x1e0   : > { %v2311_v56 = vpop.permute.xlu1 %2310  ;;  %v4497_v37 = vpop.f32.mrb[17].mxu0 }
 0x1e1   : > { %v2716_v23 = vpack.c.bf16 %v2622_v34, %v2621_v16  ;;  %v2606_v58 = vmul.f32 %v2311_v56, %v1562_v35  ;;  %v7138_v8 = vadd.f32 %v4497_v37, %v4496_v40  ;;  %v4499_v19 = vpop.f32.mrb[18].mxu0  ;;  %v1588_v16 = vld [vmem:[%s7524_s1 + $0x548] sm:$0xff] }
 0x1e2   : > { %v2306_v33 = vpop.permute.xlu0 %2305  ;;  %v4500_v48 = vpop.f32.mrb[19].mxu0 }
 0x1e3   : > { %v2605_v46 = vmul.f32 %v2306_v33, %v1561_v15  ;;  %4726 = vmatprep.subr.bf16.mxu0 %v2716_v23  ;;  %v7145_v49 = vadd.f32 %v4500_v48, %v4499_v19  ;;  %v1587_v23 = vld [vmem:[%s7524_s1 + $0x540] sm:$0xff] }
 0x1e4   : > { %v2401_v50 = vpop.permute.xlu1 %2400 }
 0x1e5   : > { %v2708_v52 = vpack.c.bf16 %v2606_v58, %v2605_v46  ;;  %v2624_v59 = vmul.f32 %v2401_v50, %v1580_v45  ;;  %v1590_v45 = vld [vmem:[%s7524_s1 + $0x558] sm:$0xff] }
 0x1e6   : > { %v2396_v61 = vpop.permute.xlu0 %2395  ;;  %3665 = vmatmul.mubr.bf16.gmra.mrb[60].mxu1 %v5008_v27  ;;  %v5017_v27 = vld [vmem:[%s6139_s26 + $0xd0] ss:$44 sps:$4 sm:$0xff]   ;;  %v5018_v46 = vld [vmem:[%s6139_s26 + $0x12c] ss:$44 sps:$4 sm:$0xff]  }
 0x1e7   : > { %v2623_v55 = vmul.f32 %v2396_v61, %v1579_v51  ;;  %4727 = vmatpush3.bf16.msra.mxu0 %v2708_v52  ;;  %4805 = vmatprep.mubr.msk.bf16.mxu1 %vm3260_vm0, %v5021_v42  ;;  %v4502_v63 = vpop.f32.mrb[20].mxu0  ;;  %v1589_v51 = vld [vmem:[%s7524_s1 + $0x550] sm:$0xff] }
 0x1e8   : > { %v2411_v62 = vpop.permute.xlu1 %2410  ;;  %v4503_v3 = vpop.f32.mrb[21].mxu0 }
 0x1e9   : > { %v2717_v54 = vpack.c.bf16 %v2624_v59, %v2623_v55  ;;  %v2626_v10 = vmul.f32 %v2411_v62, %v1582_v43  ;;  %v7159_v13 = vadd.f32 %v4503_v3, %v4502_v63  ;;  %v4505_v5 = vpop.f32.mrb[22].mxu0 }
 0x1ea   : > { %v2406_v6 = vpop.permute.xlu0 %2405  ;;  %3706 = vmatmul.mubr.bf16.vlgmr.msra.gmra.mrb[64].mxu0 %v5009_v25  ;;  %v4506_v44 = vpop.f32.mrb[23].mxu0 }
 0x1eb   : > { %v2625_v60 = vmul.f32 %v2406_v6, %v1581_v0  ;;  %4791 = vmatprep.subr.bf16.mxu1 %v2717_v54  ;;  %3713 = vmatprep.mubr.bf16.mxu0 %v5012_v53  ;;  %v7164_v7 = vadd.f32 %v4506_v44, %v4505_v5  ;;  %v1592_v53 = vld [vmem:[%s7524_s1 + $0x568] sm:$0xff] }
 0x1ec   : > { %4792 = vmatpush3.bf16.msra.mxu1 %v2717_v54  ;;  %v2421_v36 = vpop.permute.xlu1 %2420  ;;  %v1591_v54 = vld [vmem:[%s7524_s1 + $0x560] sm:$0xff] }
 0x1ed   : > { %v2718_v57 = vpack.c.bf16 %v2626_v10, %v2625_v60  ;;  %v2628_v21 = vmul.f32 %v2421_v36, %v1584_v39  ;;  %v5020_v39 = vld [vmem:[%s6139_s26 + $0x128] ss:$44 sps:$4 sm:$0xff]   ;;  %v5023_v60 = vld [vmem:[%s6139_s26 + $0x184] ss:$44 sps:$4 sm:$0xff]  }
 0x1ee   : > { %v2416_v22 = vpop.permute.xlu0 %2415 }
 0x1ef   : > { %v2627_v4 = vmul.f32 %v2416_v22, %v1583_v17  ;;  %4793 = vmatprep.subr.bf16.mxu1 %v2718_v57  ;;  %v4508_v26 = vpop.f32.mrb[24].mxu0 }
 0x1f0   : > { %4794 = vmatpush3.bf16.msra.mxu1 %v2718_v57  ;;  %v2431_v31 = vpop.permute.xlu1 %2430  ;;  %v4509_v9 = vpop.f32.mrb[25].mxu0 }
 0x1f1   : > { %v2719_v18 = vpack.c.bf16 %v2628_v21, %v2627_v4  ;;  %v2630_v30 = vmul.f32 %v2431_v31, %v1586_v2  ;;  %v7177_v34 = vadd.f32 %v4509_v9, %v4508_v26  ;;  %v4511_v38 = vpop.f32.mrb[26].mxu0  ;;  %v5026_v26 = vld [vmem:[%s6139_s26 + $0xd8] ss:$44 sps:$4 sm:$0xff]   ;;  %v5028_v9 = vld [vmem:[%s6139_s26 + $0x1dc] ss:$44 sps:$4 sm:$0xff]  }
 0x1f2   : > { %v2426_v35 = vpop.permute.xlu0 %2425  ;;  %3714 = vmatmul.mubr.bf16.gmra.mrb[68].mxu0 %v5014_v11  ;;  %v4512_v40 = vpop.f32.mrb[27].mxu0  ;;  %v5022_v11 = vld [vmem:[%s6139_s26 + $0x80] ss:$44 sps:$4 sm:$0xff]  }
 0x1f3   : > { %v2629_v56 = vmul.f32 %v2426_v35, %v1585_v32  ;;  %4795 = vmatprep.subr.bf16.mxu1 %v2719_v18  ;;  %3721 = vmatprep.mubr.bf16.mxu0 %v5015_v47  ;;  %v7182_v15 = vadd.f32 %v4512_v40, %v4511_v38  ;;  %v5025_v32 = vld [vmem:[%s6139_s26 + $0x180] ss:$44 sps:$4 sm:$0xff]  }
 0x1f4   : > { %4796 = vmatpush3.bf16.msra.mxu1 %v2719_v18  ;;  %v2441_v37 = vpop.permute.xlu1 %2440 }
 0x1f5   : > { %v2720_v58 = vpack.c.bf16 %v2630_v30, %v2629_v56  ;;  %v2632_v19 = vmul.f32 %v2441_v37, %v1588_v16  ;;  %v5027_v16 = vld [vmem:[%s6139_s26 + $0x130] ss:$44 sps:$4 sm:$0xff]   ;;  %v5031_v56 = vld [vmem:[%s6139_s26 + $0x188] ss:$44 sps:$4 sm:$0xff]  }
 0x1f6   : > { %v2436_v33 = vpop.permute.xlu0 %2435 }
 0x1f7   : > { %v2631_v48 = vmul.f32 %v2436_v33, %v1587_v23  ;;  %4797 = vmatprep.subr.bf16.mxu1 %v2720_v58  ;;  %v4514_v42 = vpop.f32.mrb[28].mxu0  ;;  %v5030_v23 = vld [vmem:[%s6139_s26 + $0x1d8] ss:$44 sps:$4 sm:$0xff]  }
 0x1f8   : > { %4798 = vmatpush3.bf16.msra.mxu1 %v2720_v58  ;;  %v2451_v50 = vpop.permute.xlu1 %2450  ;;  %v4515_v52 = vpop.f32.mrb[29].mxu0  ;;  %v5033_v58 = vld [vmem:[%s6139_s26 + $0x234] ss:$44 sps:$4 sm:$0xff]  }
 0x1f9   : > { %v2721_v59 = vpack.c.bf16 %v2632_v19, %v2631_v48  ;;  %v2634_v61 = vmul.f32 %v2451_v50, %v1590_v45  ;;  %v7195_v25 = vadd.f32 %v4515_v52, %v4514_v42  ;;  %v4517_v43 = vpop.f32.mrb[30].mxu0  ;;  %v5032_v48 = vld [vmem:[%s6139_s26 + $0x1e0] ss:$44 sps:$4 sm:$0xff]   ;;  %v5036_v42 = vld [vmem:[%s6139_s26 + $0x238] ss:$44 sps:$4 sm:$0xff]  }
 0x1fa   : > { %v2446_v55 = vpop.permute.xlu0 %2445  ;;  %3722 = vmatmul.mubr.bf16.gmra.mrb[72].mxu0 %v5017_v27  ;;  %v4518_v63 = vpop.f32.mrb[31].mxu0  ;;  %v5038_v52 = vld [vmem:[%s6139_s26 + $0x28c] ss:$44 sps:$4 sm:$0xff]  }
 0x1fb   : > { %v2633_v62 = vmul.f32 %v2446_v55, %v1589_v51  ;;  %4799 = vmatprep.subr.bf16.mxu1 %v2721_v59  ;;  %3729 = vmatprep.mubr.bf16.mxu0 %v5018_v46  ;;  %v7200_v0 = vadd.f32 %v4518_v63, %v4517_v43  ;;  %v5035_v51 = vld [vmem:[%s6139_s26 + $0x230] ss:$44 sps:$4 sm:$0xff]  }
 0x1fc   : > { %4800 = vmatpush3.bf16.msra.mxu1 %v2721_v59  ;;  %v2461_v3 = vpop.permute.xlu1 %2460 }
 0x1fd   : > { %v2722_v10 = vpack.c.bf16 %v2634_v61, %v2633_v62  ;;  %v2636_v5 = vmul.f32 %v2461_v3, %v1592_v53  ;;  %v5040_v3 = vld [vmem:[%s6139_s26 + $0x288] ss:$44 sps:$4 sm:$0xff]  }
 0x1fe   : > { %v2456_v6 = vpop.permute.xlu0 %2455 }
 0x1ff   : > { %v2635_v44 = vmul.f32 %v2456_v6, %v1591_v54  ;;  %4801 = vmatprep.subr.bf16.mxu1 %v2722_v10  ;;  %v4536_v36 = vpop.f32.mrb[0].mxu1 }
 0x200   : > { %4802 = vmatpush3.bf16.msra.mxu1 %v2722_v10  ;;  %v4537_v17 = vpop.f32.mrb[1].mxu1 }
 0x201   : > { %v2723_v57 = vpack.c.bf16 %v2636_v5, %v2635_v44  ;;  %v4538_v21 = vadd.f32 %v4537_v17, %v4536_v36  ;;  %v4539_v22 = vpop.f32.mrb[2].mxu1 }
 0x202   : > { %3730 = vmatmul.mubr.bf16.gmra.mrb[76].mxu0 %v5020_v39  ;;  %v4540_v2 = vpop.f32.mrb[3].mxu1 }
 0x203   : > { %4803 = vmatprep.subr.bf16.mxu1 %v2723_v57  ;;  %3737 = vmatprep.mubr.bf16.mxu0 %v5023_v60  ;;  %v7209_v4 = vadd.f32 %v4538_v21, %v7066_v14  ;;  %v4541_v47 = vadd.f32 %v4540_v2, %v4539_v22 }
 0x204   : > { %4804 = vmatpush3.bf16.msra.mxu1 %v2723_v57 }
 0x205   : > { %v7213_v31 = vadd.f32 %v4541_v47, %v7072_v24 }
 0x207   : > { %4806 = vmatmul.mubr.msk.bf16.vlgmr.msra.gmra.mrb[64].mxu1 %vm3260_vm0, %v5022_v11  ;;  %v4542_v18 = vpop.f32.mrb[4].mxu1 }
 0x208   : > { %4809 = vmatprep.mubr.msk.bf16.mxu1 %vm3260_vm0, %v5026_v26  ;;  %v4543_v30 = vpop.f32.mrb[5].mxu1 }
 0x209   : > { %v4544_v38 = vadd.f32 %v4543_v30, %v4542_v18  ;;  %v4545_v14 = vpop.f32.mrb[6].mxu1 }
 0x20a   : > { %3738 = vmatmul.mubr.bf16.gmra.mrb[80].mxu0 %v5025_v32  ;;  %v4546_v35 = vpop.f32.mrb[7].mxu1 }
 0x20b   : > { %3745 = vmatprep.mubr.bf16.mxu0 %v5028_v9  ;;  %v7221_v24 = vadd.f32 %v4544_v38, %v7084_v12  ;;  %v4547_v40 = vadd.f32 %v4546_v35, %v4545_v14 }
 0x20d   : > { %v7225_v37 = vadd.f32 %v4547_v40, %v7090_v41 }
 0x20f   : > { %4810 = vmatmul.mubr.msk.bf16.gmra.mrb[68].mxu1 %vm3260_vm0, %v5027_v16  ;;  %v4548_v19 = vpop.f32.mrb[8].mxu1 }
 0x210   : > { %4813 = vmatprep.mubr.msk.bf16.mxu1 %vm3260_vm0, %v5031_v56  ;;  %v4549_v33 = vpop.f32.mrb[9].mxu1 }
 0x211   : > { %v4550_v45 = vadd.f32 %v4549_v33, %v4548_v19  ;;  %v4551_v27 = vpop.f32.mrb[10].mxu1 }
 0x212   : > { %3746 = vmatmul.mubr.bf16.gmra.mrb[84].mxu0 %v5030_v23  ;;  %v4552_v12 = vpop.f32.mrb[11].mxu1 }
 0x213   : > { %3753 = vmatprep.mubr.bf16.mxu0 %v5033_v58  ;;  %v7233_v41 = vadd.f32 %v4550_v45, %v7102_v29  ;;  %v4553_v46 = vadd.f32 %v4552_v12, %v4551_v27  ;;  %v5037_v29 = vld [vmem:[%s6139_s26 + $0x290] ss:$44 sps:$4 sm:$0xff]   ;;  %s175_s26 = sand.u32 1, %s5783_s12   ;;  %s3892_s12 = ssub.s32 (%p5871_p4), 29, %s6110_s30 }
 0x214   : > { %s4163_s22 = sshll.u32 %s175_s26, 7  ;;  %p3893_p8 = scmp.lt.s32.totalorder (%p5871_p4), %s3892_s12, 16 }
 0x215   : > { %v7237_v50 = vadd.f32 %v4553_v46, %v7108_v1  ;;  %s7381_s23 = scalar_lea.vmem [#allocation2], %s4163_s22  }
 0x217   : > { %4814 = vmatmul.mubr.msk.bf16.gmra.mrb[72].mxu1 %vm3260_vm0, %v5032_v48  ;;  %v4554_v59 = vpop.f32.mrb[12].mxu1 }
 0x218   : > { %4817 = vmatprep.mubr.msk.bf16.mxu1 %vm3260_vm0, %v5036_v42  ;;  %v4555_v61 = vpop.f32.mrb[13].mxu1 }
 0x219   : > { %v4556_v43 = vadd.f32 %v4555_v61, %v4554_v59  ;;  %v4557_v55 = vpop.f32.mrb[14].mxu1 }
 0x21a   : > { %3754 = vmatmul.mubr.bf16.gmra.mrb[88].mxu0 %v5035_v51  ;;  %v4558_v53 = vpop.f32.mrb[15].mxu1 }
 0x21b   : > { %3761 = vmatprep.mubr.bf16.mxu0 %v5038_v52  ;;  %v7245_v63 = vadd.f32 %v4556_v43, %v7120_v20  ;;  %v4559_v1 = vadd.f32 %v4558_v53, %v4557_v55 }
 0x21d   : > { %v7248_v62 = vadd.f32 %v4559_v1, %v7126_v28 }
 0x21f   : > { %4818 = vmatmul.mubr.msk.bf16.gmra.mrb[76].mxu1 %vm3260_vm0, %v5037_v29  ;;  %v4560_v54 = vpop.f32.mrb[16].mxu1 }
 0x220   : > { %v4561_v10 = vpop.f32.mrb[17].mxu1 }
 0x221   : > { %v4562_v5 = vadd.f32 %v4561_v10, %v4560_v54  ;;  %v4563_v6 = vpop.f32.mrb[18].mxu1 }
 0x222   : > { %3762 = vmatmul.mubr.bf16.gmra.mrb[92].mxu0 %v5040_v3  ;;  %v4564_v39 = vpop.f32.mrb[19].mxu1 }
 0x223   : > { %v7253_v44 = vadd.f32 %v4562_v5, %v7138_v8  ;;  %v4565_v60 = vadd.f32 %v4564_v39, %v4563_v6 }
 0x225   : > { %v7256_v20 = vadd.f32 %v4565_v60, %v7145_v49 }
 0x227   : > { %v4566_v36 = vpop.f32.mrb[20].mxu1 }
 0x228   : > { %v4567_v17 = vpop.f32.mrb[21].mxu1 }
 0x229   : > { %v4568_v28 = vadd.f32 %v4567_v17, %v4566_v36  ;;  %v4569_v57 = vpop.f32.mrb[22].mxu1 }
 0x22a   : > { %v4570_v21 = vpop.f32.mrb[23].mxu1 }
 0x22b   : > { %v7259_v22 = vadd.f32 %v4568_v28, %v7159_v13  ;;  %v4571_v2 = vadd.f32 %v4570_v21, %v4569_v57 }
 0x22d   : > { %v7262_v11 = vadd.f32 %v4571_v2, %v7164_v7 }
 0x22f   : > { %v4572_v47 = vpop.f32.mrb[24].mxu1 }
 0x230   : > { %v4573_v26 = vpop.f32.mrb[25].mxu1 }
 0x231   : > { %v4574_v8 = vadd.f32 %v4573_v26, %v4572_v47  ;;  %v4575_v32 = vpop.f32.mrb[26].mxu1 }
 0x232   : > { %v4576_v9 = vpop.f32.mrb[27].mxu1 }
 0x233   : > { %v7265_v49 = vadd.f32 %v4574_v8, %v7177_v34  ;;  %v4577_v18 = vadd.f32 %v4576_v9, %v4575_v32 }
 0x235   : > { %v7268_v30 = vadd.f32 %v4577_v18, %v7182_v15 }
 0x237   : > { %v4578_v38 = vpop.f32.mrb[28].mxu1 }
 0x238   : > { %v4579_v14 = vpop.f32.mrb[29].mxu1 }
 0x239   : > { %v4580_v13 = vadd.f32 %v4579_v14, %v4578_v38  ;;  %v4581_v35 = vpop.f32.mrb[30].mxu1 }
 0x23a   : > { %v4582_v16 = vpop.f32.mrb[31].mxu1 }
 0x23b   : > { %v7271_v7 = vadd.f32 %v4580_v13, %v7195_v25  ;;  %v4583_v40 = vadd.f32 %v4582_v16, %v4581_v35 }
 0x23d   : > { %v4600_v56 = vpop.f32.mrb[32].mxu0  ;;  %v7274_v23 = vadd.f32 %v4583_v40, %v7200_v0 }
 0x23e   : > { %v4601_v58 = vpop.f32.mrb[33].mxu0 }
 0x23f   : > { %v4602_v34 = vadd.f32 %v4601_v58, %v4600_v56  ;;  %v4603_v19 = vpop.f32.mrb[34].mxu0 }
 0x240   : > { %v4604_v33 = vpop.f32.mrb[35].mxu0 }
 0x241   : > { %v7277_v15 = vadd.f32 %v4602_v34, %v7209_v4  ;;  %v4605_v45 = vadd.f32 %v4604_v33, %v4603_v19 }
 0x243   : > { %v7280_v27 = vadd.f32 %v4605_v45, %v7213_v31 }
 0x245   : > { %v4606_v12 = vpop.f32.mrb[36].mxu0 }
 0x246   : > { %v4607_v48 = vpop.f32.mrb[37].mxu0 }
 0x247   : > { %v4608_v25 = vadd.f32 %v4607_v48, %v4606_v12  ;;  %v4609_v46 = vpop.f32.mrb[38].mxu0 }
 0x248   : > { %v4610_v42 = vpop.f32.mrb[39].mxu0 }
 0x249   : > { %v7283_v51 = vadd.f32 %v4608_v25, %v7221_v24  ;;  %v4611_v0 = vadd.f32 %v4610_v42, %v4609_v46 }
 0x24b   : > { %v7286_v52 = vadd.f32 %v4611_v0, %v7225_v37 }
 0x24d   : > { %v4612_v59 = vpop.f32.mrb[40].mxu0 }
 0x24e   : > { %v4613_v61 = vpop.f32.mrb[41].mxu0 }
 0x24f   : > { %v4614_v4 = vadd.f32 %v4613_v61, %v4612_v59  ;;  %v4615_v43 = vpop.f32.mrb[42].mxu0 }
 0x250   : > { %v4616_v55 = vpop.f32.mrb[43].mxu0 }
 0x251   : > { %v7289_v31 = vadd.f32 %v4614_v4, %v7233_v41  ;;  %v4617_v53 = vadd.f32 %v4616_v55, %v4615_v43 }
 0x253   : > { %v7292_v29 = vadd.f32 %v4617_v53, %v7237_v50 }
 0x255   : > { %v4618_v1 = vpop.f32.mrb[44].mxu0 }
 0x256   : > { %v4619_v3 = vpop.f32.mrb[45].mxu0 }
 0x257   : > { %v4620_v24 = vadd.f32 %v4619_v3, %v4618_v1  ;;  %v4621_v54 = vpop.f32.mrb[46].mxu0 }
 0x258   : > { %v4622_v10 = vpop.f32.mrb[47].mxu0 }
 0x259   : > { %v7295_v37 = vadd.f32 %v4620_v24, %v7245_v63  ;;  %v4623_v5 = vadd.f32 %v4622_v10, %v4621_v54 }
 0x25b   : > { %v7298_v6 = vadd.f32 %v4623_v5, %v7248_v62 }
 0x25d   : > { %v4624_v39 = vpop.f32.mrb[48].mxu0 }
 0x25e   : > { %v4625_v60 = vpop.f32.mrb[49].mxu0 }
 0x25f   : > { %v4626_v41 = vadd.f32 %v4625_v60, %v4624_v39  ;;  %v4627_v36 = vpop.f32.mrb[50].mxu0 }
 0x260   : > { %v4628_v17 = vpop.f32.mrb[51].mxu0 }
 0x261   : > { %v7301_v50 = vadd.f32 %v4626_v41, %v7253_v44  ;;  %v4629_v28 = vadd.f32 %v4628_v17, %v4627_v36 }
 0x263   : > { %v7304_v57 = vadd.f32 %v4629_v28, %v7256_v20 }
 0x265   : > { %v4630_v21 = vpop.f32.mrb[52].mxu0 }
 0x266   : > { %v4631_v2 = vpop.f32.mrb[53].mxu0 }
 0x267   : > { %v4632_v63 = vadd.f32 %v4631_v2, %v4630_v21  ;;  %v4633_v47 = vpop.f32.mrb[54].mxu0 }
 0x268   : > { %v4634_v26 = vpop.f32.mrb[55].mxu0 }
 0x269   : > { %v7307_v62 = vadd.f32 %v4632_v63, %v7259_v22  ;;  %v4635_v8 = vadd.f32 %v4634_v26, %v4633_v47 }
 0x26b   : > { %v7310_v32 = vadd.f32 %v4635_v8, %v7262_v11 }
 0x26d   : > { %v4636_v9 = vpop.f32.mrb[56].mxu0 }
 0x26e   : > { %v4637_v18 = vpop.f32.mrb[57].mxu0 }
 0x26f   : > { %v4638_v44 = vadd.f32 %v4637_v18, %v4636_v9  ;;  %v4639_v38 = vpop.f32.mrb[58].mxu0 }
 0x270   : > { %v4640_v14 = vpop.f32.mrb[59].mxu0 }
 0x271   : > { %v7313_v20 = vadd.f32 %v4638_v44, %v7265_v49  ;;  %v4641_v13 = vadd.f32 %v4640_v14, %v4639_v38 }
 0x273   : > { %v7316_v35 = vadd.f32 %v4641_v13, %v7268_v30 }
 0x275   : > { %v4642_v16 = vpop.f32.mrb[60].mxu0 }
 0x276   : > { %v4643_v40 = vpop.f32.mrb[61].mxu0 }
 0x277   : > { %v4644_v22 = vadd.f32 %v4643_v40, %v4642_v16  ;;  %v4645_v56 = vpop.f32.mrb[62].mxu0 }
 0x278   : > { %v4646_v58 = vpop.f32.mrb[63].mxu0 }
 0x279   : > { %v7319_v11 = vadd.f32 %v4644_v22, %v7271_v7  ;;  %v4647_v34 = vadd.f32 %v4646_v58, %v4645_v56 }
 0x27b   : > { %v7322_v19 = vadd.f32 %v4647_v34, %v7274_v23 }
 0x281   : > { %v4664_v33 = vpop.f32.mrb[32].mxu1 }
 0x282   : > { %v4665_v45 = vpop.f32.mrb[33].mxu1 }
 0x283   : > { %v4666_v49 = vadd.f32 %v4665_v45, %v4664_v33  ;;  %v4667_v12 = vpop.f32.mrb[34].mxu1 }
 0x284   : > { %v4668_v48 = vpop.f32.mrb[35].mxu1 }
 0x285   : > { %v7325_v30 = vadd.f32 %v4666_v49, %v7277_v15  ;;  %v4669_v25 = vadd.f32 %v4668_v48, %v4667_v12 }
 0x287   : > { %v7328_v46 = vadd.f32 %v4669_v25, %v7280_v27 }
 0x289   : > { %v4670_v42 = vpop.f32.mrb[36].mxu1 }
 0x28a   : > { %v4671_v0 = vpop.f32.mrb[37].mxu1 }
 0x28b   : > { %v4672_v7 = vadd.f32 %v4671_v0, %v4670_v42  ;;  %v4673_v59 = vpop.f32.mrb[38].mxu1 }
 0x28c   : > { %v4674_v61 = vpop.f32.mrb[39].mxu1 }
 0x28d   : > { %v7331_v23 = vadd.f32 %v4672_v7, %v7283_v51  ;;  %v4675_v4 = vadd.f32 %v4674_v61, %v4673_v59 }
 0x28f   : > { %v7334_v43 = vadd.f32 %v4675_v4, %v7286_v52 }
 0x291   : > { %v4676_v55 = vpop.f32.mrb[40].mxu1 }
 0x292   : > { %v4677_v53 = vpop.f32.mrb[41].mxu1 }
 0x293   : > { %v4678_v15 = vadd.f32 %v4677_v53, %v4676_v55  ;;  %v4679_v1 = vpop.f32.mrb[42].mxu1 }
 0x294   : > { %v4680_v3 = vpop.f32.mrb[43].mxu1 }
 0x295   : > { %v7337_v27 = vadd.f32 %v4678_v15, %v7289_v31  ;;  %v4681_v24 = vadd.f32 %v4680_v3, %v4679_v1 }
 0x297   : > { %v7340_v54 = vadd.f32 %v4681_v24, %v7292_v29 }
 0x299   : > { %v4682_v10 = vpop.f32.mrb[44].mxu1 }
 0x29a   : > { %v4683_v5 = vpop.f32.mrb[45].mxu1 }
 0x29b   : > { %v4684_v51 = vadd.f32 %v4683_v5, %v4682_v10  ;;  %v4685_v39 = vpop.f32.mrb[46].mxu1 }
 0x29c   : > { %v4686_v60 = vpop.f32.mrb[47].mxu1 }
 0x29d   : > { %v7343_v52 = vadd.f32 %v4684_v51, %v7295_v37  ;;  %v4687_v41 = vadd.f32 %v4686_v60, %v4685_v39 }
 0x29f   : > { %v7346_v36 = vadd.f32 %v4687_v41, %v7298_v6 }
 0x2a1   : > { %v4688_v17 = vpop.f32.mrb[48].mxu1 }
 0x2a2   : > { %v4689_v28 = vpop.f32.mrb[49].mxu1 }
 0x2a3   : > { %v4690_v31 = vadd.f32 %v4689_v28, %v4688_v17  ;;  %v4691_v21 = vpop.f32.mrb[50].mxu1 }
 0x2a4   : > { %v4692_v2 = vpop.f32.mrb[51].mxu1 }
 0x2a5   : > { %v7349_v29 = vadd.f32 %v4690_v31, %v7301_v50  ;;  %v4693_v63 = vadd.f32 %v4692_v2, %v4691_v21 }
 0x2a7   : > { %v7352_v47 = vadd.f32 %v4693_v63, %v7304_v57 }
 0x2a9   : > { %v4694_v26 = vpop.f32.mrb[52].mxu1 }
 0x2aa   : > { %v4695_v8 = vpop.f32.mrb[53].mxu1 }
 0x2ab   : > { %v4696_v37 = vadd.f32 %v4695_v8, %v4694_v26  ;;  %v4697_v9 = vpop.f32.mrb[54].mxu1 }
 0x2ac   : > { %v4698_v18 = vpop.f32.mrb[55].mxu1 }
 0x2ad   : > { %v7355_v6 = vadd.f32 %v4696_v37, %v7307_v62  ;;  %v4699_v44 = vadd.f32 %v4698_v18, %v4697_v9 }
 0x2af   : > { %v7358_v38 = vadd.f32 %v4699_v44, %v7310_v32 }
 0x2b1   : > { %v4700_v14 = vpop.f32.mrb[56].mxu1 }
 0x2b2   : > { %v4701_v13 = vpop.f32.mrb[57].mxu1 }
 0x2b3   : > { %v4702_v50 = vadd.f32 %v4701_v13, %v4700_v14  ;;  %v4703_v16 = vpop.f32.mrb[58].mxu1 }
 0x2b4   : > { %v4704_v40 = vpop.f32.mrb[59].mxu1 }
 0x2b5   : > { %v7361_v57 = vadd.f32 %v4702_v50, %v7313_v20  ;;  %v4705_v22 = vadd.f32 %v4704_v40, %v4703_v16 }
 0x2b7   : > { %v7364_v56 = vadd.f32 %v4705_v22, %v7316_v35 }
 0x2b9   : > { %v4706_v58 = vpop.f32.mrb[60].mxu1 }
 0x2ba   : > { %v4707_v34 = vpop.f32.mrb[61].mxu1 }
 0x2bb   : > { %v4708_v62 = vadd.f32 %v4707_v34, %v4706_v58  ;;  %v4709_v33 = vpop.f32.mrb[62].mxu1 }
 0x2bc   : > { %v4710_v45 = vpop.f32.mrb[63].mxu1 }
 0x2bd   : > { %v7367_v32 = vadd.f32 %v4708_v62, %v7319_v11  ;;  %v4711_v49 = vadd.f32 %v4710_v45, %v4709_v33  ;;  %v4728_v12 = vpop.f32.mrb[64].mxu0 }
 0x2be   : > { %v4729_v48 = vpop.f32.mrb[65].mxu0 }
 0x2bf   : > { %v7370_v25 = vadd.f32 %v4711_v49, %v7322_v19  ;;  %v4730_v20 = vadd.f32 %v4729_v48, %v4728_v12  ;;  %v4731_v42 = vpop.f32.mrb[66].mxu0 }
 0x2c0   : > { %v4732_v0 = vpop.f32.mrb[67].mxu0 }
 0x2c1   : > { %v4733_v7 = vadd.f32 %v4732_v0, %v4731_v42  ;;  %v3708_v35 = vadd.f32 %v4730_v20, %v7325_v30 }
 0x2c3   : > { %v3711_v59 = vadd.f32 %v4733_v7, %v7328_v46 }
 0x2c5   : > { %v4734_v61 = vpop.f32.mrb[68].mxu0 }
 0x2c6   : > { %v4735_v4 = vpop.f32.mrb[69].mxu0 }
 0x2c7   : > { %v4736_v55 = vadd.f32 %v4735_v4, %v4734_v61  ;;  %v4737_v11 = vpop.f32.mrb[70].mxu0 }
 0x2c8   : > { %v4738_v53 = vpop.f32.mrb[71].mxu0 }
 0x2c9   : > { %v4739_v15 = vadd.f32 %v4738_v53, %v4737_v11  ;;  %v3716_v1 = vadd.f32 %v4736_v55, %v7331_v23 }
 0x2cb   : > { %v3719_v19 = vadd.f32 %v4739_v15, %v7334_v43 }
 0x2cd   : > { %v4740_v3 = vpop.f32.mrb[72].mxu0 }
 0x2ce   : > { %v4741_v24 = vpop.f32.mrb[73].mxu0 }
 0x2cf   : > { %v4742_v10 = vadd.f32 %v4741_v24, %v4740_v3  ;;  %v4743_v5 = vpop.f32.mrb[74].mxu0 }
 0x2d0   : > { %v4744_v51 = vpop.f32.mrb[75].mxu0 }
 0x2d1   : > { %v4745_v39 = vadd.f32 %v4744_v51, %v4743_v5  ;;  %v3724_v30 = vadd.f32 %v4742_v10, %v7337_v27 }
 0x2d3   : > { %v3727_v46 = vadd.f32 %v4745_v39, %v7340_v54 }
 0x2d5   : > { %v4746_v60 = vpop.f32.mrb[76].mxu0 }
 0x2d6   : > { %v4747_v41 = vpop.f32.mrb[77].mxu0 }
 0x2d7   : > { %v4748_v17 = vadd.f32 %v4747_v41, %v4746_v60  ;;  %v4749_v28 = vpop.f32.mrb[78].mxu0 }
 0x2d8   : > { %v4750_v31 = vpop.f32.mrb[79].mxu0 }
 0x2d9   : > { %v4751_v23 = vadd.f32 %v4750_v31, %v4749_v28  ;;  %v3732_v43 = vadd.f32 %v4748_v17, %v7343_v52 }
 0x2da   : > { %v4807_v21 = vpop.f32.mrb[64].mxu1 }
 0x2db   : > { %v3813_v2 = vadd.f32 %v4807_v21, %v3716_v1  ;;  %v3804_v63 = vpop.f32.mrb[65].mxu1  ;;  %v3735_v26 = vadd.f32 %v4751_v23, %v7346_v36 }
 0x2dc   : > { %v3805_v8 = vadd.f32 %v3804_v63, %v3708_v35  ;;  %v4808_v27 = vpop.f32.mrb[66].mxu1 }
 0x2dd   : > { %3870 = vst.msk [vmem:[%s7381_s23 + $0x10] sm:$0xff] %vm3867_vm1, %v3813_v2  ;;  %v3816_v54 = vadd.f32 %v4808_v27, %v3719_v19  ;;  %v4752_v37 = vpop.f32.mrb[80].mxu0  ;;  %v3807_v9 = vpop.f32.mrb[67].mxu1 }
 0x2de   : > { %3868 = vst.msk [vmem:[%s7381_s23] sm:$0xff] %vm3867_vm1, %v3805_v8  ;;  %v3808_v52 = vadd.f32 %v3807_v9, %v3711_v59  ;;  %v4753_v18 = vpop.f32.mrb[81].mxu0 }
 0x2df   : > { %3871 = vst.msk [vmem:[%s7381_s23 + $0x18] sm:$0xff] %vm3867_vm1, %v3816_v54  ;;  %v4754_v36 = vadd.f32 %v4753_v18, %v4752_v37  ;;  %v4755_v44 = vpop.f32.mrb[82].mxu0 }
 0x2e0   : > { %3869 = vst.msk [vmem:[%s7381_s23 + $0x8] sm:$0xff] %vm3867_vm1, %v3808_v52  ;;  %v4756_v14 = vpop.f32.mrb[83].mxu0 }
 0x2e1   : > { %v4757_v13 = vadd.f32 %v4756_v14, %v4755_v44  ;;  %v3740_v50 = vadd.f32 %v4754_v36, %v7349_v29 }
 0x2e2   : > { %v4811_v16 = vpop.f32.mrb[68].mxu1 }
 0x2e3   : > { %v3829_v40 = vadd.f32 %v4811_v16, %v3732_v43  ;;  %v3820_v22 = vpop.f32.mrb[69].mxu1  ;;  %v3743_v58 = vadd.f32 %v4757_v13, %v7352_v47 }
 0x2e4   : > { %v3821_v34 = vadd.f32 %v3820_v22, %v3724_v30  ;;  %v4812_v62 = vpop.f32.mrb[70].mxu1 }
 0x2e5   : > { %3874 = vst.msk [vmem:[%s7381_s23 + $0x30] sm:$0xff] %vm3867_vm1, %v3829_v40  ;;  %v3832_v33 = vadd.f32 %v4812_v62, %v3735_v26  ;;  %v4758_v45 = vpop.f32.mrb[84].mxu0  ;;  %v3823_v49 = vpop.f32.mrb[71].mxu1 }
 0x2e6   : > { %3872 = vst.msk [vmem:[%s7381_s23 + $0x20] sm:$0xff] %vm3867_vm1, %v3821_v34  ;;  %v3824_v12 = vadd.f32 %v3823_v49, %v3727_v46  ;;  %v4759_v48 = vpop.f32.mrb[85].mxu0 }
 0x2e7   : > { %3875 = vst.msk [vmem:[%s7381_s23 + $0x38] sm:$0xff] %vm3867_vm1, %v3832_v33  ;;  %v4760_v29 = vadd.f32 %v4759_v48, %v4758_v45  ;;  %v4761_v20 = vpop.f32.mrb[86].mxu0 }
 0x2e8   : > { %3873 = vst.msk [vmem:[%s7381_s23 + $0x28] sm:$0xff] %vm3867_vm1, %v3824_v12  ;;  %v4762_v47 = vpop.f32.mrb[87].mxu0 }
 0x2e9   : > { %v4763_v42 = vadd.f32 %v4762_v47, %v4761_v20  ;;  %v3748_v0 = vadd.f32 %v4760_v29, %v7355_v6 }
 0x2ea   : > { %v4815_v7 = vpop.f32.mrb[72].mxu1 }
 0x2eb   : > { %v3845_v35 = vadd.f32 %v4815_v7, %v3748_v0  ;;  %v3836_v59 = vpop.f32.mrb[73].mxu1  ;;  %v3751_v61 = vadd.f32 %v4763_v42, %v7358_v38 }
 0x2ec   : > { %v3837_v4 = vadd.f32 %v3836_v59, %v3740_v50  ;;  %v4816_v55 = vpop.f32.mrb[74].mxu1 }
 0x2ed   : > { %3878 = vst.msk [vmem:[%s7381_s23 + $0x50] sm:$0xff] %vm3867_vm1, %v3845_v35  ;;  %v3848_v11 = vadd.f32 %v4816_v55, %v3751_v61  ;;  %v4764_v53 = vpop.f32.mrb[88].mxu0  ;;  %v3839_v15 = vpop.f32.mrb[75].mxu1 }
 0x2ee   : > { %3876 = vst.msk [vmem:[%s7381_s23 + $0x40] sm:$0xff] %vm3867_vm1, %v3837_v4  ;;  %v3840_v1 = vadd.f32 %v3839_v15, %v3743_v58  ;;  %v4765_v19 = vpop.f32.mrb[89].mxu0 }
 0x2ef   : > { %3879 = vst.msk [vmem:[%s7381_s23 + $0x58] sm:$0xff] %vm3867_vm1, %v3848_v11  ;;  %v4766_v6 = vadd.f32 %v4765_v19, %v4764_v53  ;;  %v4767_v3 = vpop.f32.mrb[90].mxu0 }
 0x2f0   : > { %3877 = vst.msk [vmem:[%s7381_s23 + $0x48] sm:$0xff] %vm3867_vm1, %v3840_v1  ;;  %v4768_v38 = vpop.f32.mrb[91].mxu0 }
 0x2f1   : > { %v4769_v24 = vadd.f32 %v4768_v38, %v4767_v3  ;;  %v3756_v10 = vadd.f32 %v4766_v6, %v7361_v57 }
 0x2f2   : > { %v4819_v5 = vpop.f32.mrb[76].mxu1 }
 0x2f3   : > { %v3852_v51 = vpop.f32.mrb[77].mxu1  ;;  %v3759_v39 = vadd.f32 %v4769_v24, %v7364_v56 }
 0x2f4   : > { %v3853_v30 = vadd.f32 %v3852_v51, %v3756_v10  ;;  %v4820_v46 = vpop.f32.mrb[78].mxu1 }
 0x2f5   : > { %v4770_v60 = vpop.f32.mrb[92].mxu0  ;;  %v3855_v41 = vpop.f32.mrb[79].mxu1 }
 0x2f6   : > { %3880 = vst.msk [vmem:[%s7381_s23 + $0x60] sm:$0xff] %vm3867_vm1, %v3853_v30  ;;  %v3856_v17 = vadd.f32 %v3855_v41, %v3759_v39  ;;  %v4771_v28 = vpop.f32.mrb[93].mxu0 }
 0x2f7   : > { %v4772_v31 = vadd.f32 %v4771_v28, %v4770_v60  ;;  %v4773_v23 = vpop.f32.mrb[94].mxu0 }
 0x2f8   : > { %3881 = vst.msk [vmem:[%s7381_s23 + $0x68] sm:$0xff] %vm3867_vm1, %v3856_v17  ;;  %v4774_v43 = vpop.f32.mrb[95].mxu0 }
 0x2f9   : > { %v3764_v57 = vadd.f32 %v4772_v31, %v7367_v32  ;;  %v4775_v21 = vadd.f32 %v4774_v43, %v4773_v23  ;;  %3890 = sbr.rel (!%p5871_p4) target bundleno = 817 (0x331), region = 36 }
 0x2fb   : > { %v3861_v2 = vadd.f32 %v4819_v5, %v3764_v57  ;;  %v3767_v56 = vadd.f32 %v4775_v21, %v7370_v25 }
 0x2fd   : > { %3882 = vst.msk [vmem:[%s7381_s23 + $0x70] sm:$0xff] %vm3867_vm1, %v3861_v2  ;;  %v3864_v63 = vadd.f32 %v4820_v46, %v3767_v56 }
 0x2ff   : > { %3883 = vst.msk [vmem:[%s7381_s23 + $0x78] sm:$0xff] %vm3867_vm1, %v3864_v63 }
 0x300   : > { %s7535_s12 = smov (!%p3893_p8, %s3892_s12), 16 }
 0x301   : > { %s4438_s29 = sshll.u32 %s7535_s12, 7 }
 0x302   : > { %p4441_p9 = scmp.eq.s32.totalorder %s4438_s29, 0 }
 0x303   : > { %s7436_s4 = sshrl.u32 (!%p4441_p9), %s7535_s12, 4 }
 0x304   : > { %3901 = sbr.rel (%p4441_p9) target bundleno = 817 (0x331), region = 40  ;;  %p4442_p10 = scmp.le.s32.totalorder (!%p4441_p9), %s7436_s4, 0 }
 0x30b   : > { %4115 = sbr.rel (%p4442_p10) target bundleno = 796 (0x31c), region = 116  ;;  %s7528_s15 = smov (!%p4442_p10), %s7430_s28 }
 0x30c   : > { %s7529_s20 = smov (!%p4442_p10), %s7381_s23  ;;  %s7445_s30 = smov (!%p4442_p10), 0  }
 0x30d   : > { %s7447_s5 = smov (!%p4442_p10), 0  }
 0x312 LB: >> { %v3993_v32 = vld [vmem:[%s5799_s20] sm:$0xff]  ;;  %v3995_v25 = vld [vmem:[%s5799_s20 + $0x8] sm:$0xff]  ;;  %v3997_v26 = vld [vmem:[%s5799_s20 + $0x10] sm:$0xff]  ;;  %s4025_s6 = sadd.s32 1, %s5803_s30  ;;  %s3987_s5 = sadd.s32 1, %s5807_s5   ;;  %s5807_s5 = sphi %s7447_s5, %s3987_s5   ;;  %s5803_s30 = sphi %s7445_s30, %s7530_s30   ;;  %s5799_s20 = sphi %s7529_s20, %s4030_s20   ;;  %s5795_s15 = sphi %s7528_s15, %s4031_s15  }
 0x313   : >> { %3994 = vst [vmem:[%s5795_s15] sm:$0xff] %v3993_v32  ;;  %3996 = vst [vmem:[%s5795_s15 + $0x8] sm:$0xff] %v3995_v25  ;;  %v3999_v8 = vld [vmem:[%s5799_s20 + $0x18] sm:$0xff]  ;;  %v4001_v27 = vld [vmem:[%s5799_s20 + $0x20] sm:$0xff]  ;;  %p4026_p11 = scmp.ge.s32.totalorder %s4025_s6, %s7436_s4  ;;  %p3986_p12 = scmp.ge.s32.totalorder %s3987_s5, %s7436_s4 }
 0x314   : >> { %3998 = vst [vmem:[%s5795_s15 + $0x10] sm:$0xff] %v3997_v26  ;;  %v4003_v54 = vld [vmem:[%s5799_s20 + $0x28] sm:$0xff]  ;;  %4000 = vst [vmem:[%s5795_s15 + $0x18] sm:$0xff] %v3999_v8  ;;  %v4005_v37 = vld [vmem:[%s5799_s20 + $0x30] sm:$0xff] }
 0x315   : >> { %4002 = vst [vmem:[%s5795_s15 + $0x20] sm:$0xff] %v4001_v27  ;;  %4004 = vst [vmem:[%s5795_s15 + $0x28] sm:$0xff] %v4003_v54  ;;  %v4007_v9 = vld [vmem:[%s5799_s20 + $0x38] sm:$0xff]  ;;  %v4009_v52 = vld [vmem:[%s5799_s20 + $0x40] sm:$0xff]  ;;  %s7537_s6 = smov (%p4026_p11, %s4025_s6), 0  ;;  %3989 = sbr.rel (!%p3986_p12) target bundleno = 786 (0x312), region = 122 }
 0x316   : >> { %4006 = vst [vmem:[%s5795_s15 + $0x30] sm:$0xff] %v4005_v37  ;;  %4008 = vst [vmem:[%s5795_s15 + $0x38] sm:$0xff] %v4007_v9  ;;  %v4011_v18 = vld [vmem:[%s5799_s20 + $0x48] sm:$0xff]  ;;  %v4013_v36 = vld [vmem:[%s5799_s20 + $0x50] sm:$0xff]  ;;  %s4443_s7 = sshll.u32 %s7537_s6, 7  ;;  %s7530_s30 = smov %s7537_s6 }
 0x317   : >> { %4010 = vst [vmem:[%s5795_s15 + $0x40] sm:$0xff] %v4009_v52  ;;  %v4015_v44 = vld [vmem:[%s5799_s20 + $0x58] sm:$0xff]  ;;  %4012 = vst [vmem:[%s5795_s15 + $0x48] sm:$0xff] %v4011_v18  ;;  %v4017_v14 = vld [vmem:[%s5799_s20 + $0x60] sm:$0xff] }
 0x318   : >> { %4014 = vst [vmem:[%s5795_s15 + $0x50] sm:$0xff] %v4013_v36  ;;  %4016 = vst [vmem:[%s5795_s15 + $0x58] sm:$0xff] %v4015_v44  ;;  %v4019_v13 = vld [vmem:[%s5799_s20 + $0x68] sm:$0xff]  ;;  %v4021_v50 = vld [vmem:[%s5799_s20 + $0x70] sm:$0xff] }
 0x319   : >> { %4018 = vst [vmem:[%s5795_s15 + $0x60] sm:$0xff] %v4017_v14  ;;  %4020 = vst [vmem:[%s5795_s15 + $0x68] sm:$0xff] %v4019_v13  ;;  %v4023_v16 = vld [vmem:[%s5799_s20 + $0x78] sm:$0xff]  ;;  %s4030_s20 = scalar_lea.vmem %s7381_s23, %s4443_s7 [#allocation2]  }
 0x31a   : >> { %4022 = vst [vmem:[%s5795_s15 + $0x70] sm:$0xff] %v4021_v50  ;;  %4024 = vst [vmem:[%s5795_s15 + $0x78] sm:$0xff] %v4023_v16  ;;  %s4031_s15 = scalar_lea.vmem %s7430_s28, %s4443_s7  }
 0x31c PF: > { %s7505_s8 = sand.u32 15, %s7535_s12   ;;  %s4454_s9 = sshll.u32 %s7436_s4, 7 }
 0x31d   : > { %s4036_s10 = scalar_lea.vmem %s7381_s23, %s4454_s9 [#allocation2]   ;;  %s4038_s11 = scalar_lea.vmem %s7430_s28, %s4454_s9  }
 0x31e   : > { %p4448_p13 = scmp.le.s32.totalorder %s7505_s8, 0 }
 0x31f   : > { %s5809_s14 = smov (!%p4448_p13), %s4038_s11   ;;  %s5813_s17 = smov (!%p4448_p13), %s4036_s10  }
 0x320   : > { %4129 = sbr.rel (%p4448_p13) target bundleno = 817 (0x331), region = 127  ;;  %s5817_s18 = smov (!%p4448_p13), 0  }
 0x321   : > { %s5821_s21 = smov (!%p4448_p13), 0  }
 0x327 LB: >> { %v4048_v40 = vld [vmem:[%s5815_s17] sm:$0xff]  ;;  %s4050_s26 = sadd.s32 1, %s5819_s18  ;;  %s4042_s21 = sadd.s32 1, %s5823_s21   ;;  %s5823_s21 = sphi %s5821_s21, %s4042_s21   ;;  %s5819_s18 = sphi %s5817_s18, %s5818_s18   ;;  %s5815_s17 = sphi %s5813_s17, %s4055_s17   ;;  %s5811_s14 = sphi %s5809_s14, %s4056_s14  }
 0x328   : >> { %4049 = vst [vmem:[%s5811_s14] sm:$0xff] %v4048_v40  ;;  %p4051_p0 = scmp.ge.s32.totalorder %s4050_s26, %s7505_s8  ;;  %p4041_p1 = scmp.ge.s32.totalorder %s4042_s21, %s7505_s8 }
 0x32a   : >> { %s7539_s26 = smov (%p4051_p0, %s4050_s26), 0  ;;  %4044 = sbr.rel (!%p4041_p1) target bundleno = 807 (0x327), region = 133 }
 0x32b   : >> { %s4449_s22 = sshll.u32 %s7539_s26, 3  ;;  %s5818_s18 = smov %s7539_s26  }
 0x32c   : >> { %s4055_s17 = scalar_lea.vmem %s4036_s10, %s4449_s22 [#allocation2]   ;;  %s4056_s14 = scalar_lea.vmem %s4038_s11, %s4449_s22  }
 0x331 PF: > { %p10_p2 = scmp.ge.s32.totalorder %s5861_s16, 4   ;;  %s7531_s12 = smov %s5787_s13 }
 0x332   : > { %s7532_s13 = smov %s5869_s19  ;;  %s7533_s14 = smov %s5861_s16 }
 0x333   :  { %12 = sbr.rel (!%p10_p2) target bundleno = 2 (0x2), region = 144 }

</bundles_post_ra>
